<compile_context>
chip_gen: v7x
topology: tpu7x:2x2x1
jax: 0.10.0
libtpu: 0.0.40
codegen_flags: <defaults>
</compile_context>

<pallas_src>
import numpy as np
import jax
import jax.numpy as jnp
from jax.experimental import pallas as pl
from jax.experimental.pallas import tpu as pltpu

# ---- NET_custom hyper-parameters (module defaults) ------------------------------------
NFEAT = 288            # nfeatures
NQ = NFEAT // 4        # 72   ("N" in the PyTorch code, width of Q1)
M = 20                 # embedding channels
MB = 6                 # rows kept for matS
ENET_H = 50            # embedding-net hidden width
FNET_H = 50            # fitting-net hidden width
ENET_OUT = M * NQ      # 1440
FNET_IN = M * MB       # 120
HP = 128               # padded hidden width (lane-dense)
EW = 1536              # lane-padded embedding-output width (>= 1440, multiple of 128)
SEG = 32               # lane stride of each j-block inside the packed matT tile (4*32=128)
OUT_PAD = 128          # lane-dense padded output width (real result is 3 wide)
BN_EPS = 1e-5
NEG_SLOPE = 0.01       # F.leaky_relu default


def _lrelu(v):
    # activation stays in f32 on the VPU; cast to bf16 only right before each dot
    return jnp.where(v > 0, v, NEG_SLOPE * v)


def net_kernel(xq_ref,
               ew1_ref, eb1_ref, ew2_ref, eb2_ref, ew3_ref, eb3_ref,
               repl_ref, gseg_ref, pab_ref,
               fw1_ref, fb1_ref, fw2_ref, fb2_ref, fw3_ref, fb3_ref,
               gw_ref, o_ref):
    """Fused NET_custom forward for one (TB, ...) batch tile."""
    f32 = jnp.float32
    bf16 = jnp.bfloat16
    xq = xq_ref[...]                                   # (TB, 4*128) f32, j-major, aligned

    # ---------------- embedding net: Q1 -> 128 -> 128 -> EW  (BN1/BN2 folded) ----------
    q1 = xq[:, 0:HP].astype(bf16)                      # Q1 == j=0 block of xq
    h = jnp.dot(q1, ew1_ref[...], preferred_element_type=f32) + eb1_ref[...]
    h = _lrelu(h)
    h = jnp.dot(h.astype(bf16), ew2_ref[...], preferred_element_type=f32) + eb2_ref[...]
    h = _lrelu(h)
    e = jnp.dot(h.astype(bf16), ew3_ref[...], preferred_element_type=f32) + eb3_ref[...]   # (TB, EW)

    # ---------------- matT packed: lane j*SEG + m holds matT[b, m, j] -------------------
    # Per j: replicate xj over the 20 m-segments with a constant 0/1 bf16 MXU matmul,
    # multiply by e (f32 VPU), then segment-sum with a constant 0/1 bf16 matmul whose
    # output columns already land at lane j*SEG + m (packing comes out of the matmul).
    t_packed = None
    for j in range(4):
        xj = xq[:, j * HP:(j + 1) * HP].astype(bf16)                        # aligned view
        xrep = jnp.dot(xj, repl_ref[...], preferred_element_type=f32)       # (TB, EW)
        prod = (e * xrep).astype(bf16)
        tj = jnp.dot(prod, gseg_ref[:, j * HP:(j + 1) * HP],
                     preferred_element_type=f32)                            # (TB, 128)
        t_packed = tj if t_packed is None else t_packed + tj

    # ---------------- matD (k-major: lane k*M + m) ---------------------------------------
    # One constant 0/1 selection/broadcast matmul emits [A_0..A_3 | B_0..B_3] with
    # A_j[:, k*M+m] = matT[b,m,j] and B_j[:, k*M+m] = matT[b,k,j]; matD = sum_j A_j*B_j.
    ab = jnp.dot(t_packed.astype(bf16), pab_ref[...],
                 preferred_element_type=f32)                                # (TB, 8*128)
    matd = ab[:, 0:HP] * ab[:, 4 * HP:5 * HP]
    for j in range(1, 4):
        matd = matd + ab[:, j * HP:(j + 1) * HP] * ab[:, (4 + j) * HP:(5 + j) * HP]

    # ---------------- fitting net: 128 -> 128 -> 128  (BN3/BN4 folded) ------------------
    # The last-layer weight is pre-replicated so fit[b,m] lands at lane j*SEG+m,
    # i.e. already broadcast against the packed matT tile.
    g = jnp.dot(matd.astype(bf16), fw1_ref[...], preferred_element_type=f32) + fb1_ref[...]
    g = _lrelu(g)
    g = jnp.dot(g.astype(bf16), fw2_ref[...], preferred_element_type=f32) + fb2_ref[...]
    g = _lrelu(g)
    fit_rep = jnp.dot(g.astype(bf16), fw3_ref[...], preferred_element_type=f32) + fb3_ref[...]

    # ---------------- outW[b, j-1] = sum_m fit[b,m] * matT[b,m,j], j = 1..3 -------------
    outw = jnp.dot((fit_rep * t_packed).astype(bf16), gw_ref[...],
                   preferred_element_type=f32)                              # lanes 0..2
    o_ref[...] = outw.astype(o_ref.dtype)                                   # single full store


# ---------------------------------- wrapper side ---------------------------------------
def _round_up(a, b):
    return (a + b - 1) // b * b


def _pad2(a, rows, cols):
    return jnp.zeros((rows, cols), a.dtype).at[:a.shape[0], :a.shape[1]].set(a)


def _fold_bn(w, b, bn):
    """Fold eval-mode BatchNorm1d into the preceding Linear (w: (in,out), b: (out,))."""
    s = bn["gamma"] / jnp.sqrt(bn["var"] + BN_EPS)
    return w * s[None, :], (b - bn["mean"]) * s + bn["beta"]


def _const_matrices():
    """Constant 0/1 bf16 matrices: replicate / segment-sum / matD-select / final contract."""
    repl = np.zeros((HP, EW), np.float32)          # repl[n, m*72+n] = 1
    gseg = np.zeros((EW, 4 * HP), np.float32)      # gseg[m*72+n, j*128 + j*32+m] = 1
    for m in range(M):
        for n in range(NQ):
            repl[n, m * NQ + n] = 1.0
            for j in range(4):
                gseg[m * NQ + n, j * HP + j * SEG + m] = 1.0
    pab = np.zeros((HP, 8 * HP), np.float32)
    for j in range(4):
        for m in range(M):
            for k in range(MB):
                pab[j * SEG + m, j * HP + k * M + m] = 1.0           # A_j : matT[b,m,j]
                pab[j * SEG + k, (4 + j) * HP + k * M + m] = 1.0     # B_j : matT[b,k,j]
    gw = np.zeros((HP, OUT_PAD), np.float32)       # gw[j*32+m, j-1] = 1, j = 1..3
    for j in range(1, 4):
        for m in range(M):
            gw[j * SEG + m, j - 1] = 1.0
    to = lambda a: jnp.asarray(a, jnp.bfloat16)
    return to(repl), to(gseg), to(pab), to(gw)


def _prep_kernel_params(p):
    """BN-fold, pad feature dims to lane width, cast weights to bf16 for the MXU."""
    bf16 = jnp.bfloat16

    w, b = _fold_bn(p["ew1"], p["eb1"], p["bn1"])
    ew1, eb1 = _pad2(w, HP, HP).astype(bf16), _pad2(b[None, :], 1, HP)
    w, b = _fold_bn(p["ew2"], p["eb2"], p["bn2"])
    ew2, eb2 = _pad2(w, HP, HP).astype(bf16), _pad2(b[None, :], 1, HP)
    ew3 = _pad2(p["ew3"], HP, EW).astype(bf16)
    eb3 = _pad2(p["eb3"][None, :], 1, EW)

    # Fnet layer-1: fold BN3, permute rows (m*Mb+k) -> (k*M+m) to match the k-major matD
    # layout produced in-kernel, then zero-pad 120 -> 128 rows / 50 -> 128 cols.
    w, b = _fold_bn(p["fw1"], p["fb1"], p["bn3"])
    c = jnp.arange(FNET_IN)
    perm = (c % M) * MB + (c // M)
    fw1, fb1 = _pad2(w[perm, :], HP, HP).astype(bf16), _pad2(b[None, :], 1, HP)
    w, b = _fold_bn(p["fw2"], p["fb2"], p["bn4"])
    fw2, fb2 = _pad2(w, HP, HP).astype(bf16), _pad2(b[None, :], 1, HP)

    # Fnet output layer pre-replicated: column j*SEG+m = original column m (j = 0..3).
    col = jnp.arange(HP)
    keep = (col % SEG) < M
    src = jnp.where(keep, col % SEG, 0)
    fw3_rep = jnp.where(keep[None, :], _pad2(p["fw3"], HP, M)[:, src], 0.0).astype(bf16)
    fb3_rep = jnp.where(keep, p["fb3"][src], 0.0)[None, :]
    return (ew1, eb1, ew2, eb2, ew3, eb3, fw1, fb1, fw2, fb2, fw3_rep, fb3_rep)


def _pick_tb(B):
    if B <= 16:
        return _round_up(max(B, 1), 8)
    # Prefer >=2 grid tiles (keeps both v7x TensorCores busy with dimension_semantics
    # "parallel"); cap at 512 rows -- good MXU row amortization on v6e/v7x and the
    # per-tile VMEM footprint (~<20 MiB at TB=512) stays under the 32 MiB scoped default.
    return min(512, _round_up((B + 1) // 2, 8))


def net_forward(x, params):
    """x: (B, 288) float32 -> (B, 3) float32 (NET_custom.forward, eval-mode BN)."""
    B = x.shape[0]
    (ew1, eb1, ew2, eb2, ew3, eb3,
     fw1, fb1, fw2, fb2, fw3, fb3) = _prep_kernel_params(params)
    repl, gseg, pab, gw = _const_matrices()

    TB = _pick_tb(B)
    Bp = _round_up(B, TB)

    # x rearranged j-major and lane-aligned: xq[:, j*128 + n] = x[:, 4n + j] for n < 72,
    # zero elsewhere.  Block j=0 doubles as the embedding-net input Q1 = x[:, ::4].
    xq3 = jnp.transpose(x.reshape(B, NQ, 4), (0, 2, 1))              # (B, 4, 72)
    xqp = jnp.zeros((Bp, 4, HP), jnp.float32).at[:B, :, :NQ].set(xq3).reshape(Bp, 4 * HP)

    tiled = pl.BlockSpec((TB, 4 * HP), lambda i: (i, 0))
    whole = lambda a: pl.BlockSpec(a.shape, lambda i: (0,) * a.ndim)

    out = pl.pallas_call(
        net_kernel,
        out_shape=jax.ShapeDtypeStruct((Bp, OUT_PAD), jnp.float32),
        grid=(Bp // TB,),
        in_specs=[
            tiled,                              # xq tile (pipelined per grid step)
            whole(ew1), whole(eb1), whole(ew2), whole(eb2), whole(ew3), whole(eb3),
            whole(repl), whole(gseg), whole(pab),
            whole(fw1), whole(fb1), whole(fw2), whole(fb2), whole(fw3), whole(fb3),
            whole(gw),
        ],
        out_specs=pl.BlockSpec((TB, OUT_PAD), lambda i: (i, 0)),
        compiler_params=pltpu.CompilerParams(dimension_semantics=("parallel",)),
    )(xqp, ew1, eb1, ew2, eb2, ew3, eb3, repl, gseg, pab,
      fw1, fb1, fw2, fb2, fw3, fb3, gw)
    return out[:B, :3]


# ---------------------------------- init & reference -----------------------------------
def init_params(key):
    ks = jax.random.split(key, 28)
    it = iter(range(28))

    def linear(fin, fout):
        kw, kb = ks[next(it)], ks[next(it)]
        bound = 1.0 / float(fin) ** 0.5
        w = jax.random.uniform(kw, (fin, fout), jnp.float32, -bound, bound)
        b = jax.random.uniform(kb, (fout,), jnp.float32, -bound, bound)
        return w, b

    def bnorm(n):
        kg, kb, km, kv = (ks[next(it)] for _ in range(4))
        return {"gamma": 1.0 + 0.1 * jax.random.normal(kg, (n,), jnp.float32),
                "beta": 0.1 * jax.random.normal(kb, (n,), jnp.float32),
                "mean": 0.1 * jax.random.normal(km, (n,), jnp.float32),
                "var": jax.random.uniform(kv, (n,), jnp.float32, 0.5, 1.5)}

    p = {}
    p["ew1"], p["eb1"] = linear(NQ, ENET_H);      p["bn1"] = bnorm(ENET_H)
    p["ew2"], p["eb2"] = linear(ENET_H, ENET_H);  p["bn2"] = bnorm(ENET_H)
    p["ew3"], p["eb3"] = linear(ENET_H, ENET_OUT)
    p["fw1"], p["fb1"] = linear(FNET_IN, FNET_H); p["bn3"] = bnorm(FNET_H)
    p["fw2"], p["fb2"] = linear(FNET_H, FNET_H);  p["bn4"] = bnorm(FNET_H)
    p["fw3"], p["fb3"] = linear(FNET_H, M)
    return p


def net_reference(x, p):
    """Pure-JAX f32 mirror of NET_custom.forward (eval-mode BN)."""
    def bn(v, q):
        return (v - q["mean"]) / jnp.sqrt(q["var"] + BN_EPS) * q["gamma"] + q["beta"]

    def lrelu(v):
        return jnp.where(v > 0, v, NEG_SLOPE * v)

    B = x.shape[0]
    q1 = x[:, ::4]
    h = lrelu(bn(q1 @ p["ew1"] + p["eb1"], p["bn1"]))
    h = lrelu(bn(h @ p["ew2"] + p["eb2"], p["bn2"]))
    e = (h @ p["ew3"] + p["eb3"]).reshape(B, M, NQ)
    mq = x.reshape(B, NQ, 4)
    matT = jnp.einsum("bmn,bnj->bmj", e, mq)
    matS = matT[:, :MB, :]
    matD = jnp.einsum("bmj,bkj->bmk", matT, matS).reshape(B, M * MB)
    g = lrelu(bn(matD @ p["fw1"] + p["fb1"], p["bn3"]))
    g = lrelu(bn(g @ p["fw2"] + p["fb2"], p["bn4"]))
    fit = g @ p["fw3"] + p["fb3"]
    matW = jnp.einsum("bm,bmj->bj", fit, matT)
    return matW[:, 1:]


if __name__ == "__main__":
    key = jax.random.PRNGKey(0)
    kx, kp = jax.random.split(key)

    B = 8
    x = jax.random.normal(kx, (B, NFEAT), jnp.float32)
    params = init_params(kp)

    out = jax.jit(net_forward)(x, params)
    out = jax.block_until_ready(out)

    ref = net_reference(x, params)
    assert out.shape == (B, 3), out.shape
    rel = float(jnp.linalg.norm(out - ref) / (jnp.linalg.norm(ref) + 1e-8))
    assert rel < 5e-2, f"relative error too large vs f32 reference: {rel}"

    print("KERNEL_OK")
</pallas_src>

<mosaic_0001>
module attributes {stable_mosaic.version = 11 : i64} {
  func.func @net_kernel(%arg0: i32, %arg1: memref<8x512xf32, #tpu.memory_space<vmem>>, %arg2: memref<128x128xbf16, #tpu.memory_space<vmem>>, %arg3: memref<1x128xf32, #tpu.memory_space<vmem>>, %arg4: memref<128x128xbf16, #tpu.memory_space<vmem>>, %arg5: memref<1x128xf32, #tpu.memory_space<vmem>>, %arg6: memref<128x1536xbf16, #tpu.memory_space<vmem>>, %arg7: memref<1x1536xf32, #tpu.memory_space<vmem>>, %arg8: memref<128x1536xbf16, #tpu.memory_space<vmem>>, %arg9: memref<1536x512xbf16, #tpu.memory_space<vmem>>, %arg10: memref<128x1024xbf16, #tpu.memory_space<vmem>>, %arg11: memref<128x128xbf16, #tpu.memory_space<vmem>>, %arg12: memref<1x128xf32, #tpu.memory_space<vmem>>, %arg13: memref<128x128xbf16, #tpu.memory_space<vmem>>, %arg14: memref<1x128xf32, #tpu.memory_space<vmem>>, %arg15: memref<128x128xbf16, #tpu.memory_space<vmem>>, %arg16: memref<1x128xf32, #tpu.memory_space<vmem>>, %arg17: memref<128x128xbf16, #tpu.memory_space<vmem>>, %arg18: memref<8x128xf32, #tpu.memory_space<vmem>>) attributes {dimension_semantics = [#tpu.dimension_semantics<parallel>], iteration_bounds = array<i64: 1>, scalar_prefetch = 0 : i64, scratch_operands = 0 : i64, tpu.core_type = #tpu.core_type<tc>, window_params = [{transform_indices = @transform_0, window_bounds = array<i64: 8, 512>}, {pipeline_mode = #tpu.pipeline_mode<synchronous>, transform_indices = @transform_1, window_bounds = array<i64: 128, 128>}, {pipeline_mode = #tpu.pipeline_mode<synchronous>, transform_indices = @transform_2, window_bounds = array<i64: 1, 128>}, {pipeline_mode = #tpu.pipeline_mode<synchronous>, transform_indices = @transform_3, window_bounds = array<i64: 128, 128>}, {pipeline_mode = #tpu.pipeline_mode<synchronous>, transform_indices = @transform_4, window_bounds = array<i64: 1, 128>}, {pipeline_mode = #tpu.pipeline_mode<synchronous>, transform_indices = @transform_5, window_bounds = array<i64: 128, 1536>}, {pipeline_mode = #tpu.pipeline_mode<synchronous>, transform_indices = @transform_6, window_bounds = array<i64: 1, 1536>}, {pipeline_mode = #tpu.pipeline_mode<synchronous>, transform_indices = @transform_7, window_bounds = array<i64: 128, 1536>}, {pipeline_mode = #tpu.pipeline_mode<synchronous>, transform_indices = @transform_8, window_bounds = array<i64: 1536, 512>}, {pipeline_mode = #tpu.pipeline_mode<synchronous>, transform_indices = @transform_9, window_bounds = array<i64: 128, 1024>}, {pipeline_mode = #tpu.pipeline_mode<synchronous>, transform_indices = @transform_10, window_bounds = array<i64: 128, 128>}, {pipeline_mode = #tpu.pipeline_mode<synchronous>, transform_indices = @transform_11, window_bounds = array<i64: 1, 128>}, {pipeline_mode = #tpu.pipeline_mode<synchronous>, transform_indices = @transform_12, window_bounds = array<i64: 128, 128>}, {pipeline_mode = #tpu.pipeline_mode<synchronous>, transform_indices = @transform_13, window_bounds = array<i64: 1, 128>}, {pipeline_mode = #tpu.pipeline_mode<synchronous>, transform_indices = @transform_14, window_bounds = array<i64: 128, 128>}, {pipeline_mode = #tpu.pipeline_mode<synchronous>, transform_indices = @transform_15, window_bounds = array<i64: 1, 128>}, {pipeline_mode = #tpu.pipeline_mode<synchronous>, transform_indices = @transform_16, window_bounds = array<i64: 128, 128>}, {transform_indices = @transform_17, window_bounds = array<i64: 8, 128>}]} {
    %c0 = arith.constant 0 : index
    %c0_0 = arith.constant 0 : index
    %0 = vector.load %arg1[%c0, %c0_0] : memref<8x512xf32, #tpu.memory_space<vmem>>, vector<8x512xf32>
    %1 = vector.extract_strided_slice %0 {offsets = [0, 0], sizes = [8, 128], strides = [1, 1]} : vector<8x512xf32> to vector<8x128xf32>
    %2 = arith.truncf %1 : vector<8x128xf32> to vector<8x128xbf16>
    %c0_1 = arith.constant 0 : index
    %c0_2 = arith.constant 0 : index
    %3 = vector.load %arg2[%c0_1, %c0_2] : memref<128x128xbf16, #tpu.memory_space<vmem>>, vector<128x128xbf16>
    %cst = arith.constant dense<0.000000e+00> : vector<8x128xf32>
    %4 = tpu.matmul %2, %3, %cst {dimension_numbers = #tpu.dot_dimension_numbers<[1], [0], [0], [1], [0, 0, 1, 1], [], []>} : vector<8x128xbf16>, vector<128x128xbf16>, vector<8x128xf32> -> vector<8x128xf32>
    %c0_3 = arith.constant 0 : index
    %c0_4 = arith.constant 0 : index
    %5 = vector.load %arg3[%c0_3, %c0_4] : memref<1x128xf32, #tpu.memory_space<vmem>>, vector<1x128xf32>
    %6 = vector.broadcast %5 : vector<1x128xf32> to vector<8x128xf32>
    %7 = arith.addf %4, %6 : vector<8x128xf32>
    %cst_5 = arith.constant 0.000000e+00 : f32
    %8 = vector.broadcast %cst_5 : f32 to vector<8x128xf32>
    %9 = arith.cmpf ogt, %7, %8 : vector<8x128xf32>
    %cst_6 = arith.constant 0.00999999977 : f32
    %10 = vector.broadcast %cst_6 : f32 to vector<8x128xf32>
    %11 = arith.mulf %10, %7 : vector<8x128xf32>
    %12 = arith.select %9, %7, %11 : vector<8x128xi1>, vector<8x128xf32>
    %13 = arith.truncf %12 : vector<8x128xf32> to vector<8x128xbf16>
    %c0_7 = arith.constant 0 : index
    %c0_8 = arith.constant 0 : index
    %14 = vector.load %arg4[%c0_7, %c0_8] : memref<128x128xbf16, #tpu.memory_space<vmem>>, vector<128x128xbf16>
    %cst_9 = arith.constant dense<0.000000e+00> : vector<8x128xf32>
    %15 = tpu.matmul %13, %14, %cst_9 {dimension_numbers = #tpu.dot_dimension_numbers<[1], [0], [0], [1], [0, 0, 1, 1], [], []>} : vector<8x128xbf16>, vector<128x128xbf16>, vector<8x128xf32> -> vector<8x128xf32>
    %c0_10 = arith.constant 0 : index
    %c0_11 = arith.constant 0 : index
    %16 = vector.load %arg5[%c0_10, %c0_11] : memref<1x128xf32, #tpu.memory_space<vmem>>, vector<1x128xf32>
    %17 = vector.broadcast %16 : vector<1x128xf32> to vector<8x128xf32>
    %18 = arith.addf %15, %17 : vector<8x128xf32>
    %cst_12 = arith.constant 0.000000e+00 : f32
    %19 = vector.broadcast %cst_12 : f32 to vector<8x128xf32>
    %20 = arith.cmpf ogt, %18, %19 : vector<8x128xf32>
    %cst_13 = arith.constant 0.00999999977 : f32
    %21 = vector.broadcast %cst_13 : f32 to vector<8x128xf32>
    %22 = arith.mulf %21, %18 : vector<8x128xf32>
    %23 = arith.select %20, %18, %22 : vector<8x128xi1>, vector<8x128xf32>
    %24 = arith.truncf %23 : vector<8x128xf32> to vector<8x128xbf16>
    %c0_14 = arith.constant 0 : index
    %c0_15 = arith.constant 0 : index
    %25 = vector.load %arg6[%c0_14, %c0_15] : memref<128x1536xbf16, #tpu.memory_space<vmem>>, vector<128x1536xbf16>
    %cst_16 = arith.constant dense<0.000000e+00> : vector<8x1536xf32>
    %26 = tpu.matmul %24, %25, %cst_16 {dimension_numbers = #tpu.dot_dimension_numbers<[1], [0], [0], [1], [0, 0, 1, 1], [], []>} : vector<8x128xbf16>, vector<128x1536xbf16>, vector<8x1536xf32> -> vector<8x1536xf32>
    %c0_17 = arith.constant 0 : index
    %c0_18 = arith.constant 0 : index
    %27 = vector.load %arg7[%c0_17, %c0_18] : memref<1x1536xf32, #tpu.memory_space<vmem>>, vector<1x1536xf32>
    %28 = vector.broadcast %27 : vector<1x1536xf32> to vector<8x1536xf32>
    %29 = arith.addf %26, %28 : vector<8x1536xf32>
    %30 = vector.extract_strided_slice %0 {offsets = [0, 0], sizes = [8, 128], strides = [1, 1]} : vector<8x512xf32> to vector<8x128xf32>
    %31 = arith.truncf %30 : vector<8x128xf32> to vector<8x128xbf16>
    %c0_19 = arith.constant 0 : index
    %c0_20 = arith.constant 0 : index
    %32 = vector.load %arg8[%c0_19, %c0_20] : memref<128x1536xbf16, #tpu.memory_space<vmem>>, vector<128x1536xbf16>
    %cst_21 = arith.constant dense<0.000000e+00> : vector<8x1536xf32>
    %33 = tpu.matmul %31, %32, %cst_21 {dimension_numbers = #tpu.dot_dimension_numbers<[1], [0], [0], [1], [0, 0, 1, 1], [], []>} : vector<8x128xbf16>, vector<128x1536xbf16>, vector<8x1536xf32> -> vector<8x1536xf32>
    %34 = arith.mulf %29, %33 : vector<8x1536xf32>
    %35 = arith.truncf %34 : vector<8x1536xf32> to vector<8x1536xbf16>
    %c0_22 = arith.constant 0 : index
    %c0_23 = arith.constant 0 : index
    %36 = vector.load %arg9[%c0_22, %c0_23] : memref<1536x512xbf16, #tpu.memory_space<vmem>>, vector<1536x128xbf16>
    %cst_24 = arith.constant dense<0.000000e+00> : vector<8x128xf32>
    %37 = tpu.matmul %35, %36, %cst_24 {dimension_numbers = #tpu.dot_dimension_numbers<[1], [0], [0], [1], [0, 0, 1, 1], [], []>} : vector<8x1536xbf16>, vector<1536x128xbf16>, vector<8x128xf32> -> vector<8x128xf32>
    %38 = vector.extract_strided_slice %0 {offsets = [0, 128], sizes = [8, 128], strides = [1, 1]} : vector<8x512xf32> to vector<8x128xf32>
    %39 = arith.truncf %38 : vector<8x128xf32> to vector<8x128xbf16>
    %c0_25 = arith.constant 0 : index
    %c0_26 = arith.constant 0 : index
    %40 = vector.load %arg8[%c0_25, %c0_26] : memref<128x1536xbf16, #tpu.memory_space<vmem>>, vector<128x1536xbf16>
    %cst_27 = arith.constant dense<0.000000e+00> : vector<8x1536xf32>
    %41 = tpu.matmul %39, %40, %cst_27 {dimension_numbers = #tpu.dot_dimension_numbers<[1], [0], [0], [1], [0, 0, 1, 1], [], []>} : vector<8x128xbf16>, vector<128x1536xbf16>, vector<8x1536xf32> -> vector<8x1536xf32>
    %42 = arith.mulf %29, %41 : vector<8x1536xf32>
    %43 = arith.truncf %42 : vector<8x1536xf32> to vector<8x1536xbf16>
    %c0_28 = arith.constant 0 : index
    %c128 = arith.constant 128 : index
    %44 = vector.load %arg9[%c0_28, %c128] : memref<1536x512xbf16, #tpu.memory_space<vmem>>, vector<1536x128xbf16>
    %cst_29 = arith.constant dense<0.000000e+00> : vector<8x128xf32>
    %45 = tpu.matmul %43, %44, %cst_29 {dimension_numbers = #tpu.dot_dimension_numbers<[1], [0], [0], [1], [0, 0, 1, 1], [], []>} : vector<8x1536xbf16>, vector<1536x128xbf16>, vector<8x128xf32> -> vector<8x128xf32>
    %46 = arith.addf %37, %45 : vector<8x128xf32>
    %47 = vector.extract_strided_slice %0 {offsets = [0, 256], sizes = [8, 128], strides = [1, 1]} : vector<8x512xf32> to vector<8x128xf32>
    %48 = arith.truncf %47 : vector<8x128xf32> to vector<8x128xbf16>
    %c0_30 = arith.constant 0 : index
    %c0_31 = arith.constant 0 : index
    %49 = vector.load %arg8[%c0_30, %c0_31] : memref<128x1536xbf16, #tpu.memory_space<vmem>>, vector<128x1536xbf16>
    %cst_32 = arith.constant dense<0.000000e+00> : vector<8x1536xf32>
    %50 = tpu.matmul %48, %49, %cst_32 {dimension_numbers = #tpu.dot_dimension_numbers<[1], [0], [0], [1], [0, 0, 1, 1], [], []>} : vector<8x128xbf16>, vector<128x1536xbf16>, vector<8x1536xf32> -> vector<8x1536xf32>
    %51 = arith.mulf %29, %50 : vector<8x1536xf32>
    %52 = arith.truncf %51 : vector<8x1536xf32> to vector<8x1536xbf16>
    %c0_33 = arith.constant 0 : index
    %c256 = arith.constant 256 : index
    %53 = vector.load %arg9[%c0_33, %c256] : memref<1536x512xbf16, #tpu.memory_space<vmem>>, vector<1536x128xbf16>
    %cst_34 = arith.constant dense<0.000000e+00> : vector<8x128xf32>
    %54 = tpu.matmul %52, %53, %cst_34 {dimension_numbers = #tpu.dot_dimension_numbers<[1], [0], [0], [1], [0, 0, 1, 1], [], []>} : vector<8x1536xbf16>, vector<1536x128xbf16>, vector<8x128xf32> -> vector<8x128xf32>
    %55 = arith.addf %46, %54 : vector<8x128xf32>
    %56 = vector.extract_strided_slice %0 {offsets = [0, 384], sizes = [8, 128], strides = [1, 1]} : vector<8x512xf32> to vector<8x128xf32>
    %57 = arith.truncf %56 : vector<8x128xf32> to vector<8x128xbf16>
    %c0_35 = arith.constant 0 : index
    %c0_36 = arith.constant 0 : index
    %58 = vector.load %arg8[%c0_35, %c0_36] : memref<128x1536xbf16, #tpu.memory_space<vmem>>, vector<128x1536xbf16>
    %cst_37 = arith.constant dense<0.000000e+00> : vector<8x1536xf32>
    %59 = tpu.matmul %57, %58, %cst_37 {dimension_numbers = #tpu.dot_dimension_numbers<[1], [0], [0], [1], [0, 0, 1, 1], [], []>} : vector<8x128xbf16>, vector<128x1536xbf16>, vector<8x1536xf32> -> vector<8x1536xf32>
    %60 = arith.mulf %29, %59 : vector<8x1536xf32>
    %61 = arith.truncf %60 : vector<8x1536xf32> to vector<8x1536xbf16>
    %c0_38 = arith.constant 0 : index
    %c384 = arith.constant 384 : index
    %62 = vector.load %arg9[%c0_38, %c384] : memref<1536x512xbf16, #tpu.memory_space<vmem>>, vector<1536x128xbf16>
    %cst_39 = arith.constant dense<0.000000e+00> : vector<8x128xf32>
    %63 = tpu.matmul %61, %62, %cst_39 {dimension_numbers = #tpu.dot_dimension_numbers<[1], [0], [0], [1], [0, 0, 1, 1], [], []>} : vector<8x1536xbf16>, vector<1536x128xbf16>, vector<8x128xf32> -> vector<8x128xf32>
    %64 = arith.addf %55, %63 : vector<8x128xf32>
    %65 = arith.truncf %64 : vector<8x128xf32> to vector<8x128xbf16>
    %c0_40 = arith.constant 0 : index
    %c0_41 = arith.constant 0 : index
    %66 = vector.load %arg10[%c0_40, %c0_41] : memref<128x1024xbf16, #tpu.memory_space<vmem>>, vector<128x1024xbf16>
    %cst_42 = arith.constant dense<0.000000e+00> : vector<8x1024xf32>
    %67 = tpu.matmul %65, %66, %cst_42 {dimension_numbers = #tpu.dot_dimension_numbers<[1], [0], [0], [1], [0, 0, 1, 1], [], []>} : vector<8x128xbf16>, vector<128x1024xbf16>, vector<8x1024xf32> -> vector<8x1024xf32>
    %68 = vector.extract_strided_slice %67 {offsets = [0, 0], sizes = [8, 128], strides = [1, 1]} : vector<8x1024xf32> to vector<8x128xf32>
    %69 = vector.extract_strided_slice %67 {offsets = [0, 512], sizes = [8, 128], strides = [1, 1]} : vector<8x1024xf32> to vector<8x128xf32>
    %70 = arith.mulf %68, %69 : vector<8x128xf32>
    %71 = vector.extract_strided_slice %67 {offsets = [0, 128], sizes = [8, 128], strides = [1, 1]} : vector<8x1024xf32> to vector<8x128xf32>
    %72 = vector.extract_strided_slice %67 {offsets = [0, 640], sizes = [8, 128], strides = [1, 1]} : vector<8x1024xf32> to vector<8x128xf32>
    %73 = arith.mulf %71, %72 : vector<8x128xf32>
    %74 = arith.addf %70, %73 : vector<8x128xf32>
    %75 = vector.extract_strided_slice %67 {offsets = [0, 256], sizes = [8, 128], strides = [1, 1]} : vector<8x1024xf32> to vector<8x128xf32>
    %76 = vector.extract_strided_slice %67 {offsets = [0, 768], sizes = [8, 128], strides = [1, 1]} : vector<8x1024xf32> to vector<8x128xf32>
    %77 = arith.mulf %75, %76 : vector<8x128xf32>
    %78 = arith.addf %74, %77 : vector<8x128xf32>
    %79 = vector.extract_strided_slice %67 {offsets = [0, 384], sizes = [8, 128], strides = [1, 1]} : vector<8x1024xf32> to vector<8x128xf32>
    %80 = vector.extract_strided_slice %67 {offsets = [0, 896], sizes = [8, 128], strides = [1, 1]} : vector<8x1024xf32> to vector<8x128xf32>
    %81 = arith.mulf %79, %80 : vector<8x128xf32>
    %82 = arith.addf %78, %81 : vector<8x128xf32>
    %83 = arith.truncf %82 : vector<8x128xf32> to vector<8x128xbf16>
    %c0_43 = arith.constant 0 : index
    %c0_44 = arith.constant 0 : index
    %84 = vector.load %arg11[%c0_43, %c0_44] : memref<128x128xbf16, #tpu.memory_space<vmem>>, vector<128x128xbf16>
    %cst_45 = arith.constant dense<0.000000e+00> : vector<8x128xf32>
    %85 = tpu.matmul %83, %84, %cst_45 {dimension_numbers = #tpu.dot_dimension_numbers<[1], [0], [0], [1], [0, 0, 1, 1], [], []>} : vector<8x128xbf16>, vector<128x128xbf16>, vector<8x128xf32> -> vector<8x128xf32>
    %c0_46 = arith.constant 0 : index
    %c0_47 = arith.constant 0 : index
    %86 = vector.load %arg12[%c0_46, %c0_47] : memref<1x128xf32, #tpu.memory_space<vmem>>, vector<1x128xf32>
    %87 = vector.broadcast %86 : vector<1x128xf32> to vector<8x128xf32>
    %88 = arith.addf %85, %87 : vector<8x128xf32>
    %cst_48 = arith.constant 0.000000e+00 : f32
    %89 = vector.broadcast %cst_48 : f32 to vector<8x128xf32>
    %90 = arith.cmpf ogt, %88, %89 : vector<8x128xf32>
    %cst_49 = arith.constant 0.00999999977 : f32
    %91 = vector.broadcast %cst_49 : f32 to vector<8x128xf32>
    %92 = arith.mulf %91, %88 : vector<8x128xf32>
    %93 = arith.select %90, %88, %92 : vector<8x128xi1>, vector<8x128xf32>
    %94 = arith.truncf %93 : vector<8x128xf32> to vector<8x128xbf16>
    %c0_50 = arith.constant 0 : index
    %c0_51 = arith.constant 0 : index
    %95 = vector.load %arg13[%c0_50, %c0_51] : memref<128x128xbf16, #tpu.memory_space<vmem>>, vector<128x128xbf16>
    %cst_52 = arith.constant dense<0.000000e+00> : vector<8x128xf32>
    %96 = tpu.matmul %94, %95, %cst_52 {dimension_numbers = #tpu.dot_dimension_numbers<[1], [0], [0], [1], [0, 0, 1, 1], [], []>} : vector<8x128xbf16>, vector<128x128xbf16>, vector<8x128xf32> -> vector<8x128xf32>
    %c0_53 = arith.constant 0 : index
    %c0_54 = arith.constant 0 : index
    %97 = vector.load %arg14[%c0_53, %c0_54] : memref<1x128xf32, #tpu.memory_space<vmem>>, vector<1x128xf32>
    %98 = vector.broadcast %97 : vector<1x128xf32> to vector<8x128xf32>
    %99 = arith.addf %96, %98 : vector<8x128xf32>
    %cst_55 = arith.constant 0.000000e+00 : f32
    %100 = vector.broadcast %cst_55 : f32 to vector<8x128xf32>
    %101 = arith.cmpf ogt, %99, %100 : vector<8x128xf32>
    %cst_56 = arith.constant 0.00999999977 : f32
    %102 = vector.broadcast %cst_56 : f32 to vector<8x128xf32>
    %103 = arith.mulf %102, %99 : vector<8x128xf32>
    %104 = arith.select %101, %99, %103 : vector<8x128xi1>, vector<8x128xf32>
    %105 = arith.truncf %104 : vector<8x128xf32> to vector<8x128xbf16>
    %c0_57 = arith.constant 0 : index
    %c0_58 = arith.constant 0 : index
    %106 = vector.load %arg15[%c0_57, %c0_58] : memref<128x128xbf16, #tpu.memory_space<vmem>>, vector<128x128xbf16>
    %cst_59 = arith.constant dense<0.000000e+00> : vector<8x128xf32>
    %107 = tpu.matmul %105, %106, %cst_59 {dimension_numbers = #tpu.dot_dimension_numbers<[1], [0], [0], [1], [0, 0, 1, 1], [], []>} : vector<8x128xbf16>, vector<128x128xbf16>, vector<8x128xf32> -> vector<8x128xf32>
    %c0_60 = arith.constant 0 : index
    %c0_61 = arith.constant 0 : index
    %108 = vector.load %arg16[%c0_60, %c0_61] : memref<1x128xf32, #tpu.memory_space<vmem>>, vector<1x128xf32>
    %109 = vector.broadcast %108 : vector<1x128xf32> to vector<8x128xf32>
    %110 = arith.addf %107, %109 : vector<8x128xf32>
    %111 = arith.mulf %110, %64 : vector<8x128xf32>
    %112 = arith.truncf %111 : vector<8x128xf32> to vector<8x128xbf16>
    %c0_62 = arith.constant 0 : index
    %c0_63 = arith.constant 0 : index
    %113 = vector.load %arg17[%c0_62, %c0_63] : memref<128x128xbf16, #tpu.memory_space<vmem>>, vector<128x128xbf16>
    %cst_64 = arith.constant dense<0.000000e+00> : vector<8x128xf32>
    %114 = tpu.matmul %112, %113, %cst_64 {dimension_numbers = #tpu.dot_dimension_numbers<[1], [0], [0], [1], [0, 0, 1, 1], [], []>} : vector<8x128xbf16>, vector<128x128xbf16>, vector<8x128xf32> -> vector<8x128xf32>
    %c0_65 = arith.constant 0 : index
    %c0_66 = arith.constant 0 : index
    %115 = vector.load %arg18[%c0_65, %c0_66] : memref<8x128xf32, #tpu.memory_space<vmem>>, vector<8x128xf32>
    tpu.vector_store %arg18[%c0_65, %c0_66], %114 {strides = array<i32>} : memref<8x128xf32, #tpu.memory_space<vmem>>, vector<8x128xf32>,
    return
  }
  func.func @transform_0(%arg0: i32) -> (i32, i32) {
    %c0_i32 = arith.constant 0 : i32
    %c0_i32_0 = arith.constant 0 : i32
    return %arg0, %c0_i32 : i32, i32
  }
  func.func @transform_1(%arg0: i32) -> (i32, i32) {
    %c0_i32 = arith.constant 0 : i32
    %c0_i32_0 = arith.constant 0 : i32
    %c0_i32_1 = arith.constant 0 : i32
    return %c0_i32, %c0_i32_0 : i32, i32
  }
  func.func @transform_2(%arg0: i32) -> (i32, i32) {
    %c0_i32 = arith.constant 0 : i32
    %c0_i32_0 = arith.constant 0 : i32
    %c0_i32_1 = arith.constant 0 : i32
    return %c0_i32, %c0_i32_0 : i32, i32
  }
  func.func @transform_3(%arg0: i32) -> (i32, i32) {
    %c0_i32 = arith.constant 0 : i32
    %c0_i32_0 = arith.constant 0 : i32
    %c0_i32_1 = arith.constant 0 : i32
    return %c0_i32, %c0_i32_0 : i32, i32
  }
  func.func @transform_4(%arg0: i32) -> (i32, i32) {
    %c0_i32 = arith.constant 0 : i32
    %c0_i32_0 = arith.constant 0 : i32
    %c0_i32_1 = arith.constant 0 : i32
    return %c0_i32, %c0_i32_0 : i32, i32
  }
  func.func @transform_5(%arg0: i32) -> (i32, i32) {
    %c0_i32 = arith.constant 0 : i32
    %c0_i32_0 = arith.constant 0 : i32
    %c0_i32_1 = arith.constant 0 : i32
    return %c0_i32, %c0_i32_0 : i32, i32
  }
  func.func @transform_6(%arg0: i32) -> (i32, i32) {
    %c0_i32 = arith.constant 0 : i32
    %c0_i32_0 = arith.constant 0 : i32
    %c0_i32_1 = arith.constant 0 : i32
    return %c0_i32, %c0_i32_0 : i32, i32
  }
  func.func @transform_7(%arg0: i32) -> (i32, i32) {
    %c0_i32 = arith.constant 0 : i32
    %c0_i32_0 = arith.constant 0 : i32
    %c0_i32_1 = arith.constant 0 : i32
    return %c0_i32, %c0_i32_0 : i32, i32
  }
  func.func @transform_8(%arg0: i32) -> (i32, i32) {
    %c0_i32 = arith.constant 0 : i32
    %c0_i32_0 = arith.constant 0 : i32
    %c0_i32_1 = arith.constant 0 : i32
    return %c0_i32, %c0_i32_0 : i32, i32
  }
  func.func @transform_9(%arg0: i32) -> (i32, i32) {
    %c0_i32 = arith.constant 0 : i32
    %c0_i32_0 = arith.constant 0 : i32
    %c0_i32_1 = arith.constant 0 : i32
    return %c0_i32, %c0_i32_0 : i32, i32
  }
  func.func @transform_10(%arg0: i32) -> (i32, i32) {
    %c0_i32 = arith.constant 0 : i32
    %c0_i32_0 = arith.constant 0 : i32
    %c0_i32_1 = arith.constant 0 : i32
    return %c0_i32, %c0_i32_0 : i32, i32
  }
  func.func @transform_11(%arg0: i32) -> (i32, i32) {
    %c0_i32 = arith.constant 0 : i32
    %c0_i32_0 = arith.constant 0 : i32
    %c0_i32_1 = arith.constant 0 : i32
    return %c0_i32, %c0_i32_0 : i32, i32
  }
  func.func @transform_12(%arg0: i32) -> (i32, i32) {
    %c0_i32 = arith.constant 0 : i32
    %c0_i32_0 = arith.constant 0 : i32
    %c0_i32_1 = arith.constant 0 : i32
    return %c0_i32, %c0_i32_0 : i32, i32
  }
  func.func @transform_13(%arg0: i32) -> (i32, i32) {
    %c0_i32 = arith.constant 0 : i32
    %c0_i32_0 = arith.constant 0 : i32
    %c0_i32_1 = arith.constant 0 : i32
    return %c0_i32, %c0_i32_0 : i32, i32
  }
  func.func @transform_14(%arg0: i32) -> (i32, i32) {
    %c0_i32 = arith.constant 0 : i32
    %c0_i32_0 = arith.constant 0 : i32
    %c0_i32_1 = arith.constant 0 : i32
    return %c0_i32, %c0_i32_0 : i32, i32
  }
  func.func @transform_15(%arg0: i32) -> (i32, i32) {
    %c0_i32 = arith.constant 0 : i32
    %c0_i32_0 = arith.constant 0 : i32
    %c0_i32_1 = arith.constant 0 : i32
    return %c0_i32, %c0_i32_0 : i32, i32
  }
  func.func @transform_16(%arg0: i32) -> (i32, i32) {
    %c0_i32 = arith.constant 0 : i32
    %c0_i32_0 = arith.constant 0 : i32
    %c0_i32_1 = arith.constant 0 : i32
    return %c0_i32, %c0_i32_0 : i32, i32
  }
  func.func @transform_17(%arg0: i32) -> (i32, i32) {
    %c0_i32 = arith.constant 0 : i32
    %c0_i32_0 = arith.constant 0 : i32
    return %arg0, %c0_i32 : i32, i32
  }
}

</mosaic_0001>

<bundles_post_ra>
// kernel: net_forward.1
= control target key start
LH: loop header
LB: loop body
LE: loop exit
PB: predicated region body
PF: predicated region fallthrough
CT: control target
= control target key end

     0   :  { %v13709_v0 = vmov 0.0   ;;  %vm10095_vm0 = vmmov 0   ;;  %v13711_v62 = vmov 0   ;;  %s13689_s1 = inlined_call_operand.vmem [shape: bf16[128,128], index: 1, kind: input, shape index: {}]   ;;  %s13690_s3 = inlined_call_operand.vmem [shape: bf16[128,128], index: 3, kind: input, shape index: {}]   ;;  %s13691_s0 = inlined_call_operand.vmem [shape: f32[8,512], index: 0, kind: input, shape index: {}]   ;;  %s13692_s5 = inlined_call_operand.vmem [shape: bf16[128,1536], index: 5, kind: input, shape index: {}]   ;;  %s13693_s2 = inlined_call_operand.vmem [shape: f32[1,128], index: 2, kind: input, shape index: {}]   ;;  %s13694_s7 = inlined_call_operand.vmem [shape: bf16[128,1536], index: 7, kind: input, shape index: {}]   ;;  %s13695_s4 = inlined_call_operand.vmem [shape: f32[1,128], index: 4, kind: input, shape index: {}]   ;;  %s13696_s6 = inlined_call_operand.vmem [shape: f32[1,1536], index: 6, kind: input, shape index: {}]   ;;  %s13697_s8 = inlined_call_operand.vmem [shape: bf16[1536,512], index: 8, kind: input, shape index: {}]   ;;  %s13698_s9 = inlined_call_operand.vmem [shape: bf16[128,1024], index: 9, kind: input, shape index: {}]   ;;  %s13699_s10 = inlined_call_operand.vmem [shape: bf16[128,128], index: 10, kind: input, shape index: {}]   ;;  %s13700_s12 = inlined_call_operand.vmem [shape: bf16[128,128], index: 12, kind: input, shape index: {}]   ;;  %s13701_s14 = inlined_call_operand.vmem [shape: bf16[128,128], index: 14, kind: input, shape index: {}]   ;;  %s13702_s11 = inlined_call_operand.vmem [shape: f32[1,128], index: 11, kind: input, shape index: {}]   ;;  %s13703_s16 = inlined_call_operand.vmem [shape: bf16[128,128], index: 16, kind: input, shape index: {}]   ;;  %s13704_s13 = inlined_call_operand.vmem [shape: f32[1,128], index: 13, kind: input, shape index: {}]   ;;  %s13705_s15 = inlined_call_operand.vmem [shape: f32[1,128], index: 15, kind: input, shape index: {}]   ;;  %s13706_s17 = inlined_call_operand.vmem [shape: f32[8,128], index: 17, kind: output, shape index: {}]  }
   0x1   :  { %13823 = sst [smem:[#allocation72_spill]] %s13689_s1  ;;  %9155 = vmatprep.subr.bf16.mxu0 %v13709_v0  ;;  %9171 = vmatprep.mubr.msk.bf16.mxu0 %vm10095_vm0, %v13709_v0  ;;  %v57_v14 = vld [vmem:[%s13691_s0] sm:$0xff]  ;;  %v9299_v21 = vld [vmem:[%s13692_s5 + $0xc] ss:$48 sps:$4 sm:$0xff]   ;;  %v9297_v42 = vld [vmem:[%s13692_s5 + $0x8] ss:$48 sps:$4 sm:$0xff]  }
   0x2   :  { %13824 = sst [smem:[#allocation73_spill]] %s13690_s3  ;;  %s13825_s26 = sld [smem:[#allocation72_spill]]  ;;  %9175 = vmatprep.subr.bf16.mxu1 %v13709_v0  ;;  %9191 = vmatprep.mubr.msk.bf16.mxu1 %vm10095_vm0, %v13709_v0  ;;  %v10250_v16 = vpack.c.bf16 %v57_v14, %v57_v14  ;;  %v9294_v19 = vld [vmem:[%s13692_s5] ss:$48 sps:$4 sm:$0xff]   ;;  %v9296_v20 = vld [vmem:[%s13692_s5 + $0x4] ss:$48 sps:$4 sm:$0xff]  }
   0x3   :  { %s13826_s19 = sld [smem:[#allocation73_spill]]  ;;  %v9302_v22 = vld [vmem:[%s13692_s5 + $0x64] ss:$48 sps:$4 sm:$0xff]   ;;  %v9300_v23 = vld [vmem:[%s13692_s5 + $0x60] ss:$48 sps:$4 sm:$0xff]  }
   0x4   :  { %v9308_v24 = vld [vmem:[%s13692_s5 + $0xc4] ss:$48 sps:$4 sm:$0xff]   ;;  %v9306_v25 = vld [vmem:[%s13692_s5 + $0xc0] ss:$48 sps:$4 sm:$0xff]   ;;  %v9305_v44 = vld [vmem:[%s13692_s5 + $0x6c] ss:$48 sps:$4 sm:$0xff]  }
   0x5   :  { %v9314_v26 = vld [vmem:[%s13692_s5 + $0x124] ss:$48 sps:$4 sm:$0xff]   ;;  %v9312_v27 = vld [vmem:[%s13692_s5 + $0x120] ss:$48 sps:$4 sm:$0xff]   ;;  %v9303_v45 = vld [vmem:[%s13692_s5 + $0x68] ss:$48 sps:$4 sm:$0xff]  }
   0x6   :  { %v9320_v28 = vld [vmem:[%s13692_s5 + $0x184] ss:$48 sps:$4 sm:$0xff]   ;;  %v9318_v29 = vld [vmem:[%s13692_s5 + $0x180] ss:$48 sps:$4 sm:$0xff]   ;;  %v9311_v46 = vld [vmem:[%s13692_s5 + $0xcc] ss:$48 sps:$4 sm:$0xff]  }
   0x7   :  { %v9326_v30 = vld [vmem:[%s13692_s5 + $0x1e4] ss:$48 sps:$4 sm:$0xff]   ;;  %v9324_v31 = vld [vmem:[%s13692_s5 + $0x1e0] ss:$48 sps:$4 sm:$0xff]   ;;  %v9309_v47 = vld [vmem:[%s13692_s5 + $0xc8] ss:$48 sps:$4 sm:$0xff]  }
   0x8   :  { %v9278_v1 = vld [vmem:[%s13825_s26] sm:$0xff]   ;;  %v9279_v2 = vld [vmem:[%s13825_s26 + $0x8] sm:$0xff]   ;;  %v9280_v3 = vld [vmem:[%s13825_s26 + $0x10] sm:$0xff]  }
   0x9   :  { %9156 = vmatpush3.bf16.msra.mxu0 %v9278_v1  ;;  %v9286_v4 = vld [vmem:[%s13826_s19] sm:$0xff]   ;;  %v9281_v5 = vld [vmem:[%s13825_s26 + $0x18] sm:$0xff]   ;;  %v9287_v6 = vld [vmem:[%s13826_s19 + $0x8] sm:$0xff]  }
   0xa   :  { %9157 = vmatprep.subr.bf16.mxu0 %v13709_v0  ;;  %9176 = vmatpush3.bf16.msra.mxu1 %v9286_v4  ;;  %v9282_v7 = vld [vmem:[%s13825_s26 + $0x20] sm:$0xff]   ;;  %v9288_v8 = vld [vmem:[%s13826_s19 + $0x10] sm:$0xff]   ;;  %v9283_v9 = vld [vmem:[%s13825_s26 + $0x28] sm:$0xff]  }
   0xb   :  { %9177 = vmatprep.subr.bf16.mxu1 %v13709_v0  ;;  %v9289_v10 = vld [vmem:[%s13826_s19 + $0x18] sm:$0xff]   ;;  %v9284_v11 = vld [vmem:[%s13825_s26 + $0x30] sm:$0xff]   ;;  %v9290_v12 = vld [vmem:[%s13826_s19 + $0x20] sm:$0xff]  }
   0xc   :  { %v9285_v13 = vld [vmem:[%s13825_s26 + $0x38] sm:$0xff]   ;;  %v9291_v15 = vld [vmem:[%s13826_s19 + $0x28] sm:$0xff]   ;;  %v9292_v17 = vld [vmem:[%s13826_s19 + $0x30] sm:$0xff]  }
   0xd   :  { %9158 = vmatpush3.bf16.msra.mxu0 %v9279_v2  ;;  %v9293_v18 = vld [vmem:[%s13826_s19 + $0x38] sm:$0xff]   ;;  %v9332_v32 = vld [vmem:[%s13692_s5 + $0x244] ss:$48 sps:$4 sm:$0xff]   ;;  %v9330_v33 = vld [vmem:[%s13692_s5 + $0x240] ss:$48 sps:$4 sm:$0xff]  }
   0xe   :  { %9159 = vmatprep.subr.bf16.mxu0 %v13709_v0  ;;  %9178 = vmatpush3.bf16.msra.mxu1 %v9287_v6  ;;  %v7880_v34 = vld [vmem:[%s13693_s2] ss:$0 sm:$0xff]  ;;  %v9317_v48 = vld [vmem:[%s13692_s5 + $0x12c] ss:$48 sps:$4 sm:$0xff]   ;;  %v9315_v49 = vld [vmem:[%s13692_s5 + $0x128] ss:$48 sps:$4 sm:$0xff]  }
   0xf   :  { %9179 = vmatprep.subr.bf16.mxu1 %v13709_v0  ;;  %v9323_v50 = vld [vmem:[%s13692_s5 + $0x18c] ss:$48 sps:$4 sm:$0xff]   ;;  %v9321_v51 = vld [vmem:[%s13692_s5 + $0x188] ss:$48 sps:$4 sm:$0xff]   ;;  %v9338_v56 = vld [vmem:[%s13692_s5 + $0x2a4] ss:$48 sps:$4 sm:$0xff]  }
  0x10   :  { %v9329_v52 = vld [vmem:[%s13692_s5 + $0x1ec] ss:$48 sps:$4 sm:$0xff]   ;;  %v9327_v53 = vld [vmem:[%s13692_s5 + $0x1e8] ss:$48 sps:$4 sm:$0xff]   ;;  %v9336_v58 = vld [vmem:[%s13692_s5 + $0x2a0] ss:$48 sps:$4 sm:$0xff]  }
  0x11   :  { %9160 = vmatpush3.bf16.msra.mxu0 %v9280_v3  ;;  %v9335_v54 = vld [vmem:[%s13692_s5 + $0x24c] ss:$48 sps:$4 sm:$0xff]   ;;  %v9333_v55 = vld [vmem:[%s13692_s5 + $0x248] ss:$48 sps:$4 sm:$0xff]   ;;  %v9344_v60 = vld [vmem:[%s13692_s5 + $0x14] ss:$48 sps:$4 sm:$0xff]  }
  0x12   :  { %9161 = vmatprep.subr.bf16.mxu0 %v13709_v0  ;;  %9180 = vmatpush3.bf16.msra.mxu1 %v9288_v8  ;;  %v9341_v57 = vld [vmem:[%s13692_s5 + $0x2ac] ss:$48 sps:$4 sm:$0xff]   ;;  %v9339_v59 = vld [vmem:[%s13692_s5 + $0x2a8] ss:$48 sps:$4 sm:$0xff]   ;;  %v7889_v63 = vld [vmem:[%s13695_s4] ss:$0 sm:$0xff] }
  0x13   :  { %9181 = vmatprep.subr.bf16.mxu1 %v13709_v0  ;;  %v9347_v61 = vld [vmem:[%s13692_s5 + $0x1c] ss:$48 sps:$4 sm:$0xff]   ;;  %v9342_v8 = vld [vmem:[%s13692_s5 + $0x10] ss:$48 sps:$4 sm:$0xff]   ;;  %v9351_v14 = vld [vmem:[%s13692_s5 + $0x78] ss:$48 sps:$4 sm:$0xff]  }
  0x15   :  { %9162 = vmatpush3.bf16.msra.mxu0 %v9281_v5 }
  0x16   :  { %9163 = vmatprep.subr.bf16.mxu0 %v13709_v0  ;;  %9182 = vmatpush3.bf16.msra.mxu1 %v9289_v10 }
  0x17   :  { %9183 = vmatprep.subr.bf16.mxu1 %v13709_v0 }
  0x19   :  { %9164 = vmatpush3.bf16.msra.mxu0 %v9282_v7 }
  0x1a   :  { %9165 = vmatprep.subr.bf16.mxu0 %v13709_v0  ;;  %9184 = vmatpush3.bf16.msra.mxu1 %v9290_v12  ;;  %v9353_v12 = vld [vmem:[%s13692_s5 + $0x7c] ss:$48 sps:$4 sm:$0xff]  }
  0x1b   :  { %9185 = vmatprep.subr.bf16.mxu1 %v13709_v0 }
  0x1d   :  { %9166 = vmatpush3.bf16.msra.mxu0 %v9283_v9  ;;  %v9345_v9 = vld [vmem:[%s13692_s5 + $0x18] ss:$48 sps:$4 sm:$0xff]  }
  0x1e   :  { %9167 = vmatprep.subr.bf16.mxu0 %v13709_v0  ;;  %9186 = vmatpush3.bf16.msra.mxu1 %v9291_v15  ;;  %v9356_v15 = vld [vmem:[%s13692_s5 + $0xd4] ss:$48 sps:$4 sm:$0xff]  }
  0x1f   :  { %9187 = vmatprep.subr.bf16.mxu1 %v13709_v0 }
  0x21   :  { %9168 = vmatpush3.bf16.msra.mxu0 %v9284_v11  ;;  %v9350_v11 = vld [vmem:[%s13692_s5 + $0x74] ss:$48 sps:$4 sm:$0xff]  }
  0x22   :  { %9169 = vmatprep.subr.bf16.mxu0 %v13709_v0  ;;  %9188 = vmatpush3.bf16.msra.mxu1 %v9292_v17  ;;  %v9359_v17 = vld [vmem:[%s13692_s5 + $0xdc] ss:$48 sps:$4 sm:$0xff]  }
  0x23   :  { %9189 = vmatprep.subr.bf16.mxu1 %v13709_v0  ;;  %v10941_v0 = vld [vmem:[%s13694_s7 + $0x2bc] ss:$48 sps:$4 sm:$0xff]  }
  0x24   :  { %13839 = vst [vmem:[#allocation14_spill] sm:$0xff] %v10941_v0 }
  0x25   :  { %9170 = vmatpush3.bf16.msra.mxu0 %v9285_v13  ;;  %v9348_v13 = vld [vmem:[%s13692_s5 + $0x70] ss:$48 sps:$4 sm:$0xff]  }
  0x26   :  { %9190 = vmatpush3.bf16.msra.mxu1 %v9293_v18  ;;  %932 = vmatprep.subr.bf16.mxu0 %v9296_v20  ;;  %v9354_v18 = vld [vmem:[%s13692_s5 + $0xd0] ss:$48 sps:$4 sm:$0xff]   ;;  %v9362_v20 = vld [vmem:[%s13692_s5 + $0x134] ss:$48 sps:$4 sm:$0xff]  }
  0x27   :  { %973 = vmatprep.subr.bf16.mxu1 %v9299_v21  ;;  %v9365_v21 = vld [vmem:[%s13692_s5 + $0x13c] ss:$48 sps:$4 sm:$0xff]  }
  0x28   :  { %9172 = vmatmul.mubr.bf16.vlgmr.msra.gmra.mrb[0].mxu0 %v10250_v16 }
  0x29   :  { %933 = vmatpush1.bf16.msra.mxu0 %v9294_v19  ;;  %964 = vmatprep.mubr.bf16.mxu0 %v13711_v62  ;;  %v9357_v19 = vld [vmem:[%s13692_s5 + $0xd8] ss:$48 sps:$4 sm:$0xff]  }
  0x2a   :  { %934 = vmatprep.subr.bf16.mxu0 %v9302_v22  ;;  %v9360_v22 = vld [vmem:[%s13692_s5 + $0x130] ss:$48 sps:$4 sm:$0xff]  }
  0x2d   :  { %935 = vmatpush1.bf16.msra.mxu0 %v9300_v23  ;;  %v9363_v23 = vld [vmem:[%s13692_s5 + $0x138] ss:$48 sps:$4 sm:$0xff]  }
  0x2e   :  { %936 = vmatprep.subr.bf16.mxu0 %v9308_v24  ;;  %v9368_v24 = vld [vmem:[%s13692_s5 + $0x194] ss:$48 sps:$4 sm:$0xff]  }
  0x31   :  { %937 = vmatpush1.bf16.msra.mxu0 %v9306_v25  ;;  %v9371_v25 = vld [vmem:[%s13692_s5 + $0x19c] ss:$48 sps:$4 sm:$0xff]  }
  0x32   :  { %938 = vmatprep.subr.bf16.mxu0 %v9314_v26  ;;  %v9366_v26 = vld [vmem:[%s13692_s5 + $0x190] ss:$48 sps:$4 sm:$0xff]  }
  0x35   :  { %939 = vmatpush1.bf16.msra.mxu0 %v9312_v27  ;;  %v9369_v27 = vld [vmem:[%s13692_s5 + $0x198] ss:$48 sps:$4 sm:$0xff]  }
  0x36   :  { %940 = vmatprep.subr.bf16.mxu0 %v9320_v28  ;;  %v9374_v28 = vld [vmem:[%s13692_s5 + $0x1f4] ss:$48 sps:$4 sm:$0xff]  }
  0x39   :  { %941 = vmatpush1.bf16.msra.mxu0 %v9318_v29  ;;  %v9377_v29 = vld [vmem:[%s13692_s5 + $0x1fc] ss:$48 sps:$4 sm:$0xff]  }
  0x3a   :  { %942 = vmatprep.subr.bf16.mxu0 %v9326_v30  ;;  %v9372_v30 = vld [vmem:[%s13692_s5 + $0x1f0] ss:$48 sps:$4 sm:$0xff]  }
  0x3d   :  { %943 = vmatpush1.bf16.msra.mxu0 %v9324_v31  ;;  %v9375_v31 = vld [vmem:[%s13692_s5 + $0x1f8] ss:$48 sps:$4 sm:$0xff]  }
  0x3e   :  { %944 = vmatprep.subr.bf16.mxu0 %v9332_v32  ;;  %v9380_v32 = vld [vmem:[%s13692_s5 + $0x254] ss:$48 sps:$4 sm:$0xff]  }
  0x41   :  { %945 = vmatpush1.bf16.msra.mxu0 %v9330_v33  ;;  %v9383_v33 = vld [vmem:[%s13692_s5 + $0x25c] ss:$48 sps:$4 sm:$0xff]  }
  0x42   :  { %946 = vmatprep.subr.bf16.mxu0 %v9338_v56  ;;  %v9416_v56 = vld [vmem:[%s13692_s5 + $0x1a4] ss:$48 sps:$4 sm:$0xff]  }
  0x45   :  { %947 = vmatpush1.bf16.msra.mxu0 %v9336_v58  ;;  %v9414_v58 = vld [vmem:[%s13692_s5 + $0x1a0] ss:$48 sps:$4 sm:$0xff]  }
  0x46   :  { %1014 = vmatprep.subr.bf16.mxu0 %v9344_v60  ;;  %v9422_v60 = vld [vmem:[%s13692_s5 + $0x204] ss:$48 sps:$4 sm:$0xff]  }
  0xfb   :  { %v167_v35 = vpop.f32.mrb[0].mxu0 }
  0xfc   :  { %v168_v36 = vadd.f32 %v7880_v34, %v167_v35  ;;  %v9173_v37 = vpop.f32.mrb[1].mxu0  ;;  %v9378_v34 = vld [vmem:[%s13692_s5 + $0x250] ss:$48 sps:$4 sm:$0xff]   ;;  %v9381_v35 = vld [vmem:[%s13692_s5 + $0x258] ss:$48 sps:$4 sm:$0xff]  }
  0xfd   :  { %v170_v38 = vpop.f32.mrb[2].mxu0  ;;  %v9389_v37 = vld [vmem:[%s13692_s5 + $0x2bc] ss:$48 sps:$4 sm:$0xff]  }
  0xfe   :  { %vm173_vm1 = vcmp.gt.f32.partialorder %v168_v36, 0.0  ;;  %v174_v39 = vmul.f32 0.01, %v168_v36  ;;  %v9174_v40 = vpop.f32.mrb[3].mxu0  ;;  %v9384_v38 = vld [vmem:[%s13692_s5 + $0x2b0] ss:$48 sps:$4 sm:$0xff]  }
  0xff   :  { %v9392_v40 = vld [vmem:[%s13692_s5 + $0x24] ss:$48 sps:$4 sm:$0xff]  }
 0x100   :  { %v175_v41 = vsel %vm173_vm1, %v168_v36, %v174_v39  ;;  %v9386_v36 = vld [vmem:[%s13692_s5 + $0x2b4] ss:$48 sps:$4 sm:$0xff]   ;;  %v9387_v39 = vld [vmem:[%s13692_s5 + $0x2b8] ss:$48 sps:$4 sm:$0xff]  }
 0x101   :  { %v176_v43 = vpack.c.bf16 %v175_v41, %v175_v41  ;;  %v9395_v41 = vld [vmem:[%s13692_s5 + $0x2c] ss:$48 sps:$4 sm:$0xff]  }
 0x103   :  { %9192 = vmatmul.mubr.bf16.vlgmr.msra.gmra.mrb[0].mxu1 %v176_v43  ;;  %v9393_v43 = vld [vmem:[%s13692_s5 + $0x28] ss:$48 sps:$4 sm:$0xff]  }
 0x104   :  { %974 = vmatpush1.bf16.msra.mxu1 %v9297_v42  ;;  %1005 = vmatprep.mubr.bf16.mxu1 %v13711_v62  ;;  %v9390_v42 = vld [vmem:[%s13692_s5 + $0x20] ss:$48 sps:$4 sm:$0xff]  }
 0x105   :  { %975 = vmatprep.subr.bf16.mxu1 %v9305_v44  ;;  %v9398_v44 = vld [vmem:[%s13692_s5 + $0x84] ss:$48 sps:$4 sm:$0xff]  }
 0x108   :  { %976 = vmatpush1.bf16.msra.mxu1 %v9303_v45  ;;  %v9401_v45 = vld [vmem:[%s13692_s5 + $0x8c] ss:$48 sps:$4 sm:$0xff]  }
 0x109   :  { %977 = vmatprep.subr.bf16.mxu1 %v9311_v46  ;;  %v9396_v46 = vld [vmem:[%s13692_s5 + $0x80] ss:$48 sps:$4 sm:$0xff]  }
 0x10c   :  { %978 = vmatpush1.bf16.msra.mxu1 %v9309_v47  ;;  %v9399_v47 = vld [vmem:[%s13692_s5 + $0x88] ss:$48 sps:$4 sm:$0xff]  }
 0x10d   :  { %979 = vmatprep.subr.bf16.mxu1 %v9317_v48  ;;  %v9404_v48 = vld [vmem:[%s13692_s5 + $0xe4] ss:$48 sps:$4 sm:$0xff]  }
 0x110   :  { %980 = vmatpush1.bf16.msra.mxu1 %v9315_v49  ;;  %v9407_v49 = vld [vmem:[%s13692_s5 + $0xec] ss:$48 sps:$4 sm:$0xff]  }
 0x111   :  { %981 = vmatprep.subr.bf16.mxu1 %v9323_v50  ;;  %v9402_v50 = vld [vmem:[%s13692_s5 + $0xe0] ss:$48 sps:$4 sm:$0xff]  }
 0x114   :  { %982 = vmatpush1.bf16.msra.mxu1 %v9321_v51  ;;  %v9405_v51 = vld [vmem:[%s13692_s5 + $0xe8] ss:$48 sps:$4 sm:$0xff]  }
 0x115   :  { %983 = vmatprep.subr.bf16.mxu1 %v9329_v52  ;;  %v9410_v52 = vld [vmem:[%s13692_s5 + $0x144] ss:$48 sps:$4 sm:$0xff]  }
 0x118   :  { %984 = vmatpush1.bf16.msra.mxu1 %v9327_v53  ;;  %v9413_v53 = vld [vmem:[%s13692_s5 + $0x14c] ss:$48 sps:$4 sm:$0xff]  }
 0x119   :  { %985 = vmatprep.subr.bf16.mxu1 %v9335_v54  ;;  %v9408_v54 = vld [vmem:[%s13692_s5 + $0x140] ss:$48 sps:$4 sm:$0xff]  }
 0x11c   :  { %986 = vmatpush1.bf16.msra.mxu1 %v9333_v55  ;;  %v9411_v55 = vld [vmem:[%s13692_s5 + $0x148] ss:$48 sps:$4 sm:$0xff]  }
 0x11d   :  { %987 = vmatprep.subr.bf16.mxu1 %v9341_v57  ;;  %v9419_v57 = vld [vmem:[%s13692_s5 + $0x1ac] ss:$48 sps:$4 sm:$0xff]  }
 0x120   :  { %988 = vmatpush1.bf16.msra.mxu1 %v9339_v59  ;;  %v9417_v59 = vld [vmem:[%s13692_s5 + $0x1a8] ss:$48 sps:$4 sm:$0xff]  }
 0x121   :  { %1055 = vmatprep.subr.bf16.mxu1 %v9347_v61  ;;  %v9425_v61 = vld [vmem:[%s13692_s5 + $0x20c] ss:$48 sps:$4 sm:$0xff]  }
 0x1d6   :  { %v282_v1 = vpop.f32.mrb[0].mxu1 }
 0x1d7   :  { %v283_v2 = vadd.f32 %v7889_v63, %v282_v1  ;;  %v9193_v3 = vpop.f32.mrb[1].mxu1  ;;  %v9420_v63 = vld [vmem:[%s13692_s5 + $0x200] ss:$48 sps:$4 sm:$0xff]   ;;  %v9423_v1 = vld [vmem:[%s13692_s5 + $0x208] ss:$48 sps:$4 sm:$0xff]  }
 0x1d8   :  { %v285_v4 = vpop.f32.mrb[2].mxu1  ;;  %v9431_v3 = vld [vmem:[%s13692_s5 + $0x26c] ss:$48 sps:$4 sm:$0xff]  }
 0x1d9   :  { %vm288_vm2 = vcmp.gt.f32.partialorder %v283_v2, 0.0  ;;  %v289_v5 = vmul.f32 0.01, %v283_v2  ;;  %v9194_v6 = vpop.f32.mrb[3].mxu1  ;;  %v9426_v4 = vld [vmem:[%s13692_s5 + $0x260] ss:$48 sps:$4 sm:$0xff]  }
 0x1da   :  { %v9434_v6 = vld [vmem:[%s13692_s5 + $0x2c4] ss:$48 sps:$4 sm:$0xff]  }
 0x1db   :  { %v290_v7 = vsel %vm288_vm2, %v283_v2, %v289_v5  ;;  %v9428_v2 = vld [vmem:[%s13692_s5 + $0x264] ss:$48 sps:$4 sm:$0xff]   ;;  %v9429_v5 = vld [vmem:[%s13692_s5 + $0x268] ss:$48 sps:$4 sm:$0xff]  }
 0x1dc   :  { %v10377_v10 = vpack.c.bf16 %v290_v7, %v290_v7  ;;  %v9437_v7 = vld [vmem:[%s13692_s5 + $0x2cc] ss:$48 sps:$4 sm:$0xff]  }
 0x1de   :  { %965 = vmatmul.mubr.bf16.vlgmr.msra.gmra.mrb[4].mxu0 %v10377_v10  ;;  %1006 = vmatmul.mubr.bf16.vlgmr.msra.gmra.mrb[4].mxu1 %v10377_v10 }
 0x1df   :  { %1015 = vmatpush1.bf16.msra.mxu0 %v9342_v8  ;;  %1056 = vmatpush1.bf16.msra.mxu1 %v9345_v9  ;;  %v9432_v8 = vld [vmem:[%s13692_s5 + $0x2c0] ss:$48 sps:$4 sm:$0xff]   ;;  %v9435_v9 = vld [vmem:[%s13692_s5 + $0x2c8] ss:$48 sps:$4 sm:$0xff]  }
 0x1e0   :  { %1016 = vmatprep.subr.bf16.mxu0 %v9350_v11  ;;  %1057 = vmatprep.subr.bf16.mxu1 %v9353_v12  ;;  %v10570_v11 = vld [vmem:[%s13694_s7 + $0x4] ss:$48 sps:$4 sm:$0xff]   ;;  %v10575_v12 = vld [vmem:[%s13694_s7 + $0xc] ss:$48 sps:$4 sm:$0xff]  }
 0x1e1   :  { %1046 = vmatprep.mubr.bf16.mxu0 %v13711_v62  ;;  %1087 = vmatprep.mubr.bf16.mxu1 %v13711_v62 }
 0x1e3   :  { %1017 = vmatpush1.bf16.msra.mxu0 %v9348_v13  ;;  %1058 = vmatpush1.bf16.msra.mxu1 %v9351_v14  ;;  %v10580_v13 = vld [vmem:[%s13694_s7] ss:$48 sps:$4 sm:$0xff]   ;;  %v10585_v14 = vld [vmem:[%s13694_s7 + $0x8] ss:$48 sps:$4 sm:$0xff]  }
 0x1e4   :  { %1018 = vmatprep.subr.bf16.mxu0 %v9356_v15  ;;  %1059 = vmatprep.subr.bf16.mxu1 %v9359_v17  ;;  %v10592_v15 = vld [vmem:[%s13694_s7 + $0x64] ss:$48 sps:$4 sm:$0xff]   ;;  %v10597_v17 = vld [vmem:[%s13694_s7 + $0x6c] ss:$48 sps:$4 sm:$0xff]  }
 0x1e7   :  { %1019 = vmatpush1.bf16.msra.mxu0 %v9354_v18  ;;  %1060 = vmatpush1.bf16.msra.mxu1 %v9357_v19  ;;  %v10606_v18 = vld [vmem:[%s13694_s7 + $0x60] ss:$48 sps:$4 sm:$0xff]   ;;  %v10611_v19 = vld [vmem:[%s13694_s7 + $0x68] ss:$48 sps:$4 sm:$0xff]  }
 0x1e8   :  { %1020 = vmatprep.subr.bf16.mxu0 %v9362_v20  ;;  %1061 = vmatprep.subr.bf16.mxu1 %v9365_v21  ;;  %v10623_v20 = vld [vmem:[%s13694_s7 + $0xcc] ss:$48 sps:$4 sm:$0xff]   ;;  %v10632_v21 = vld [vmem:[%s13694_s7 + $0xc0] ss:$48 sps:$4 sm:$0xff]  }
 0x1eb   :  { %1021 = vmatpush1.bf16.msra.mxu0 %v9360_v22  ;;  %1062 = vmatpush1.bf16.msra.mxu1 %v9363_v23  ;;  %v10637_v22 = vld [vmem:[%s13694_s7 + $0xc8] ss:$48 sps:$4 sm:$0xff]   ;;  %v10644_v23 = vld [vmem:[%s13694_s7 + $0x124] ss:$48 sps:$4 sm:$0xff]  }
 0x1ec   :  { %1022 = vmatprep.subr.bf16.mxu0 %v9368_v24  ;;  %1063 = vmatprep.subr.bf16.mxu1 %v9371_v25  ;;  %v10649_v24 = vld [vmem:[%s13694_s7 + $0x12c] ss:$48 sps:$4 sm:$0xff]   ;;  %v10656_v25 = vld [vmem:[%s13694_s7 + $0x120] ss:$48 sps:$4 sm:$0xff]  }
 0x1ef   :  { %1023 = vmatpush1.bf16.msra.mxu0 %v9366_v26  ;;  %1064 = vmatpush1.bf16.msra.mxu1 %v9369_v27  ;;  %v10661_v26 = vld [vmem:[%s13694_s7 + $0x128] ss:$48 sps:$4 sm:$0xff]   ;;  %v10668_v27 = vld [vmem:[%s13694_s7 + $0x184] ss:$48 sps:$4 sm:$0xff]  }
 0x1f0   :  { %1024 = vmatprep.subr.bf16.mxu0 %v9374_v28  ;;  %1065 = vmatprep.subr.bf16.mxu1 %v9377_v29  ;;  %v10673_v28 = vld [vmem:[%s13694_s7 + $0x18c] ss:$48 sps:$4 sm:$0xff]   ;;  %v10680_v29 = vld [vmem:[%s13694_s7 + $0x180] ss:$48 sps:$4 sm:$0xff]  }
 0x1f3   :  { %1025 = vmatpush1.bf16.msra.mxu0 %v9372_v30  ;;  %1066 = vmatpush1.bf16.msra.mxu1 %v9375_v31  ;;  %v10685_v30 = vld [vmem:[%s13694_s7 + $0x188] ss:$48 sps:$4 sm:$0xff]   ;;  %v10692_v31 = vld [vmem:[%s13694_s7 + $0x1e4] ss:$48 sps:$4 sm:$0xff]  }
 0x1f4   :  { %1026 = vmatprep.subr.bf16.mxu0 %v9380_v32  ;;  %1067 = vmatprep.subr.bf16.mxu1 %v9383_v33  ;;  %v10697_v32 = vld [vmem:[%s13694_s7 + $0x1ec] ss:$48 sps:$4 sm:$0xff]   ;;  %v10704_v33 = vld [vmem:[%s13694_s7 + $0x1e0] ss:$48 sps:$4 sm:$0xff]  }
 0x1f7   :  { %1027 = vmatpush1.bf16.msra.mxu0 %v9378_v34  ;;  %1068 = vmatpush1.bf16.msra.mxu1 %v9381_v35  ;;  %v10709_v34 = vld [vmem:[%s13694_s7 + $0x1e8] ss:$48 sps:$4 sm:$0xff]   ;;  %v10716_v35 = vld [vmem:[%s13694_s7 + $0x244] ss:$48 sps:$4 sm:$0xff]  }
 0x1f8   :  { %1028 = vmatprep.subr.bf16.mxu0 %v9386_v36  ;;  %1069 = vmatprep.subr.bf16.mxu1 %v9389_v37  ;;  %v10721_v36 = vld [vmem:[%s13694_s7 + $0x24c] ss:$48 sps:$4 sm:$0xff]   ;;  %v10728_v37 = vld [vmem:[%s13694_s7 + $0x240] ss:$48 sps:$4 sm:$0xff]  }
 0x1fb   :  { %1029 = vmatpush1.bf16.msra.mxu0 %v9384_v38  ;;  %1070 = vmatpush1.bf16.msra.mxu1 %v9387_v39  ;;  %v10733_v38 = vld [vmem:[%s13694_s7 + $0x248] ss:$48 sps:$4 sm:$0xff]   ;;  %v10740_v39 = vld [vmem:[%s13694_s7 + $0x2a4] ss:$48 sps:$4 sm:$0xff]  }
 0x1fc   :  { %1096 = vmatprep.subr.bf16.mxu0 %v9392_v40  ;;  %1137 = vmatprep.subr.bf16.mxu1 %v9395_v41  ;;  %v10745_v40 = vld [vmem:[%s13694_s7 + $0x2ac] ss:$48 sps:$4 sm:$0xff]   ;;  %v10752_v41 = vld [vmem:[%s13694_s7 + $0x2a0] ss:$48 sps:$4 sm:$0xff]  }
 0x1fe   :  { %1047 = vmatmul.mubr.bf16.vlgmr.msra.gmra.mrb[8].mxu0 %v10377_v10  ;;  %1088 = vmatmul.mubr.bf16.vlgmr.msra.gmra.mrb[8].mxu1 %v10377_v10 }
 0x1ff   :  { %1097 = vmatpush1.bf16.msra.mxu0 %v9390_v42  ;;  %1138 = vmatpush1.bf16.msra.mxu1 %v9393_v43  ;;  %v10757_v42 = vld [vmem:[%s13694_s7 + $0x2a8] ss:$48 sps:$4 sm:$0xff]   ;;  %v10764_v43 = vld [vmem:[%s13694_s7 + $0x14] ss:$48 sps:$4 sm:$0xff]  }
 0x200   :  { %1098 = vmatprep.subr.bf16.mxu0 %v9398_v44  ;;  %1139 = vmatprep.subr.bf16.mxu1 %v9401_v45  ;;  %v10769_v44 = vld [vmem:[%s13694_s7 + $0x1c] ss:$48 sps:$4 sm:$0xff]   ;;  %v10776_v45 = vld [vmem:[%s13694_s7 + $0x10] ss:$48 sps:$4 sm:$0xff]  }
 0x201   :  { %1128 = vmatprep.mubr.bf16.mxu0 %v13711_v62  ;;  %1169 = vmatprep.mubr.bf16.mxu1 %v13711_v62 }
 0x203   :  { %1099 = vmatpush1.bf16.msra.mxu0 %v9396_v46  ;;  %1140 = vmatpush1.bf16.msra.mxu1 %v9399_v47  ;;  %v10781_v46 = vld [vmem:[%s13694_s7 + $0x18] ss:$48 sps:$4 sm:$0xff]   ;;  %v10788_v47 = vld [vmem:[%s13694_s7 + $0x74] ss:$48 sps:$4 sm:$0xff]  }
 0x204   :  { %1100 = vmatprep.subr.bf16.mxu0 %v9404_v48  ;;  %1141 = vmatprep.subr.bf16.mxu1 %v9407_v49  ;;  %v10793_v48 = vld [vmem:[%s13694_s7 + $0x7c] ss:$48 sps:$4 sm:$0xff]   ;;  %v10802_v49 = vld [vmem:[%s13694_s7 + $0x70] ss:$48 sps:$4 sm:$0xff]  }
 0x207   :  { %1101 = vmatpush1.bf16.msra.mxu0 %v9402_v50  ;;  %1142 = vmatpush1.bf16.msra.mxu1 %v9405_v51  ;;  %v10807_v50 = vld [vmem:[%s13694_s7 + $0x78] ss:$48 sps:$4 sm:$0xff]   ;;  %v10814_v51 = vld [vmem:[%s13694_s7 + $0xd4] ss:$48 sps:$4 sm:$0xff]  }
 0x208   :  { %1102 = vmatprep.subr.bf16.mxu0 %v9410_v52  ;;  %1143 = vmatprep.subr.bf16.mxu1 %v9413_v53  ;;  %v10819_v52 = vld [vmem:[%s13694_s7 + $0xdc] ss:$48 sps:$4 sm:$0xff]   ;;  %v10828_v53 = vld [vmem:[%s13694_s7 + $0xd0] ss:$48 sps:$4 sm:$0xff]  }
 0x20b   :  { %1103 = vmatpush1.bf16.msra.mxu0 %v9408_v54  ;;  %1144 = vmatpush1.bf16.msra.mxu1 %v9411_v55  ;;  %v10833_v54 = vld [vmem:[%s13694_s7 + $0xd8] ss:$48 sps:$4 sm:$0xff]   ;;  %v10840_v55 = vld [vmem:[%s13694_s7 + $0x134] ss:$48 sps:$4 sm:$0xff]  }
 0x20c   :  { %1104 = vmatprep.subr.bf16.mxu0 %v9416_v56  ;;  %1145 = vmatprep.subr.bf16.mxu1 %v9419_v57  ;;  %v10845_v56 = vld [vmem:[%s13694_s7 + $0x13c] ss:$48 sps:$4 sm:$0xff]   ;;  %v10852_v57 = vld [vmem:[%s13694_s7 + $0x130] ss:$48 sps:$4 sm:$0xff]  }
 0x20f   :  { %1105 = vmatpush1.bf16.msra.mxu0 %v9414_v58  ;;  %1146 = vmatpush1.bf16.msra.mxu1 %v9417_v59  ;;  %v10857_v58 = vld [vmem:[%s13694_s7 + $0x138] ss:$48 sps:$4 sm:$0xff]   ;;  %v10864_v59 = vld [vmem:[%s13694_s7 + $0x194] ss:$48 sps:$4 sm:$0xff]  }
 0x210   :  { %1106 = vmatprep.subr.bf16.mxu0 %v9422_v60  ;;  %1147 = vmatprep.subr.bf16.mxu1 %v9425_v61  ;;  %v10869_v60 = vld [vmem:[%s13694_s7 + $0x19c] ss:$48 sps:$4 sm:$0xff]   ;;  %v10876_v61 = vld [vmem:[%s13694_s7 + $0x190] ss:$48 sps:$4 sm:$0xff]  }
 0x211   :  { %13827 = vst [vmem:[#allocation2_spill] sm:$0xff] %v10869_v60  ;;  %13828 = vst [vmem:[#allocation3_spill] sm:$0xff] %v10876_v61 }
 0x213   :  { %1107 = vmatpush1.bf16.msra.mxu0 %v9420_v63  ;;  %1148 = vmatpush1.bf16.msra.mxu1 %v9423_v1  ;;  %v10881_v63 = vld [vmem:[%s13694_s7 + $0x198] ss:$48 sps:$4 sm:$0xff]   ;;  %v10888_v1 = vld [vmem:[%s13694_s7 + $0x1f4] ss:$48 sps:$4 sm:$0xff]  }
 0x214   :  { %1108 = vmatprep.subr.bf16.mxu0 %v9428_v2  ;;  %1149 = vmatprep.subr.bf16.mxu1 %v9431_v3  ;;  %13829 = vst [vmem:[#allocation4_spill] sm:$0xff] %v10881_v63  ;;  %13830 = vst [vmem:[#allocation5_spill] sm:$0xff] %v10888_v1  ;;  %v10893_v2 = vld [vmem:[%s13694_s7 + $0x1fc] ss:$48 sps:$4 sm:$0xff]   ;;  %v10900_v3 = vld [vmem:[%s13694_s7 + $0x1f0] ss:$48 sps:$4 sm:$0xff]  }
 0x215   :  { %13831 = vst [vmem:[#allocation6_spill] sm:$0xff] %v10893_v2  ;;  %13832 = vst [vmem:[#allocation7_spill] sm:$0xff] %v10900_v3 }
 0x217   :  { %1109 = vmatpush1.bf16.msra.mxu0 %v9426_v4  ;;  %1150 = vmatpush1.bf16.msra.mxu1 %v9429_v5  ;;  %v10905_v4 = vld [vmem:[%s13694_s7 + $0x1f8] ss:$48 sps:$4 sm:$0xff]   ;;  %v10912_v5 = vld [vmem:[%s13694_s7 + $0x254] ss:$48 sps:$4 sm:$0xff]  }
 0x218   :  { %1110 = vmatprep.subr.bf16.mxu0 %v9434_v6  ;;  %1151 = vmatprep.subr.bf16.mxu1 %v9437_v7  ;;  %13833 = vst [vmem:[#allocation8_spill] sm:$0xff] %v10905_v4  ;;  %13834 = vst [vmem:[#allocation9_spill] sm:$0xff] %v10912_v5  ;;  %v10917_v6 = vld [vmem:[%s13694_s7 + $0x25c] ss:$48 sps:$4 sm:$0xff]   ;;  %v10924_v7 = vld [vmem:[%s13694_s7 + $0x250] ss:$48 sps:$4 sm:$0xff]  }
 0x219   :  { %13835 = vst [vmem:[#allocation10_spill] sm:$0xff] %v10917_v6  ;;  %13836 = vst [vmem:[#allocation11_spill] sm:$0xff] %v10924_v7 }
 0x21b   :  { %1111 = vmatpush1.bf16.msra.mxu0 %v9432_v8  ;;  %1152 = vmatpush1.bf16.msra.mxu1 %v9435_v9  ;;  %v10929_v8 = vld [vmem:[%s13694_s7 + $0x258] ss:$48 sps:$4 sm:$0xff]   ;;  %v10936_v9 = vld [vmem:[%s13694_s7 + $0x2b4] ss:$48 sps:$4 sm:$0xff]  }
 0x21c   :  { %1754 = vmatprep.subr.bf16.mxu0 %v10570_v11  ;;  %1795 = vmatprep.subr.bf16.mxu1 %v10575_v12  ;;  %13837 = vst [vmem:[#allocation12_spill] sm:$0xff] %v10929_v8  ;;  %13838 = vst [vmem:[#allocation13_spill] sm:$0xff] %v10936_v9 }
 0x21e   :  { %1129 = vmatmul.mubr.bf16.vlgmr.msra.gmra.mrb[12].mxu0 %v10377_v10  ;;  %1170 = vmatmul.mubr.bf16.vlgmr.msra.gmra.mrb[12].mxu1 %v10377_v10  ;;  %v10618_v10 = vld [vmem:[%s13694_s7 + $0xc4] ss:$48 sps:$4 sm:$0xff]  }
 0x21f   :  { %1755 = vmatpush1.bf16.msra.mxu0 %v10580_v13  ;;  %1796 = vmatpush1.bf16.msra.mxu1 %v10585_v14 }
 0x220   :  { %1756 = vmatprep.subr.bf16.mxu0 %v10592_v15  ;;  %1797 = vmatprep.subr.bf16.mxu1 %v10597_v17 }
 0x221   :  { %1786 = vmatprep.mubr.bf16.mxu0 %v13711_v62  ;;  %1827 = vmatprep.mubr.bf16.mxu1 %v13711_v62 }
 0x223   :  { %1757 = vmatpush1.bf16.msra.mxu0 %v10606_v18  ;;  %1798 = vmatpush1.bf16.msra.mxu1 %v10611_v19 }
 0x224   :  { %1758 = vmatprep.subr.bf16.mxu0 %v10618_v10  ;;  %1799 = vmatprep.subr.bf16.mxu1 %v10623_v20 }
 0x227   :  { %1759 = vmatpush1.bf16.msra.mxu0 %v10632_v21  ;;  %1800 = vmatpush1.bf16.msra.mxu1 %v10637_v22 }
 0x228   :  { %1760 = vmatprep.subr.bf16.mxu0 %v10644_v23  ;;  %1801 = vmatprep.subr.bf16.mxu1 %v10649_v24 }
 0x22b   :  { %1761 = vmatpush1.bf16.msra.mxu0 %v10656_v25  ;;  %1802 = vmatpush1.bf16.msra.mxu1 %v10661_v26 }
 0x22c   :  { %1762 = vmatprep.subr.bf16.mxu0 %v10668_v27  ;;  %1803 = vmatprep.subr.bf16.mxu1 %v10673_v28 }
 0x22f   :  { %1763 = vmatpush1.bf16.msra.mxu0 %v10680_v29  ;;  %1804 = vmatpush1.bf16.msra.mxu1 %v10685_v30 }
 0x230   :  { %1764 = vmatprep.subr.bf16.mxu0 %v10692_v31  ;;  %1805 = vmatprep.subr.bf16.mxu1 %v10697_v32 }
 0x233   :  { %1765 = vmatpush1.bf16.msra.mxu0 %v10704_v33  ;;  %1806 = vmatpush1.bf16.msra.mxu1 %v10709_v34 }
 0x234   :  { %1766 = vmatprep.subr.bf16.mxu0 %v10716_v35  ;;  %1807 = vmatprep.subr.bf16.mxu1 %v10721_v36 }
 0x237   :  { %1767 = vmatpush1.bf16.msra.mxu0 %v10728_v37  ;;  %1808 = vmatpush1.bf16.msra.mxu1 %v10733_v38 }
 0x238   :  { %1768 = vmatprep.subr.bf16.mxu0 %v10740_v39  ;;  %1809 = vmatprep.subr.bf16.mxu1 %v10745_v40 }
 0x23b   :  { %1769 = vmatpush1.bf16.msra.mxu0 %v10752_v41  ;;  %1810 = vmatpush1.bf16.msra.mxu1 %v10757_v42 }
 0x23c   :  { %1836 = vmatprep.subr.bf16.mxu0 %v10764_v43  ;;  %1877 = vmatprep.subr.bf16.mxu1 %v10769_v44 }
 0x23e   :  { %1787 = vmatmul.mubr.bf16.vlgmr.msra.gmra.mrb[16].mxu0 %v10250_v16  ;;  %1828 = vmatmul.mubr.bf16.vlgmr.msra.gmra.mrb[16].mxu1 %v10250_v16 }
 0x23f   :  { %1837 = vmatpush1.bf16.msra.mxu0 %v10776_v45  ;;  %1878 = vmatpush1.bf16.msra.mxu1 %v10781_v46 }
 0x240   :  { %1838 = vmatprep.subr.bf16.mxu0 %v10788_v47  ;;  %1879 = vmatprep.subr.bf16.mxu1 %v10793_v48 }
 0x241   :  { %1868 = vmatprep.mubr.bf16.mxu0 %v13711_v62  ;;  %1909 = vmatprep.mubr.bf16.mxu1 %v13711_v62  ;;  %v392_v62 = vlaneseq }
 0x243   :  { %1839 = vmatpush1.bf16.msra.mxu0 %v10802_v49  ;;  %1880 = vmatpush1.bf16.msra.mxu1 %v10807_v50 }
 0x244   :  { %1840 = vmatprep.subr.bf16.mxu0 %v10814_v51  ;;  %1881 = vmatprep.subr.bf16.mxu1 %v10819_v52 }
 0x247   :  { %1841 = vmatpush1.bf16.msra.mxu0 %v10828_v53  ;;  %1882 = vmatpush1.bf16.msra.mxu1 %v10833_v54 }
 0x248   :  { %1842 = vmatprep.subr.bf16.mxu0 %v10840_v55  ;;  %1883 = vmatprep.subr.bf16.mxu1 %v10845_v56 }
 0x24b   :  { %1843 = vmatpush1.bf16.msra.mxu0 %v10852_v57  ;;  %1884 = vmatpush1.bf16.msra.mxu1 %v10857_v58 }
 0x24c   :  { %1844 = vmatprep.subr.bf16.mxu0 %v10864_v59  ;;  %1885 = vmatprep.subr.bf16.mxu1 %v10869_v60  ;;  %v11145_v60 = vld [vmem:[%s13694_s7 + $0x260] ss:$48 sps:$4 sm:$0xff]  }
 0x24f   :  { %1845 = vmatpush1.bf16.msra.mxu0 %v10876_v61  ;;  %1886 = vmatpush1.bf16.msra.mxu1 %v10881_v63 }
 0x250   :  { %1846 = vmatprep.subr.bf16.mxu0 %v10888_v1  ;;  %1887 = vmatprep.subr.bf16.mxu1 %v10893_v2  ;;  %v13855_v1 = vmov 0  }
 0x253   :  { %1847 = vmatpush1.bf16.msra.mxu0 %v10900_v3  ;;  %1888 = vmatpush1.bf16.msra.mxu1 %v10905_v4  ;;  %v10967_v4 = vshrl.u32 %v392_v62, 7  ;;  %v10986_v62 = vld [vmem:[%s13694_s7 + $0x84] ss:$48 sps:$4 sm:$0xff]  }
 0x254   :  { %1848 = vmatprep.subr.bf16.mxu0 %v10912_v5  ;;  %1889 = vmatprep.subr.bf16.mxu1 %v10917_v6  ;;  %v10948_v5 = vld [vmem:[%s13694_s7 + $0x2b0] ss:$48 sps:$4 sm:$0xff]   ;;  %v10953_v6 = vld [vmem:[%s13694_s7 + $0x2b8] ss:$48 sps:$4 sm:$0xff]   ;;  %13847 = vst [vmem:[#allocation22_spill] sm:$0xff] %v10986_v62 }
 0x255   :  { %13840 = vst [vmem:[#allocation15_spill] sm:$0xff] %v10948_v5  ;;  %13841 = vst [vmem:[#allocation16_spill] sm:$0xff] %v10953_v6  ;;  %v13851_v3 = vsub.s32 0, %v10967_v4 }
 0x256   :  { %13844 = vst [vmem:[#allocation19_spill] sm:$0xff] %v10967_v4 }
 0x257   :  { %1849 = vmatpush1.bf16.msra.mxu0 %v10924_v7  ;;  %1890 = vmatpush1.bf16.msra.mxu1 %v10929_v8  ;;  %v10960_v7 = vld [vmem:[%s13694_s7 + $0x24] ss:$48 sps:$4 sm:$0xff]   ;;  %v10965_v8 = vld [vmem:[%s13694_s7 + $0x2c] ss:$48 sps:$4 sm:$0xff]  }
 0x258   :  { %1850 = vmatprep.subr.bf16.mxu0 %v10936_v9  ;;  %1891 = vmatprep.subr.bf16.mxu1 %v10941_v0  ;;  %13842 = vst [vmem:[#allocation17_spill] sm:$0xff] %v10960_v7  ;;  %13843 = vst [vmem:[#allocation18_spill] sm:$0xff] %v10965_v8  ;;  %v10974_v0 = vld [vmem:[%s13694_s7 + $0x20] ss:$48 sps:$4 sm:$0xff]   ;;  %v10979_v9 = vld [vmem:[%s13694_s7 + $0x28] ss:$48 sps:$4 sm:$0xff]  }
 0x259   :  { %13845 = vst [vmem:[#allocation20_spill] sm:$0xff] %v10974_v0  ;;  %13846 = vst [vmem:[#allocation21_spill] sm:$0xff] %v10979_v9 }
 0x25b   :  { %1851 = vmatpush1.bf16.msra.mxu0 %v10948_v5  ;;  %1892 = vmatpush1.bf16.msra.mxu1 %v10953_v6  ;;  %v10991_v6 = vld [vmem:[%s13694_s7 + $0x8c] ss:$48 sps:$4 sm:$0xff]   ;;  %v11009_v5 = vld [vmem:[%s13694_s7 + $0x88] ss:$48 sps:$4 sm:$0xff]  }
 0x25c   :  { %1918 = vmatprep.subr.bf16.mxu0 %v10960_v7  ;;  %1959 = vmatprep.subr.bf16.mxu1 %v10965_v8  ;;  %13848 = vst [vmem:[#allocation23_spill] sm:$0xff] %v10991_v6  ;;  %v389_v8 = vld [vmem:[%s13696_s6 + $0x8] sm:$0xf]  ;;  %v11004_v7 = vld [vmem:[%s13694_s7 + $0x80] ss:$48 sps:$4 sm:$0xff]   ;;  %13850 = vst [vmem:[#allocation25_spill] sm:$0xff] %v11009_v5 }
 0x25d   :  { %13849 = vst [vmem:[#allocation24_spill] sm:$0xff] %v11004_v7  ;;  %v11013_v2 = vrot.slane %v389_v8, %v13851_v3  ;;  %v11034_v3 = vld [vmem:[%s13694_s7 + $0xe0] ss:$48 sps:$4 sm:$0xff]  }
 0x25e   :  { %1869 = vmatmul.mubr.bf16.vlgmr.msra.gmra.mrb[20].mxu0 %v10250_v16  ;;  %1910 = vmatmul.mubr.bf16.vlgmr.msra.gmra.mrb[20].mxu1 %v10250_v16  ;;  %13856 = vst [vmem:[#allocation29_spill] sm:$0xff] %v11034_v3 }
 0x25f   :  { %1919 = vmatpush1.bf16.msra.mxu0 %v10974_v0  ;;  %1960 = vmatpush1.bf16.msra.mxu1 %v10979_v9  ;;  %13852 = vst [vmem:[#allocation26_spill] sm:$0xff] %v11013_v2  ;;  %v11020_v9 = vld [vmem:[%s13694_s7 + $0xe4] ss:$48 sps:$4 sm:$0xff]   ;;  %v11025_v0 = vld [vmem:[%s13694_s7 + $0xec] ss:$48 sps:$4 sm:$0xff]  }
 0x260   :  { %1920 = vmatprep.subr.bf16.mxu0 %v10986_v62  ;;  %1961 = vmatprep.subr.bf16.mxu1 %v10991_v6  ;;  %13853 = vst [vmem:[#allocation27_spill] sm:$0xff] %v11020_v9  ;;  %13854 = vst [vmem:[#allocation28_spill] sm:$0xff] %v11025_v0  ;;  %v11039_v2 = vld [vmem:[%s13694_s7 + $0xe8] ss:$48 sps:$4 sm:$0xff]   ;;  %v13750_v62 = vsub.s32 1, %v10967_v4 }
 0x261   :  { %1950 = vmatprep.mubr.bf16.mxu0 %v13855_v1  ;;  %1991 = vmatprep.mubr.bf16.mxu1 %v13855_v1  ;;  %13857 = vst [vmem:[#allocation30_spill] sm:$0xff] %v11039_v2  ;;  %v11121_v6 = vld [vmem:[%s13694_s7 + $0x264] ss:$48 sps:$4 sm:$0xff]  }
 0x262   :  { %v11134_v63 = vrot.slane %v389_v8, %v13750_v62  ;;  %v11169_v62 = vld [vmem:[%s13694_s7 + $0x2c0] ss:$48 sps:$4 sm:$0xff]  }
 0x263   :  { %1921 = vmatpush1.bf16.msra.mxu0 %v11004_v7  ;;  %1962 = vmatpush1.bf16.msra.mxu1 %v11009_v5  ;;  %v11046_v7 = vld [vmem:[%s13694_s7 + $0x144] ss:$48 sps:$4 sm:$0xff]   ;;  %v11051_v5 = vld [vmem:[%s13694_s7 + $0x14c] ss:$48 sps:$4 sm:$0xff]  }
 0x264   :  { %1922 = vmatprep.subr.bf16.mxu0 %v11020_v9  ;;  %1963 = vmatprep.subr.bf16.mxu1 %v11025_v0  ;;  %13858 = vst [vmem:[#allocation31_spill] sm:$0xff] %v11046_v7  ;;  %13859 = vst [vmem:[#allocation32_spill] sm:$0xff] %v11051_v5  ;;  %v11058_v9 = vld [vmem:[%s13694_s7 + $0x140] ss:$48 sps:$4 sm:$0xff]   ;;  %v11063_v0 = vld [vmem:[%s13694_s7 + $0x148] ss:$48 sps:$4 sm:$0xff]  }
 0x265   :  { %13860 = vst [vmem:[#allocation33_spill] sm:$0xff] %v11058_v9  ;;  %13861 = vst [vmem:[#allocation34_spill] sm:$0xff] %v11063_v0 }
 0x267   :  { %1923 = vmatpush1.bf16.msra.mxu0 %v11034_v3  ;;  %1964 = vmatpush1.bf16.msra.mxu1 %v11039_v2  ;;  %v11070_v3 = vld [vmem:[%s13694_s7 + $0x1a4] ss:$48 sps:$4 sm:$0xff]   ;;  %v11075_v2 = vld [vmem:[%s13694_s7 + $0x1ac] ss:$48 sps:$4 sm:$0xff]  }
 0x268   :  { %1924 = vmatprep.subr.bf16.mxu0 %v11046_v7  ;;  %1965 = vmatprep.subr.bf16.mxu1 %v11051_v5  ;;  %13862 = vst [vmem:[#allocation35_spill] sm:$0xff] %v11070_v3  ;;  %13863 = vst [vmem:[#allocation36_spill] sm:$0xff] %v11075_v2  ;;  %v11082_v7 = vld [vmem:[%s13694_s7 + $0x1a0] ss:$48 sps:$4 sm:$0xff]   ;;  %v11087_v5 = vld [vmem:[%s13694_s7 + $0x1a8] ss:$48 sps:$4 sm:$0xff]  }
 0x269   :  { %13864 = vst [vmem:[#allocation37_spill] sm:$0xff] %v11082_v7  ;;  %13865 = vst [vmem:[#allocation38_spill] sm:$0xff] %v11087_v5 }
 0x26b   :  { %1925 = vmatpush1.bf16.msra.mxu0 %v11058_v9  ;;  %1966 = vmatpush1.bf16.msra.mxu1 %v11063_v0  ;;  %v11094_v9 = vld [vmem:[%s13694_s7 + $0x204] ss:$48 sps:$4 sm:$0xff]   ;;  %v11099_v0 = vld [vmem:[%s13694_s7 + $0x20c] ss:$48 sps:$4 sm:$0xff]  }
 0x26c   :  { %1926 = vmatprep.subr.bf16.mxu0 %v11070_v3  ;;  %1967 = vmatprep.subr.bf16.mxu1 %v11075_v2  ;;  %13866 = vst [vmem:[#allocation39_spill] sm:$0xff] %v11094_v9  ;;  %13867 = vst [vmem:[#allocation40_spill] sm:$0xff] %v11099_v0  ;;  %v11107_v2 = vld [vmem:[%s13694_s7 + $0x200] ss:$48 sps:$4 sm:$0xff]   ;;  %v11112_v3 = vld [vmem:[%s13694_s7 + $0x208] ss:$48 sps:$4 sm:$0xff]  }
 0x26f   :  { %1927 = vmatpush1.bf16.msra.mxu0 %v11082_v7  ;;  %1968 = vmatpush1.bf16.msra.mxu1 %v11087_v5  ;;  %v11126_v5 = vld [vmem:[%s13694_s7 + $0x26c] ss:$48 sps:$4 sm:$0xff]   ;;  %v13868_v7 = vsub.s32 2, %v10967_v4 }
 0x270   :  { %1928 = vmatprep.subr.bf16.mxu0 %v11094_v9  ;;  %1969 = vmatprep.subr.bf16.mxu1 %v11099_v0  ;;  %v13869_v0 = vsub.s32 3, %v10967_v4  ;;  %v11174_v4 = vld [vmem:[%s13694_s7 + $0x2c8] ss:$48 sps:$4 sm:$0xff]  }
 0x271   :  { %v11130_v61 = vrot.slane %v389_v8, %v13868_v7  ;;  %v11150_v7 = vld [vmem:[%s13694_s7 + $0x268] ss:$48 sps:$4 sm:$0xff]  }
 0x272   :  { %v11138_v9 = vrot.slane %v389_v8, %v13869_v0  ;;  %v11157_v0 = vld [vmem:[%s13694_s7 + $0x2c4] ss:$48 sps:$4 sm:$0xff]   ;;  %v11162_v8 = vld [vmem:[%s13694_s7 + $0x2cc] ss:$48 sps:$4 sm:$0xff]  }
 0x273   :  { %1929 = vmatpush1.bf16.msra.mxu0 %v11107_v2  ;;  %1970 = vmatpush1.bf16.msra.mxu1 %v11112_v3 }
 0x274   :  { %1930 = vmatprep.subr.bf16.mxu0 %v11121_v6  ;;  %1971 = vmatprep.subr.bf16.mxu1 %v11126_v5 }
 0x277   :  { %1931 = vmatpush1.bf16.msra.mxu0 %v11145_v60  ;;  %1972 = vmatpush1.bf16.msra.mxu1 %v11150_v7 }
 0x278   :  { %1932 = vmatprep.subr.bf16.mxu0 %v11157_v0  ;;  %1973 = vmatprep.subr.bf16.mxu1 %v11162_v8 }
 0x27b   :  { %1933 = vmatpush1.bf16.msra.mxu0 %v11169_v62  ;;  %1974 = vmatpush1.bf16.msra.mxu1 %v11174_v4 }
 0x27c   :  { %2217 = vmatprep.subr.bf16.mxu0 %v10570_v11  ;;  %2258 = vmatprep.subr.bf16.mxu1 %v10575_v12  ;;  %v13870_v12 = vld [vmem:[#allocation2_spill] sm:$0xff] }
 0x27e   :  { %1951 = vmatmul.mubr.bf16.vlgmr.msra.gmra.mrb[24].mxu0 %v10250_v16  ;;  %1992 = vmatmul.mubr.bf16.vlgmr.msra.gmra.mrb[24].mxu1 %v10250_v16  ;;  %v58_v16 = vld [vmem:[%s13691_s0 + $0x8] sm:$0xff] }
 0x27f   :  { %2218 = vmatpush1.bf16.msra.mxu0 %v10580_v13  ;;  %2259 = vmatpush1.bf16.msra.mxu1 %v10585_v14  ;;  %v11217_v11 = vpack.c.bf16 %v58_v16, %v58_v16  ;;  %v13871_v13 = vld [vmem:[#allocation3_spill] sm:$0xff]  ;;  %v13872_v14 = vld [vmem:[#allocation4_spill] sm:$0xff] }
 0x280   :  { %2219 = vmatprep.subr.bf16.mxu0 %v10592_v15  ;;  %2260 = vmatprep.subr.bf16.mxu1 %v10597_v17  ;;  %v13873_v15 = vld [vmem:[#allocation5_spill] sm:$0xff]  ;;  %v13874_v17 = vld [vmem:[#allocation6_spill] sm:$0xff] }
 0x281   :  { %2249 = vmatprep.mubr.bf16.mxu0 %v13855_v1  ;;  %2290 = vmatprep.mubr.bf16.mxu1 %v13855_v1 }
 0x283   :  { %2220 = vmatpush1.bf16.msra.mxu0 %v10606_v18  ;;  %2261 = vmatpush1.bf16.msra.mxu1 %v10611_v19 }
 0x284   :  { %2221 = vmatprep.subr.bf16.mxu0 %v10618_v10  ;;  %2262 = vmatprep.subr.bf16.mxu1 %v10623_v20 }
 0x287   :  { %2222 = vmatpush1.bf16.msra.mxu0 %v10632_v21  ;;  %2263 = vmatpush1.bf16.msra.mxu1 %v10637_v22  ;;  %v13875_v21 = vld [vmem:[#allocation7_spill] sm:$0xff]  ;;  %v13876_v22 = vld [vmem:[#allocation8_spill] sm:$0xff] }
 0x288   :  { %2223 = vmatprep.subr.bf16.mxu0 %v10644_v23  ;;  %2264 = vmatprep.subr.bf16.mxu1 %v10649_v24 }
 0x28b   :  { %2224 = vmatpush1.bf16.msra.mxu0 %v10656_v25  ;;  %2265 = vmatpush1.bf16.msra.mxu1 %v10661_v26 }
 0x28c   :  { %2225 = vmatprep.subr.bf16.mxu0 %v10668_v27  ;;  %2266 = vmatprep.subr.bf16.mxu1 %v10673_v28  ;;  %v13877_v27 = vld [vmem:[#allocation9_spill] sm:$0xff]  ;;  %v13878_v28 = vld [vmem:[#allocation10_spill] sm:$0xff] }
 0x28f   :  { %2226 = vmatpush1.bf16.msra.mxu0 %v10680_v29  ;;  %2267 = vmatpush1.bf16.msra.mxu1 %v10685_v30  ;;  %v13879_v29 = vld [vmem:[#allocation11_spill] sm:$0xff]  ;;  %v13880_v30 = vld [vmem:[#allocation12_spill] sm:$0xff] }
 0x290   :  { %2227 = vmatprep.subr.bf16.mxu0 %v10692_v31  ;;  %2268 = vmatprep.subr.bf16.mxu1 %v10697_v32  ;;  %v13881_v31 = vld [vmem:[#allocation13_spill] sm:$0xff]  ;;  %v13882_v32 = vld [vmem:[#allocation14_spill] sm:$0xff] }
 0x293   :  { %2228 = vmatpush1.bf16.msra.mxu0 %v10704_v33  ;;  %2269 = vmatpush1.bf16.msra.mxu1 %v10709_v34  ;;  %v13883_v33 = vld [vmem:[#allocation15_spill] sm:$0xff]  ;;  %v13884_v34 = vld [vmem:[#allocation16_spill] sm:$0xff] }
 0x294   :  { %2229 = vmatprep.subr.bf16.mxu0 %v10716_v35  ;;  %2270 = vmatprep.subr.bf16.mxu1 %v10721_v36  ;;  %v13885_v35 = vld [vmem:[#allocation17_spill] sm:$0xff]  ;;  %v13886_v36 = vld [vmem:[#allocation18_spill] sm:$0xff] }
 0x297   :  { %2230 = vmatpush1.bf16.msra.mxu0 %v10728_v37  ;;  %2271 = vmatpush1.bf16.msra.mxu1 %v10733_v38  ;;  %v13887_v37 = vld [vmem:[#allocation20_spill] sm:$0xff]  ;;  %v13888_v38 = vld [vmem:[#allocation21_spill] sm:$0xff] }
 0x298   :  { %2231 = vmatprep.subr.bf16.mxu0 %v10740_v39  ;;  %2272 = vmatprep.subr.bf16.mxu1 %v10745_v40  ;;  %v13889_v39 = vld [vmem:[#allocation22_spill] sm:$0xff]  ;;  %v13890_v40 = vld [vmem:[#allocation23_spill] sm:$0xff] }
 0x29b   :  { %2232 = vmatpush1.bf16.msra.mxu0 %v10752_v41  ;;  %2273 = vmatpush1.bf16.msra.mxu1 %v10757_v42  ;;  %v13891_v41 = vld [vmem:[#allocation24_spill] sm:$0xff]  ;;  %v13892_v42 = vld [vmem:[#allocation25_spill] sm:$0xff] }
 0x29c   :  { %2299 = vmatprep.subr.bf16.mxu0 %v10764_v43  ;;  %2340 = vmatprep.subr.bf16.mxu1 %v10769_v44  ;;  %v13893_v43 = vld [vmem:[#allocation27_spill] sm:$0xff]  ;;  %v13894_v44 = vld [vmem:[#allocation28_spill] sm:$0xff] }
 0x29e   :  { %2250 = vmatmul.mubr.bf16.vlgmr.msra.gmra.mrb[28].mxu0 %v11217_v11  ;;  %2291 = vmatmul.mubr.bf16.vlgmr.msra.gmra.mrb[28].mxu1 %v11217_v11 }
 0x29f   :  { %2300 = vmatpush1.bf16.msra.mxu0 %v10776_v45  ;;  %2341 = vmatpush1.bf16.msra.mxu1 %v10781_v46  ;;  %v13895_v45 = vld [vmem:[#allocation29_spill] sm:$0xff]  ;;  %v13896_v46 = vld [vmem:[#allocation30_spill] sm:$0xff] }
 0x2a0   :  { %2301 = vmatprep.subr.bf16.mxu0 %v10788_v47  ;;  %2342 = vmatprep.subr.bf16.mxu1 %v10793_v48  ;;  %v13897_v47 = vld [vmem:[#allocation31_spill] sm:$0xff]  ;;  %v13898_v48 = vld [vmem:[#allocation32_spill] sm:$0xff] }
 0x2a1   :  { %2331 = vmatprep.mubr.bf16.mxu0 %v13855_v1  ;;  %2372 = vmatprep.mubr.bf16.mxu1 %v13855_v1 }
 0x2a3   :  { %2302 = vmatpush1.bf16.msra.mxu0 %v10802_v49  ;;  %2343 = vmatpush1.bf16.msra.mxu1 %v10807_v50  ;;  %v13899_v49 = vld [vmem:[#allocation33_spill] sm:$0xff]  ;;  %v13900_v50 = vld [vmem:[#allocation34_spill] sm:$0xff] }
 0x2a4   :  { %2303 = vmatprep.subr.bf16.mxu0 %v10814_v51  ;;  %2344 = vmatprep.subr.bf16.mxu1 %v10819_v52  ;;  %v13901_v51 = vld [vmem:[#allocation35_spill] sm:$0xff]  ;;  %v13902_v52 = vld [vmem:[#allocation36_spill] sm:$0xff] }
 0x2a7   :  { %2304 = vmatpush1.bf16.msra.mxu0 %v10828_v53  ;;  %2345 = vmatpush1.bf16.msra.mxu1 %v10833_v54  ;;  %v13903_v53 = vld [vmem:[#allocation37_spill] sm:$0xff]  ;;  %v13904_v54 = vld [vmem:[#allocation38_spill] sm:$0xff] }
 0x2a8   :  { %2305 = vmatprep.subr.bf16.mxu0 %v10840_v55  ;;  %2346 = vmatprep.subr.bf16.mxu1 %v10845_v56  ;;  %v13905_v55 = vld [vmem:[#allocation39_spill] sm:$0xff]  ;;  %v13906_v56 = vld [vmem:[#allocation40_spill] sm:$0xff] }
 0x2ab   :  { %2306 = vmatpush1.bf16.msra.mxu0 %v10852_v57  ;;  %2347 = vmatpush1.bf16.msra.mxu1 %v10857_v58 }
 0x2ac   :  { %2307 = vmatprep.subr.bf16.mxu0 %v10864_v59  ;;  %2348 = vmatprep.subr.bf16.mxu1 %v13870_v12 }
 0x2af   :  { %2308 = vmatpush1.bf16.msra.mxu0 %v13871_v13  ;;  %2349 = vmatpush1.bf16.msra.mxu1 %v13872_v14 }
 0x2b0   :  { %2309 = vmatprep.subr.bf16.mxu0 %v13873_v15  ;;  %2350 = vmatprep.subr.bf16.mxu1 %v13874_v17  ;;  %v9582_v17 = vld [vmem:[%s13697_s8 + $0x104] ss:$16 sps:$4 sm:$0xff]  }
 0x2b1   :  { %v11247_v18 = vpop.f32.mrb[4].mxu0  ;;  %v11249_v19 = vpop.f32.mrb[4].mxu1 }
 0x2b2   :  { %v11251_v10 = vpop.f32.mrb[5].mxu0  ;;  %v11253_v20 = vpop.f32.mrb[5].mxu1 }
 0x2b3   :  { %2310 = vmatpush1.bf16.msra.mxu0 %v13875_v21  ;;  %2351 = vmatpush1.bf16.msra.mxu1 %v13876_v22  ;;  %v970_v23 = vpop.f32.mrb[6].mxu0  ;;  %v1011_v24 = vpop.f32.mrb[6].mxu1  ;;  %v9594_v21 = vld [vmem:[%s13697_s8 + $0x164] ss:$16 sps:$4 sm:$0xff]  }
 0x2b4   :  { %v971_v25 = vpop.f32.mrb[7].mxu0  ;;  %v1012_v26 = vpop.f32.mrb[7].mxu1  ;;  %2311 = vmatprep.subr.bf16.mxu0 %v13877_v27  ;;  %2352 = vmatprep.subr.bf16.mxu1 %v13878_v28  ;;  %v9595_v22 = vld [vmem:[%s13697_s8 + $0x364] ss:$16 sps:$4 sm:$0xff]  }
 0x2b5   :  { %v9596_v23 = vld [vmem:[%s13697_s8 + $0x64] ss:$16 sps:$4 sm:$0xff]  }
 0x2b6   :  { %v9597_v24 = vld [vmem:[%s13697_s8 + $0x264] ss:$16 sps:$4 sm:$0xff]  }
 0x2b7   :  { %2312 = vmatpush1.bf16.msra.mxu0 %v13879_v29  ;;  %2353 = vmatpush1.bf16.msra.mxu1 %v13880_v30  ;;  %v9598_v25 = vld [vmem:[%s13697_s8 + $0x184] ss:$16 sps:$4 sm:$0xff]  }
 0x2b8   :  { %2313 = vmatprep.subr.bf16.mxu0 %v13881_v31  ;;  %2354 = vmatprep.subr.bf16.mxu1 %v13882_v32  ;;  %v9599_v26 = vld [vmem:[%s13697_s8 + $0x384] ss:$16 sps:$4 sm:$0xff]  }
 0x2b9   :  { %v9600_v27 = vld [vmem:[%s13697_s8 + $0x84] ss:$16 sps:$4 sm:$0xff]  }
 0x2ba   :  { %v9601_v28 = vld [vmem:[%s13697_s8 + $0x284] ss:$16 sps:$4 sm:$0xff]  }
 0x2bb   :  { %2314 = vmatpush1.bf16.msra.mxu0 %v13883_v33  ;;  %2355 = vmatpush1.bf16.msra.mxu1 %v13884_v34  ;;  %v9602_v29 = vld [vmem:[%s13697_s8 + $0x1a4] ss:$16 sps:$4 sm:$0xff]  }
 0x2bc   :  { %2381 = vmatprep.subr.bf16.mxu0 %v13885_v35  ;;  %2422 = vmatprep.subr.bf16.mxu1 %v13886_v36  ;;  %v9603_v30 = vld [vmem:[%s13697_s8 + $0x3a4] ss:$16 sps:$4 sm:$0xff]  }
 0x2bd   :  { %v9604_v31 = vld [vmem:[%s13697_s8 + $0xa4] ss:$16 sps:$4 sm:$0xff]  }
 0x2be   :  { %2332 = vmatmul.mubr.bf16.vlgmr.msra.gmra.mrb[32].mxu0 %v11217_v11  ;;  %2373 = vmatmul.mubr.bf16.vlgmr.msra.gmra.mrb[32].mxu1 %v11217_v11  ;;  %v9605_v32 = vld [vmem:[%s13697_s8 + $0x2a4] ss:$16 sps:$4 sm:$0xff]  }
 0x2bf   :  { %2382 = vmatpush1.bf16.msra.mxu0 %v13887_v37  ;;  %2423 = vmatpush1.bf16.msra.mxu1 %v13888_v38  ;;  %v9606_v33 = vld [vmem:[%s13697_s8 + $0x1c4] ss:$16 sps:$4 sm:$0xff]  }
 0x2c0   :  { %2383 = vmatprep.subr.bf16.mxu0 %v13889_v39  ;;  %2424 = vmatprep.subr.bf16.mxu1 %v13890_v40  ;;  %v9607_v34 = vld [vmem:[%s13697_s8 + $0x3c4] ss:$16 sps:$4 sm:$0xff]  }
 0x2c1   :  { %2413 = vmatprep.mubr.bf16.mxu0 %v13855_v1  ;;  %2454 = vmatprep.mubr.bf16.mxu1 %v13855_v1  ;;  %v9608_v37 = vld [vmem:[%s13697_s8 + $0xc4] ss:$16 sps:$4 sm:$0xff]  }
 0x2c2   :  { %v9609_v38 = vld [vmem:[%s13697_s8 + $0x2c4] ss:$16 sps:$4 sm:$0xff]  }
 0x2c3   :  { %2384 = vmatpush1.bf16.msra.mxu0 %v13891_v41  ;;  %2425 = vmatpush1.bf16.msra.mxu1 %v13892_v42  ;;  %v13907_v39 = vld [vmem:[#allocation26_spill] sm:$0xff] }
 0x2c4   :  { %2385 = vmatprep.subr.bf16.mxu0 %v13893_v43  ;;  %2426 = vmatprep.subr.bf16.mxu1 %v13894_v44  ;;  %v9610_v44 = vld [vmem:[%s13697_s8 + $0x1e4] ss:$16 sps:$4 sm:$0xff]  }
 0x2c7   :  { %2386 = vmatpush1.bf16.msra.mxu0 %v13895_v45  ;;  %2427 = vmatpush1.bf16.msra.mxu1 %v13896_v46 }
 0x2c8   :  { %2387 = vmatprep.subr.bf16.mxu0 %v13897_v47  ;;  %2428 = vmatprep.subr.bf16.mxu1 %v13898_v48 }
 0x2cb   :  { %2388 = vmatpush1.bf16.msra.mxu0 %v13899_v49  ;;  %2429 = vmatpush1.bf16.msra.mxu1 %v13900_v50 }
 0x2cc   :  { %2389 = vmatprep.subr.bf16.mxu0 %v13901_v51  ;;  %2430 = vmatprep.subr.bf16.mxu1 %v13902_v52  ;;  %v9614_v51 = vld [vmem:[%s13697_s8 + $0x504] ss:$16 sps:$4 sm:$0xff]  }
 0x2cd   :  { %v9615_v52 = vld [vmem:[%s13697_s8 + $0x704] ss:$16 sps:$4 sm:$0xff]  }
 0x2cf   :  { %2390 = vmatpush1.bf16.msra.mxu0 %v13903_v53  ;;  %2431 = vmatpush1.bf16.msra.mxu1 %v13904_v54 }
 0x2d0   :  { %2391 = vmatprep.subr.bf16.mxu0 %v13905_v55  ;;  %2432 = vmatprep.subr.bf16.mxu1 %v13906_v56 }
 0x2d1   :  { %v11291_v57 = vpop.f32.mrb[8].mxu0  ;;  %v11293_v58 = vpop.f32.mrb[8].mxu1 }
 0x2d2   :  { %v11295_v59 = vpop.f32.mrb[9].mxu0  ;;  %v11297_v16 = vpop.f32.mrb[9].mxu1 }
 0x2d3   :  { %v1052_v12 = vpop.f32.mrb[10].mxu0  ;;  %v1093_v13 = vpop.f32.mrb[10].mxu1  ;;  %2392 = vmatpush1.bf16.msra.mxu0 %v11107_v2  ;;  %2433 = vmatpush1.bf16.msra.mxu1 %v11112_v3  ;;  %v9583_v2 = vld [vmem:[%s13697_s8 + $0x304] ss:$16 sps:$4 sm:$0xff]  }
 0x2d4   :  { %v1053_v14 = vpop.f32.mrb[11].mxu0  ;;  %v1094_v15 = vpop.f32.mrb[11].mxu1  ;;  %2393 = vmatprep.subr.bf16.mxu0 %v11121_v6  ;;  %2434 = vmatprep.subr.bf16.mxu1 %v11126_v5  ;;  %v9584_v5 = vld [vmem:[%s13697_s8 + $0x4] ss:$16 sps:$4 sm:$0xff]  }
 0x2d5   :  { %v9586_v6 = vld [vmem:[%s13697_s8 + $0x124] ss:$16 sps:$4 sm:$0xff]  }
 0x2d6   :  { %v9587_v3 = vld [vmem:[%s13697_s8 + $0x324] ss:$16 sps:$4 sm:$0xff]  }
 0x2d7   :  { %2394 = vmatpush1.bf16.msra.mxu0 %v11145_v60  ;;  %2435 = vmatpush1.bf16.msra.mxu1 %v11150_v7  ;;  %v9585_v60 = vld [vmem:[%s13697_s8 + $0x204] ss:$16 sps:$4 sm:$0xff]  }
 0x2d8   :  { %2395 = vmatprep.subr.bf16.mxu0 %v11157_v0  ;;  %2436 = vmatprep.subr.bf16.mxu1 %v11162_v8  ;;  %v9588_v7 = vld [vmem:[%s13697_s8 + $0x24] ss:$16 sps:$4 sm:$0xff]  }
 0x2d9   :  { %v9591_v0 = vld [vmem:[%s13697_s8 + $0x344] ss:$16 sps:$4 sm:$0xff]  }
 0x2da   :  { %v9592_v8 = vld [vmem:[%s13697_s8 + $0x44] ss:$16 sps:$4 sm:$0xff]  }
 0x2db   :  { %2396 = vmatpush1.bf16.msra.mxu0 %v11169_v62  ;;  %2437 = vmatpush1.bf16.msra.mxu1 %v11174_v4  ;;  %v9589_v4 = vld [vmem:[%s13697_s8 + $0x224] ss:$16 sps:$4 sm:$0xff]  }
 0x2dc   :  { %8591 = vmatprep.subr.bf16.mxu0 %v9582_v17  ;;  %8613 = vmatprep.subr.bf16.mxu1 %v9583_v2  ;;  %v9590_v62 = vld [vmem:[%s13697_s8 + $0x144] ss:$16 sps:$4 sm:$0xff]  }
 0x2de   :  { %2414 = vmatmul.mubr.bf16.vlgmr.msra.gmra.mrb[36].mxu0 %v11217_v11  ;;  %2455 = vmatmul.mubr.bf16.vlgmr.msra.gmra.mrb[36].mxu1 %v11217_v11  ;;  %v9593_v11 = vld [vmem:[%s13697_s8 + $0x244] ss:$16 sps:$4 sm:$0xff]  }
 0x2df   :  { %8592 = vmatpush3.bf16.msra.mxu0 %v9584_v5  ;;  %8614 = vmatpush3.bf16.msra.mxu1 %v9585_v60 }
 0x2e0   :  { %8593 = vmatprep.subr.bf16.mxu0 %v9586_v6  ;;  %8615 = vmatprep.subr.bf16.mxu1 %v9587_v3 }
 0x2e3   :  { %8594 = vmatpush3.bf16.msra.mxu0 %v9588_v7  ;;  %8616 = vmatpush3.bf16.msra.mxu1 %v9589_v4 }
 0x2e4   :  { %8595 = vmatprep.subr.bf16.mxu0 %v9590_v62  ;;  %8617 = vmatprep.subr.bf16.mxu1 %v9591_v0 }
 0x2e7   :  { %8596 = vmatpush3.bf16.msra.mxu0 %v9592_v8  ;;  %8618 = vmatpush3.bf16.msra.mxu1 %v9593_v11 }
 0x2e8   :  { %8597 = vmatprep.subr.bf16.mxu0 %v9594_v21  ;;  %8619 = vmatprep.subr.bf16.mxu1 %v9595_v22 }
 0x2eb   :  { %8598 = vmatpush3.bf16.msra.mxu0 %v9596_v23  ;;  %8620 = vmatpush3.bf16.msra.mxu1 %v9597_v24 }
 0x2ec   :  { %8599 = vmatprep.subr.bf16.mxu0 %v9598_v25  ;;  %8621 = vmatprep.subr.bf16.mxu1 %v9599_v26  ;;  %v11452_v25 = vld [vmem:[%s13696_s6] sm:$0xff]  ;;  %v13908_v26 = vld [vmem:[#allocation19_spill] sm:$0xff] }
 0x2ef   :  { %8600 = vmatpush3.bf16.msra.mxu0 %v9600_v27  ;;  %8622 = vmatpush3.bf16.msra.mxu1 %v9601_v28  ;;  %v13909_v27 = vsub.s32 0, %v13908_v26 }
 0x2f0   :  { %8601 = vmatprep.subr.bf16.mxu0 %v9602_v29  ;;  %8623 = vmatprep.subr.bf16.mxu1 %v9603_v30  ;;  %v13910_v29 = vsub.s32 2, %v13908_v26 }
 0x2f1   :  { %v1130_v35 = vpop.f32.mrb[12].mxu0  ;;  %v1171_v36 = vpop.f32.mrb[12].mxu1  ;;  %v395_v28 = vrot.slane %v11452_v25, %v13909_v27  ;;  %v9625_v27 = vld [vmem:[%s13697_s8 + $0x644] ss:$16 sps:$4 sm:$0xff]  }
 0x2f2   :  { %v11396_v40 = vadd.f32 %v1130_v35, %v13907_v39  ;;  %v11399_v41 = vadd.f32 %v1171_v36, %v11130_v61  ;;  %v1132_v42 = vpop.f32.mrb[13].mxu0  ;;  %v1173_v43 = vpop.f32.mrb[13].mxu1  ;;  %v9611_v61 = vld [vmem:[%s13697_s8 + $0x3e4] ss:$16 sps:$4 sm:$0xff]   ;;  %v403_v30 = vrot.slane %v11452_v25, %v13910_v29  ;;  %v410_v39 = vsub.s32 4, %v13908_v26 }
 0x2f3   :  { %v11405_v45 = vadd.f32 %v1132_v42, %v11134_v63  ;;  %v11408_v46 = vadd.f32 %v1173_v43, %v11138_v9  ;;  %v1134_v47 = vpop.f32.mrb[14].mxu0  ;;  %v1175_v48 = vpop.f32.mrb[14].mxu1  ;;  %8602 = vmatpush3.bf16.msra.mxu0 %v9604_v31  ;;  %8624 = vmatpush3.bf16.msra.mxu1 %v9605_v32  ;;  %v9612_v63 = vld [vmem:[%s13697_s8 + $0xe4] ss:$16 sps:$4 sm:$0xff]   ;;  %v13911_v31 = vsub.s32 1, %v13908_v26  ;;  %v11467_v35 = vadd.f32 %v11247_v18, %v395_v28 }
 0x2f4   :  { %v1135_v49 = vpop.f32.mrb[15].mxu0  ;;  %v1176_v50 = vpop.f32.mrb[15].mxu1  ;;  %8603 = vmatprep.subr.bf16.mxu0 %v9606_v33  ;;  %8625 = vmatprep.subr.bf16.mxu1 %v9607_v34  ;;  %v9613_v9 = vld [vmem:[%s13697_s8 + $0x2e4] ss:$16 sps:$4 sm:$0xff]   ;;  %v13912_v33 = vsub.s32 3, %v13908_v26  ;;  %v11470_v36 = vadd.f32 %v11249_v19, %v403_v30  ;;  %v418_v42 = vsub.s32 6, %v13908_v26 }
 0x2f5   :  { %v399_v32 = vrot.slane %v11452_v25, %v13911_v31  ;;  %v414_v47 = vsub.s32 5, %v13908_v26  ;;  %v422_v18 = vsub.s32 7, %v13908_v26  ;;  %v9626_v28 = vld [vmem:[%s13697_s8 + $0x564] ss:$16 sps:$4 sm:$0xff]  }
 0x2f6   :  { %v407_v34 = vrot.slane %v11452_v25, %v13912_v33  ;;  %v9627_v29 = vld [vmem:[%s13697_s8 + $0x764] ss:$16 sps:$4 sm:$0xff]  }
 0x2f7   :  { %8604 = vmatpush3.bf16.msra.mxu0 %v9608_v37  ;;  %8626 = vmatpush3.bf16.msra.mxu1 %v9609_v38  ;;  %v11473_v37 = vadd.f32 %v11251_v10, %v399_v32  ;;  %v9628_v30 = vld [vmem:[%s13697_s8 + $0x464] ss:$16 sps:$4 sm:$0xff]  }
 0x2f8   :  { %8605 = vmatprep.subr.bf16.mxu0 %v9610_v44  ;;  %8627 = vmatprep.subr.bf16.mxu1 %v9611_v61  ;;  %v11476_v38 = vadd.f32 %v11253_v20, %v407_v34  ;;  %v9629_v31 = vld [vmem:[%s13697_s8 + $0x664] ss:$16 sps:$4 sm:$0xff]  }
 0x2f9   :  { %v9630_v32 = vld [vmem:[%s13697_s8 + $0x584] ss:$16 sps:$4 sm:$0xff]  }
 0x2fa   :  { %v9631_v33 = vld [vmem:[%s13697_s8 + $0x784] ss:$16 sps:$4 sm:$0xff]  }
 0x2fb   :  { %8606 = vmatpush3.bf16.msra.mxu0 %v9612_v63  ;;  %8628 = vmatpush3.bf16.msra.mxu1 %v9613_v9  ;;  %v9616_v9 = vld [vmem:[%s13697_s8 + $0x404] ss:$16 sps:$4 sm:$0xff]  }
 0x2fc   :  { %8635 = vmatprep.subr.bf16.mxu0 %v9614_v51  ;;  %8657 = vmatprep.subr.bf16.mxu1 %v9615_v52  ;;  %v9632_v34 = vld [vmem:[%s13697_s8 + $0x484] ss:$16 sps:$4 sm:$0xff]  }
 0x311   :  { %v11425_v53 = vpop.f32.mrb[16].mxu0  ;;  %v11427_v54 = vpop.f32.mrb[16].mxu1 }
 0x312   :  { %v11429_v55 = vpop.f32.mrb[17].mxu0  ;;  %v11431_v56 = vpop.f32.mrb[17].mxu1 }
 0x313   :  { %v1792_v12 = vpop.f32.mrb[18].mxu0  ;;  %v1833_v13 = vpop.f32.mrb[18].mxu1 }
 0x314   :  { %v1793_v14 = vpop.f32.mrb[19].mxu0  ;;  %v1834_v15 = vpop.f32.mrb[19].mxu1  ;;  %v9617_v12 = vld [vmem:[%s13697_s8 + $0x604] ss:$16 sps:$4 sm:$0xff]  }
 0x315   :  { %v9618_v15 = vld [vmem:[%s13697_s8 + $0x524] ss:$16 sps:$4 sm:$0xff]  }
 0x331   :  { %v11433_v17 = vpop.f32.mrb[20].mxu0  ;;  %v11435_v2 = vpop.f32.mrb[20].mxu1 }
 0x332   :  { %v11437_v5 = vpop.f32.mrb[21].mxu0  ;;  %v11439_v60 = vpop.f32.mrb[21].mxu1 }
 0x333   :  { %v1874_v6 = vpop.f32.mrb[22].mxu0  ;;  %v1915_v3 = vpop.f32.mrb[22].mxu1 }
 0x334   :  { %v1875_v7 = vpop.f32.mrb[23].mxu0  ;;  %v1916_v4 = vpop.f32.mrb[23].mxu1 }
 0x335   :  { %v9619_v7 = vld [vmem:[%s13697_s8 + $0x724] ss:$16 sps:$4 sm:$0xff]  }
 0x336   :  { %v9620_v4 = vld [vmem:[%s13697_s8 + $0x424] ss:$16 sps:$4 sm:$0xff]  }
 0x351   :  { %v11441_v62 = vpop.f32.mrb[24].mxu0  ;;  %v11443_v0 = vpop.f32.mrb[24].mxu1 }
 0x352   :  { %v11445_v8 = vpop.f32.mrb[25].mxu0  ;;  %v11447_v11 = vpop.f32.mrb[25].mxu1 }
 0x353   :  { %v1956_v21 = vpop.f32.mrb[26].mxu0  ;;  %v1997_v22 = vpop.f32.mrb[26].mxu1 }
 0x354   :  { %v1957_v23 = vpop.f32.mrb[27].mxu0  ;;  %v1998_v24 = vpop.f32.mrb[27].mxu1  ;;  %v9621_v21 = vld [vmem:[%s13697_s8 + $0x624] ss:$16 sps:$4 sm:$0xff]  }
 0x355   :  { %v9622_v22 = vld [vmem:[%s13697_s8 + $0x544] ss:$16 sps:$4 sm:$0xff]  }
 0x356   :  { %v9623_v23 = vld [vmem:[%s13697_s8 + $0x744] ss:$16 sps:$4 sm:$0xff]  }
 0x357   :  { %v9624_v24 = vld [vmem:[%s13697_s8 + $0x444] ss:$16 sps:$4 sm:$0xff]  }
 0x371   :  { %v2251_v43 = vpop.f32.mrb[28].mxu0  ;;  %v2292_v44 = vpop.f32.mrb[28].mxu1 }
 0x372   :  { %v2463_v48 = vmul.f32 %v2251_v43, %v11467_v35  ;;  %v2465_v19 = vmul.f32 %v2292_v44, %v11470_v36  ;;  %v2253_v61 = vpop.f32.mrb[29].mxu0  ;;  %v2294_v10 = vpop.f32.mrb[29].mxu1  ;;  %v9633_v43 = vld [vmem:[%s13697_s8 + $0x684] ss:$16 sps:$4 sm:$0xff]  }
 0x373   :  { %v2464_v49 = vmul.f32 %v2253_v61, %v11473_v37  ;;  %v2466_v20 = vmul.f32 %v2294_v10, %v11476_v38  ;;  %v2255_v50 = vpop.f32.mrb[30].mxu0  ;;  %v2296_v63 = vpop.f32.mrb[30].mxu1  ;;  %v9634_v44 = vld [vmem:[%s13697_s8 + $0x5a4] ss:$16 sps:$4 sm:$0xff]  }
 0x374   :  { %v2256_v51 = vpop.f32.mrb[31].mxu0  ;;  %v2297_v52 = vpop.f32.mrb[31].mxu1  ;;  %v2475_v6 = vpack.c.bf16 %v2463_v48, %v2463_v48  ;;  %v2477_v3 = vpack.c.bf16 %v2465_v19, %v2465_v19  ;;  %v9635_v48 = vld [vmem:[%s13697_s8 + $0x7a4] ss:$16 sps:$4 sm:$0xff]   ;;  %v411_v50 = vrot.slane %v11452_v25, %v410_v39  ;;  %v419_v63 = vrot.slane %v11452_v25, %v418_v42 }
 0x375   :  { %v2476_v13 = vpack.c.bf16 %v2464_v49, %v2464_v49  ;;  %v2478_v14 = vpack.c.bf16 %v2466_v20, %v2466_v20  ;;  %v9636_v19 = vld [vmem:[%s13697_s8 + $0x4a4] ss:$16 sps:$4 sm:$0xff]   ;;  %v415_v51 = vrot.slane %v11452_v25, %v414_v47  ;;  %v423_v52 = vrot.slane %v11452_v25, %v422_v18 }
 0x376   :  { %v9637_v61 = vld [vmem:[%s13697_s8 + $0x6a4] ss:$16 sps:$4 sm:$0xff]   ;;  %v11589_v26 = vadd.f32 %v11291_v57, %v411_v50  ;;  %v11592_v18 = vadd.f32 %v11293_v58, %v419_v63 }
 0x377   :  { %3287 = vmatprep.mubr.bf16.mxu0 %v2476_v13  ;;  %3327 = vmatprep.mubr.bf16.mxu1 %v2478_v14  ;;  %v9638_v10 = vld [vmem:[%s13697_s8 + $0x5c4] ss:$16 sps:$4 sm:$0xff]   ;;  %v11598_v13 = vadd.f32 %v11295_v59, %v415_v51  ;;  %v11601_v14 = vadd.f32 %v11297_v16, %v423_v52 }
 0x378   :  { %3288 = vmatmul.mubr.bf16.vlgmr.msra.gmra.mrb[40].mxu0 %v2475_v6  ;;  %3328 = vmatmul.mubr.bf16.vlgmr.msra.gmra.mrb[40].mxu1 %v2477_v3  ;;  %v9639_v49 = vld [vmem:[%s13697_s8 + $0x7c4] ss:$16 sps:$4 sm:$0xff]  }
 0x379   :  { %8636 = vmatpush3.bf16.msra.mxu0 %v9616_v9  ;;  %8658 = vmatpush3.bf16.msra.mxu1 %v9617_v12  ;;  %v9640_v20 = vld [vmem:[%s13697_s8 + $0x4c4] ss:$16 sps:$4 sm:$0xff]  }
 0x37a   :  { %8637 = vmatprep.subr.bf16.mxu0 %v9618_v15  ;;  %8659 = vmatprep.subr.bf16.mxu1 %v9619_v7  ;;  %v9641_v9 = vld [vmem:[%s13697_s8 + $0x6c4] ss:$16 sps:$4 sm:$0xff]  }
 0x37b   :  { %v9642_v39 = vld [vmem:[%s13697_s8 + $0x5e4] ss:$16 sps:$4 sm:$0xff]  }
 0x37c   :  { %v9643_v42 = vld [vmem:[%s13697_s8 + $0x7e4] ss:$16 sps:$4 sm:$0xff]  }
 0x37d   :  { %8638 = vmatpush3.bf16.msra.mxu0 %v9620_v4  ;;  %8660 = vmatpush3.bf16.msra.mxu1 %v9621_v21  ;;  %v9644_v47 = vld [vmem:[%s13697_s8 + $0x4e4] ss:$16 sps:$4 sm:$0xff]  }
 0x37e   :  { %8639 = vmatprep.subr.bf16.mxu0 %v9622_v22  ;;  %8661 = vmatprep.subr.bf16.mxu1 %v9623_v23  ;;  %v9645_v25 = vld [vmem:[%s13697_s8 + $0x6e4] ss:$16 sps:$4 sm:$0xff]  }
 0x37f   :  { %v9646_v12 = vld [vmem:[%s13697_s8 + $0x904] ss:$16 sps:$4 sm:$0xff]  }
 0x380   :  { %v9647_v57 = vld [vmem:[%s13697_s8 + $0xb04] ss:$16 sps:$4 sm:$0xff]  }
 0x381   :  { %8640 = vmatpush3.bf16.msra.mxu0 %v9624_v24  ;;  %8662 = vmatpush3.bf16.msra.mxu1 %v9625_v27  ;;  %v9648_v23 = vld [vmem:[%s13697_s8 + $0x804] ss:$16 sps:$4 sm:$0xff]  }
 0x382   :  { %8641 = vmatprep.subr.bf16.mxu0 %v9626_v28  ;;  %8663 = vmatprep.subr.bf16.mxu1 %v9627_v29  ;;  %v9649_v28 = vld [vmem:[%s13697_s8 + $0xa04] ss:$16 sps:$4 sm:$0xff]  }
 0x383   :  { %v9660_v50 = vld [vmem:[%s13697_s8 + $0x864] ss:$16 sps:$4 sm:$0xff]  }
 0x384   :  { %v9661_v63 = vld [vmem:[%s13697_s8 + $0xa64] ss:$16 sps:$4 sm:$0xff]  }
 0x385   :  { %8642 = vmatpush3.bf16.msra.mxu0 %v9628_v30  ;;  %8664 = vmatpush3.bf16.msra.mxu1 %v9629_v31  ;;  %v9650_v31 = vld [vmem:[%s13697_s8 + $0x924] ss:$16 sps:$4 sm:$0xff]  }
 0x386   :  { %8643 = vmatprep.subr.bf16.mxu0 %v9630_v32  ;;  %8665 = vmatprep.subr.bf16.mxu1 %v9631_v33  ;;  %v9663_v51 = vld [vmem:[%s13697_s8 + $0xb84] ss:$16 sps:$4 sm:$0xff]  }
 0x387   :  { %v9664_v52 = vld [vmem:[%s13697_s8 + $0x884] ss:$16 sps:$4 sm:$0xff]  }
 0x389   :  { %8644 = vmatpush3.bf16.msra.mxu0 %v9632_v34  ;;  %8666 = vmatpush3.bf16.msra.mxu1 %v9633_v43  ;;  %v9651_v34 = vld [vmem:[%s13697_s8 + $0xb24] ss:$16 sps:$4 sm:$0xff]  }
 0x38a   :  { %8645 = vmatprep.subr.bf16.mxu0 %v9634_v44  ;;  %8667 = vmatprep.subr.bf16.mxu1 %v9635_v48  ;;  %v9652_v43 = vld [vmem:[%s13697_s8 + $0x824] ss:$16 sps:$4 sm:$0xff]  }
 0x38b   :  { %v9653_v44 = vld [vmem:[%s13697_s8 + $0xa24] ss:$16 sps:$4 sm:$0xff]  }
 0x38c   :  { %v9654_v48 = vld [vmem:[%s13697_s8 + $0x944] ss:$16 sps:$4 sm:$0xff]  }
 0x38d   :  { %8646 = vmatpush3.bf16.msra.mxu0 %v9636_v19  ;;  %8668 = vmatpush3.bf16.msra.mxu1 %v9637_v61  ;;  %v9655_v19 = vld [vmem:[%s13697_s8 + $0xb44] ss:$16 sps:$4 sm:$0xff]  }
 0x38e   :  { %8647 = vmatprep.subr.bf16.mxu0 %v9638_v10  ;;  %8669 = vmatprep.subr.bf16.mxu1 %v9639_v49  ;;  %v9656_v61 = vld [vmem:[%s13697_s8 + $0x844] ss:$16 sps:$4 sm:$0xff]  }
 0x38f   :  { %v9657_v10 = vld [vmem:[%s13697_s8 + $0xa44] ss:$16 sps:$4 sm:$0xff]  }
 0x390   :  { %v9658_v49 = vld [vmem:[%s13697_s8 + $0x964] ss:$16 sps:$4 sm:$0xff]  }
 0x391   :  { %8648 = vmatpush3.bf16.msra.mxu0 %v9640_v20  ;;  %8670 = vmatpush3.bf16.msra.mxu1 %v9641_v9  ;;  %v2333_v15 = vpop.f32.mrb[32].mxu0  ;;  %v2374_v6 = vpop.f32.mrb[32].mxu1  ;;  %v9659_v20 = vld [vmem:[%s13697_s8 + $0xb64] ss:$16 sps:$4 sm:$0xff]  }
 0x392   :  { %v2467_v58 = vmul.f32 %v2333_v15, %v11589_v26  ;;  %v2469_v3 = vmul.f32 %v2374_v6, %v11592_v18  ;;  %v2335_v7 = vpop.f32.mrb[33].mxu0  ;;  %v2376_v4 = vpop.f32.mrb[33].mxu1  ;;  %8649 = vmatprep.subr.bf16.mxu0 %v9642_v39  ;;  %8671 = vmatprep.subr.bf16.mxu1 %v9643_v42  ;;  %v9662_v9 = vld [vmem:[%s13697_s8 + $0x984] ss:$16 sps:$4 sm:$0xff]  }
 0x393   :  { %v2468_v59 = vmul.f32 %v2335_v7, %v11598_v13  ;;  %v2470_v16 = vmul.f32 %v2376_v4, %v11601_v14  ;;  %v2337_v21 = vpop.f32.mrb[34].mxu0  ;;  %v2378_v22 = vpop.f32.mrb[34].mxu1  ;;  %v9665_v39 = vld [vmem:[%s13697_s8 + $0xa84] ss:$16 sps:$4 sm:$0xff]  }
 0x394   :  { %v2338_v24 = vpop.f32.mrb[35].mxu0  ;;  %v2379_v27 = vpop.f32.mrb[35].mxu1  ;;  %v2479_v32 = vpack.c.bf16 %v2467_v58, %v2467_v58  ;;  %v2481_v33 = vpack.c.bf16 %v2469_v3, %v2469_v3  ;;  %v9666_v42 = vld [vmem:[%s13697_s8 + $0x9a4] ss:$16 sps:$4 sm:$0xff]   ;;  %v9679_v21 = vld [vmem:[%s13697_s8 + $0x300] ss:$16 sps:$4 sm:$0xff]  }
 0x395   :  { %v2480_v29 = vpack.c.bf16 %v2468_v59, %v2468_v59  ;;  %v2482_v30 = vpack.c.bf16 %v2470_v16, %v2470_v16  ;;  %8650 = vmatpush3.bf16.msra.mxu0 %v9644_v47  ;;  %8672 = vmatpush3.bf16.msra.mxu1 %v9645_v25  ;;  %v9667_v47 = vld [vmem:[%s13697_s8 + $0xba4] ss:$16 sps:$4 sm:$0xff]   ;;  %v9678_v16 = vld [vmem:[%s13697_s8 + $0x100] ss:$16 sps:$4 sm:$0xff]  }
 0x396   :  { %8679 = vmatprep.subr.bf16.mxu0 %v9646_v12  ;;  %8701 = vmatprep.subr.bf16.mxu1 %v9647_v57  ;;  %v9668_v25 = vld [vmem:[%s13697_s8 + $0x8a4] ss:$16 sps:$4 sm:$0xff]  }
 0x397   :  { %3367 = vmatprep.mubr.bf16.mxu0 %v2480_v29  ;;  %3407 = vmatprep.mubr.bf16.mxu1 %v2482_v30  ;;  %v9669_v12 = vld [vmem:[%s13697_s8 + $0xaa4] ss:$16 sps:$4 sm:$0xff]  }
 0x398   :  { %3368 = vmatmul.mubr.bf16.vlgmr.msra.gmra.mrb[44].mxu0 %v2479_v32  ;;  %3408 = vmatmul.mubr.bf16.vlgmr.msra.gmra.mrb[44].mxu1 %v2481_v33  ;;  %v9670_v15 = vld [vmem:[%s13697_s8 + $0x9c4] ss:$16 sps:$4 sm:$0xff]  }
 0x399   :  { %8680 = vmatpush3.bf16.msra.mxu0 %v9648_v23  ;;  %8702 = vmatpush3.bf16.msra.mxu1 %v9649_v28  ;;  %v9671_v6 = vld [vmem:[%s13697_s8 + $0xbc4] ss:$16 sps:$4 sm:$0xff]  }
 0x39a   :  { %8681 = vmatprep.subr.bf16.mxu0 %v9650_v31  ;;  %8703 = vmatprep.subr.bf16.mxu1 %v9651_v34  ;;  %v9672_v57 = vld [vmem:[%s13697_s8 + $0x8c4] ss:$16 sps:$4 sm:$0xff]   ;;  %v9680_v34 = vld [vmem:[%s13697_s8] ss:$16 sps:$4 sm:$0xff]  }
 0x39b   :  { %v9673_v58 = vld [vmem:[%s13697_s8 + $0xac4] ss:$16 sps:$4 sm:$0xff]  }
 0x39c   :  { %v9674_v3 = vld [vmem:[%s13697_s8 + $0x9e4] ss:$16 sps:$4 sm:$0xff]  }
 0x39d   :  { %8682 = vmatpush3.bf16.msra.mxu0 %v9652_v43  ;;  %8704 = vmatpush3.bf16.msra.mxu1 %v9653_v44  ;;  %v9675_v7 = vld [vmem:[%s13697_s8 + $0xbe4] ss:$16 sps:$4 sm:$0xff]   ;;  %v9681_v43 = vld [vmem:[%s13697_s8 + $0x200] ss:$16 sps:$4 sm:$0xff]   ;;  %v2001_v44 = vmul.f32 %v11429_v55, %v11473_v37 }
 0x39e   :  { %8683 = vmatprep.subr.bf16.mxu0 %v9654_v48  ;;  %8705 = vmatprep.subr.bf16.mxu1 %v9655_v19  ;;  %v9676_v4 = vld [vmem:[%s13697_s8 + $0x8e4] ss:$16 sps:$4 sm:$0xff]   ;;  %v2003_v48 = vmul.f32 %v11431_v56, %v11476_v38  ;;  %v9683_v55 = vld [vmem:[%s13697_s8 + $0x320] ss:$16 sps:$4 sm:$0xff]  }
 0x39f   :  { %v9677_v59 = vld [vmem:[%s13697_s8 + $0xae4] ss:$16 sps:$4 sm:$0xff]   ;;  %v9684_v56 = vld [vmem:[%s13697_s8 + $0x20] ss:$16 sps:$4 sm:$0xff]  }
 0x3a1   :  { %8684 = vmatpush3.bf16.msra.mxu0 %v9656_v61  ;;  %8706 = vmatpush3.bf16.msra.mxu1 %v9657_v10 }
 0x3a2   :  { %8685 = vmatprep.subr.bf16.mxu0 %v9658_v49  ;;  %8707 = vmatprep.subr.bf16.mxu1 %v9659_v20  ;;  %v9682_v20 = vld [vmem:[%s13697_s8 + $0x120] ss:$16 sps:$4 sm:$0xff]  }
 0x3a5   :  { %8686 = vmatpush3.bf16.msra.mxu0 %v9660_v50  ;;  %8708 = vmatpush3.bf16.msra.mxu1 %v9661_v63 }
 0x3a6   :  { %8687 = vmatprep.subr.bf16.mxu0 %v9662_v9  ;;  %8709 = vmatprep.subr.bf16.mxu1 %v9663_v51  ;;  %v9685_v9 = vld [vmem:[%s13697_s8 + $0x220] ss:$16 sps:$4 sm:$0xff]   ;;  %v2013_v51 = vpack.c.bf16 %v2001_v44, %v2001_v44  ;;  %v2002_v44 = vmul.f32 %v11427_v54, %v11470_v36 }
 0x3a7   :  { %v9715_v54 = vld [vmem:[%s13697_s8 + $0x720] ss:$16 sps:$4 sm:$0xff]  }
 0x3a9   :  { %8688 = vmatpush3.bf16.msra.mxu0 %v9664_v52  ;;  %8710 = vmatpush3.bf16.msra.mxu1 %v9665_v39  ;;  %v2015_v52 = vpack.c.bf16 %v2003_v48, %v2003_v48  ;;  %v9686_v39 = vld [vmem:[%s13697_s8 + $0x140] ss:$16 sps:$4 sm:$0xff]   ;;  %v2005_v48 = vmul.f32 %v11437_v5, %v11598_v13 }
 0x3aa   :  { %8689 = vmatprep.subr.bf16.mxu0 %v9666_v42  ;;  %8711 = vmatprep.subr.bf16.mxu1 %v9667_v47  ;;  %v9687_v42 = vld [vmem:[%s13697_s8 + $0x340] ss:$16 sps:$4 sm:$0xff]  }
 0x3ab   :  { %v9688_v47 = vld [vmem:[%s13697_s8 + $0x40] ss:$16 sps:$4 sm:$0xff]  }
 0x3ad   :  { %8690 = vmatpush3.bf16.msra.mxu0 %v9668_v25  ;;  %8712 = vmatpush3.bf16.msra.mxu1 %v9669_v12  ;;  %v9689_v25 = vld [vmem:[%s13697_s8 + $0x240] ss:$16 sps:$4 sm:$0xff]  }
 0x3ae   :  { %8691 = vmatprep.subr.bf16.mxu0 %v9670_v15  ;;  %8713 = vmatprep.subr.bf16.mxu1 %v9671_v6  ;;  %v9690_v12 = vld [vmem:[%s13697_s8 + $0x160] ss:$16 sps:$4 sm:$0xff]  }
 0x3af   :  { %v9691_v15 = vld [vmem:[%s13697_s8 + $0x360] ss:$16 sps:$4 sm:$0xff]  }
 0x3b0   :  { %v9692_v6 = vld [vmem:[%s13697_s8 + $0x60] ss:$16 sps:$4 sm:$0xff]  }
 0x3b1   :  { %8692 = vmatpush3.bf16.msra.mxu0 %v9672_v57  ;;  %8714 = vmatpush3.bf16.msra.mxu1 %v9673_v58  ;;  %v2415_v22 = vpop.f32.mrb[36].mxu0  ;;  %v2456_v23 = vpop.f32.mrb[36].mxu1  ;;  %v9693_v57 = vld [vmem:[%s13697_s8 + $0x260] ss:$16 sps:$4 sm:$0xff]  }
 0x3b2   :  { %v2471_v24 = vmul.f32 %v2415_v22, %v11396_v40  ;;  %v2473_v27 = vmul.f32 %v2456_v23, %v11399_v41  ;;  %v2417_v28 = vpop.f32.mrb[37].mxu0  ;;  %v2458_v29 = vpop.f32.mrb[37].mxu1  ;;  %8693 = vmatprep.subr.bf16.mxu0 %v9674_v3  ;;  %8715 = vmatprep.subr.bf16.mxu1 %v9675_v7  ;;  %v9694_v58 = vld [vmem:[%s13697_s8 + $0x180] ss:$16 sps:$4 sm:$0xff]  }
 0x3b3   :  { %v2472_v30 = vmul.f32 %v2417_v28, %v11405_v45  ;;  %v2474_v31 = vmul.f32 %v2458_v29, %v11408_v46  ;;  %v2419_v32 = vpop.f32.mrb[38].mxu0  ;;  %v2460_v33 = vpop.f32.mrb[38].mxu1  ;;  %v9695_v3 = vld [vmem:[%s13697_s8 + $0x380] ss:$16 sps:$4 sm:$0xff]  }
 0x3b4   :  { %v2420_v19 = vpop.f32.mrb[39].mxu0  ;;  %v2461_v61 = vpop.f32.mrb[39].mxu1  ;;  %v2483_v50 = vpack.c.bf16 %v2471_v24, %v2471_v24  ;;  %v2485_v63 = vpack.c.bf16 %v2473_v27, %v2473_v27  ;;  %v9696_v7 = vld [vmem:[%s13697_s8 + $0x80] ss:$16 sps:$4 sm:$0xff]  }
 0x3b5   :  { %v2484_v10 = vpack.c.bf16 %v2472_v30, %v2472_v30  ;;  %v2486_v49 = vpack.c.bf16 %v2474_v31, %v2474_v31  ;;  %8694 = vmatpush3.bf16.msra.mxu0 %v9676_v4  ;;  %8716 = vmatpush3.bf16.msra.mxu1 %v9677_v59  ;;  %v9697_v4 = vld [vmem:[%s13697_s8 + $0x280] ss:$16 sps:$4 sm:$0xff]   ;;  %v2007_v61 = vmul.f32 %v11439_v60, %v11601_v14 }
 0x3b6   :  { %8723 = vmatprep.subr.bf16.mxu0 %v9678_v16  ;;  %8745 = vmatprep.subr.bf16.mxu1 %v9679_v21  ;;  %v9698_v59 = vld [vmem:[%s13697_s8 + $0x1a0] ss:$16 sps:$4 sm:$0xff]  }
 0x3b7   :  { %3447 = vmatprep.mubr.bf16.mxu0 %v2484_v10  ;;  %3487 = vmatprep.mubr.bf16.mxu1 %v2486_v49  ;;  %v9699_v16 = vld [vmem:[%s13697_s8 + $0x3a0] ss:$16 sps:$4 sm:$0xff]   ;;  %v2014_v49 = vpack.c.bf16 %v2002_v44, %v2002_v44 }
 0x3b8   :  { %3448 = vmatmul.mubr.bf16.vlgmr.msra.gmra.mrb[48].mxu0 %v2483_v50  ;;  %3488 = vmatmul.mubr.bf16.vlgmr.msra.gmra.mrb[48].mxu1 %v2485_v63  ;;  %v9700_v21 = vld [vmem:[%s13697_s8 + $0xa0] ss:$16 sps:$4 sm:$0xff]   ;;  %v2019_v50 = vpack.c.bf16 %v2007_v61, %v2007_v61 }
 0x3b9   :  { %8724 = vmatpush3.bf16.msra.mxu0 %v9680_v34  ;;  %8746 = vmatpush3.bf16.msra.mxu1 %v9681_v43  ;;  %v9701_v22 = vld [vmem:[%s13697_s8 + $0x2a0] ss:$16 sps:$4 sm:$0xff]   ;;  %v2000_v43 = vmul.f32 %v11425_v53, %v11467_v35 }
 0x3ba   :  { %4103 = vmatprep.mubr.bf16.mxu0 %v2013_v51  ;;  %4143 = vmatprep.mubr.bf16.mxu1 %v2015_v52  ;;  %v9702_v23 = vld [vmem:[%s13697_s8 + $0x1c0] ss:$16 sps:$4 sm:$0xff]  }
 0x3bb   :  { %8725 = vmatprep.subr.bf16.mxu0 %v9682_v20  ;;  %8747 = vmatprep.subr.bf16.mxu1 %v9683_v55  ;;  %v9703_v24 = vld [vmem:[%s13697_s8 + $0x3c0] ss:$16 sps:$4 sm:$0xff]   ;;  %v2012_v5 = vpack.c.bf16 %v2000_v43, %v2000_v43  ;;  %v2017_v20 = vpack.c.bf16 %v2005_v48, %v2005_v48 }
 0x3bc   :  { %v9704_v27 = vld [vmem:[%s13697_s8 + $0xc0] ss:$16 sps:$4 sm:$0xff]  }
 0x3bd   :  { %8726 = vmatpush3.bf16.msra.mxu0 %v9684_v56  ;;  %8748 = vmatpush3.bf16.msra.mxu1 %v9685_v9  ;;  %v9705_v28 = vld [vmem:[%s13697_s8 + $0x2c0] ss:$16 sps:$4 sm:$0xff]  }
 0x3be   :  { %8727 = vmatprep.subr.bf16.mxu0 %v9686_v39  ;;  %8749 = vmatprep.subr.bf16.mxu1 %v9687_v42  ;;  %v9706_v29 = vld [vmem:[%s13697_s8 + $0x1e0] ss:$16 sps:$4 sm:$0xff]  }
 0x3bf   :  { %v9707_v30 = vld [vmem:[%s13697_s8 + $0x3e0] ss:$16 sps:$4 sm:$0xff]  }
 0x3c0   :  { %v9708_v31 = vld [vmem:[%s13697_s8 + $0xe0] ss:$16 sps:$4 sm:$0xff]  }
 0x3c1   :  { %8728 = vmatpush3.bf16.msra.mxu0 %v9688_v47  ;;  %8750 = vmatpush3.bf16.msra.mxu1 %v9689_v25  ;;  %v9709_v32 = vld [vmem:[%s13697_s8 + $0x2e0] ss:$16 sps:$4 sm:$0xff]  }
 0x3c2   :  { %8729 = vmatprep.subr.bf16.mxu0 %v9690_v12  ;;  %8751 = vmatprep.subr.bf16.mxu1 %v9691_v15  ;;  %v9710_v33 = vld [vmem:[%s13697_s8 + $0x500] ss:$16 sps:$4 sm:$0xff]  }
 0x3c3   :  { %v9711_v34 = vld [vmem:[%s13697_s8 + $0x700] ss:$16 sps:$4 sm:$0xff]  }
 0x3c4   :  { %v9712_v19 = vld [vmem:[%s13697_s8 + $0x400] ss:$16 sps:$4 sm:$0xff]  }
 0x3c5   :  { %8730 = vmatpush3.bf16.msra.mxu0 %v9692_v6  ;;  %8752 = vmatpush3.bf16.msra.mxu1 %v9693_v57  ;;  %v9713_v10 = vld [vmem:[%s13697_s8 + $0x600] ss:$16 sps:$4 sm:$0xff]  }
 0x3c6   :  { %8731 = vmatprep.subr.bf16.mxu0 %v9694_v58  ;;  %8753 = vmatprep.subr.bf16.mxu1 %v9695_v3  ;;  %v9714_v53 = vld [vmem:[%s13697_s8 + $0x520] ss:$16 sps:$4 sm:$0xff]  }
 0x3c7   :  { %v9716_v60 = vld [vmem:[%s13697_s8 + $0x420] ss:$16 sps:$4 sm:$0xff]  }
 0x3c8   :  { %v9717_v63 = vld [vmem:[%s13697_s8 + $0x620] ss:$16 sps:$4 sm:$0xff]  }
 0x3c9   :  { %8732 = vmatpush3.bf16.msra.mxu0 %v9696_v7  ;;  %8754 = vmatpush3.bf16.msra.mxu1 %v9697_v4  ;;  %v9718_v55 = vld [vmem:[%s13697_s8 + $0x540] ss:$16 sps:$4 sm:$0xff]  }
 0x3ca   :  { %8733 = vmatprep.subr.bf16.mxu0 %v9698_v59  ;;  %8755 = vmatprep.subr.bf16.mxu1 %v9699_v16  ;;  %v9719_v56 = vld [vmem:[%s13697_s8 + $0x740] ss:$16 sps:$4 sm:$0xff]  }
 0x3cb   :  { %v9720_v9 = vld [vmem:[%s13697_s8 + $0x440] ss:$16 sps:$4 sm:$0xff]  }
 0x3cc   :  { %v9721_v51 = vld [vmem:[%s13697_s8 + $0x640] ss:$16 sps:$4 sm:$0xff]  }
 0x3cd   :  { %8734 = vmatpush3.bf16.msra.mxu0 %v9700_v21  ;;  %8756 = vmatpush3.bf16.msra.mxu1 %v9701_v22  ;;  %v9722_v52 = vld [vmem:[%s13697_s8 + $0x560] ss:$16 sps:$4 sm:$0xff]  }
 0x3ce   :  { %8735 = vmatprep.subr.bf16.mxu0 %v9702_v23  ;;  %8757 = vmatprep.subr.bf16.mxu1 %v9703_v24  ;;  %v9723_v39 = vld [vmem:[%s13697_s8 + $0x760] ss:$16 sps:$4 sm:$0xff]  }
 0x3cf   :  { %v9724_v42 = vld [vmem:[%s13697_s8 + $0x460] ss:$16 sps:$4 sm:$0xff]  }
 0x3d0   :  { %v9725_v47 = vld [vmem:[%s13697_s8 + $0x660] ss:$16 sps:$4 sm:$0xff]  }
 0x3d1   :  { %8736 = vmatpush3.bf16.msra.mxu0 %v9704_v27  ;;  %8758 = vmatpush3.bf16.msra.mxu1 %v9705_v28  ;;  %v9726_v25 = vld [vmem:[%s13697_s8 + $0x580] ss:$16 sps:$4 sm:$0xff]  }
 0x3d2   :  { %8737 = vmatprep.subr.bf16.mxu0 %v9706_v29  ;;  %8759 = vmatprep.subr.bf16.mxu1 %v9707_v30  ;;  %v9727_v12 = vld [vmem:[%s13697_s8 + $0x780] ss:$16 sps:$4 sm:$0xff]   ;;  %v2004_v30 = vmul.f32 %v11433_v17, %v11589_v26  ;;  %v2011_v17 = vmul.f32 %v11447_v11, %v11408_v46 }
 0x3d3   :  { %v9728_v15 = vld [vmem:[%s13697_s8 + $0x480] ss:$16 sps:$4 sm:$0xff]  }
 0x3d4   :  { %v9729_v6 = vld [vmem:[%s13697_s8 + $0x680] ss:$16 sps:$4 sm:$0xff]   ;;  %v2016_v43 = vpack.c.bf16 %v2004_v30, %v2004_v30  ;;  %v12075_v30 = vld [vmem:[%s13694_s7 + $0xcc] ss:$48 sps:$4 sm:$0xff]  }
 0x3d5   :  { %8738 = vmatpush3.bf16.msra.mxu0 %v9708_v31  ;;  %8760 = vmatpush3.bf16.msra.mxu1 %v9709_v32  ;;  %v9730_v57 = vld [vmem:[%s13697_s8 + $0x5a0] ss:$16 sps:$4 sm:$0xff]   ;;  %v2006_v31 = vmul.f32 %v11435_v2, %v11592_v18 }
 0x3d6   :  { %8767 = vmatprep.subr.bf16.mxu0 %v9710_v33  ;;  %8789 = vmatprep.subr.bf16.mxu1 %v9711_v34  ;;  %v9731_v58 = vld [vmem:[%s13697_s8 + $0x7a0] ss:$16 sps:$4 sm:$0xff]   ;;  %v2009_v33 = vmul.f32 %v11445_v8, %v11405_v45 }
 0x3d7   :  { %v9732_v3 = vld [vmem:[%s13697_s8 + $0x4a0] ss:$16 sps:$4 sm:$0xff]   ;;  %v2018_v8 = vpack.c.bf16 %v2006_v31, %v2006_v31 }
 0x3d8   :  { %4104 = vmatmul.mubr.bf16.vlgmr.msra.gmra.mrb[52].mxu0 %v2012_v5  ;;  %4144 = vmatmul.mubr.bf16.vlgmr.msra.gmra.mrb[52].mxu1 %v2014_v49  ;;  %v9733_v7 = vld [vmem:[%s13697_s8 + $0x6a0] ss:$16 sps:$4 sm:$0xff]  }
 0x3d9   :  { %8768 = vmatpush3.bf16.msra.mxu0 %v9712_v19  ;;  %4183 = vmatprep.mubr.bf16.mxu0 %v2017_v20  ;;  %v9734_v4 = vld [vmem:[%s13697_s8 + $0x5c0] ss:$16 sps:$4 sm:$0xff]   ;;  %v2021_v19 = vpack.c.bf16 %v2009_v33, %v2009_v33  ;;  %v12093_v33 = vld [vmem:[%s13694_s7 + $0x124] ss:$48 sps:$4 sm:$0xff]  }
 0x3da   :  { %8790 = vmatpush3.bf16.msra.mxu1 %v9713_v10  ;;  %4223 = vmatprep.mubr.bf16.mxu1 %v2019_v50  ;;  %v9735_v59 = vld [vmem:[%s13697_s8 + $0x7c0] ss:$16 sps:$4 sm:$0xff]   ;;  %v2023_v10 = vpack.c.bf16 %v2011_v17, %v2011_v17 }
 0x3db   :  { %8769 = vmatprep.subr.bf16.mxu0 %v9714_v53  ;;  %8791 = vmatprep.subr.bf16.mxu1 %v9715_v54  ;;  %v9736_v16 = vld [vmem:[%s13697_s8 + $0x4c0] ss:$16 sps:$4 sm:$0xff]  }
 0x3dc   :  { %v9737_v21 = vld [vmem:[%s13697_s8 + $0x6c0] ss:$16 sps:$4 sm:$0xff]  }
 0x3dd   :  { %8770 = vmatpush3.bf16.msra.mxu0 %v9716_v60  ;;  %v9738_v22 = vld [vmem:[%s13697_s8 + $0x5e0] ss:$16 sps:$4 sm:$0xff]  }
 0x3de   :  { %8792 = vmatpush3.bf16.msra.mxu1 %v9717_v63  ;;  %8771 = vmatprep.subr.bf16.mxu0 %v9718_v55  ;;  %v9739_v23 = vld [vmem:[%s13697_s8 + $0x7e0] ss:$16 sps:$4 sm:$0xff]  }
 0x3df   :  { %8793 = vmatprep.subr.bf16.mxu1 %v9719_v56  ;;  %v9740_v24 = vld [vmem:[%s13697_s8 + $0x4e0] ss:$16 sps:$4 sm:$0xff]  }
 0x3e0   :  { %v9741_v27 = vld [vmem:[%s13697_s8 + $0x6e0] ss:$16 sps:$4 sm:$0xff]  }
 0x3e1   :  { %8772 = vmatpush3.bf16.msra.mxu0 %v9720_v9  ;;  %v9742_v28 = vld [vmem:[%s13697_s8 + $0x900] ss:$16 sps:$4 sm:$0xff]  }
 0x3e2   :  { %8794 = vmatpush3.bf16.msra.mxu1 %v9721_v51  ;;  %8773 = vmatprep.subr.bf16.mxu0 %v9722_v52  ;;  %v9743_v29 = vld [vmem:[%s13697_s8 + $0xb00] ss:$16 sps:$4 sm:$0xff]  }
 0x3e3   :  { %8795 = vmatprep.subr.bf16.mxu1 %v9723_v39  ;;  %v9744_v32 = vld [vmem:[%s13697_s8 + $0x800] ss:$16 sps:$4 sm:$0xff]  }
 0x3e4   :  { %v9745_v34 = vld [vmem:[%s13697_s8 + $0xa00] ss:$16 sps:$4 sm:$0xff]  }
 0x3e5   :  { %8774 = vmatpush3.bf16.msra.mxu0 %v9724_v42  ;;  %v9746_v2 = vld [vmem:[%s13697_s8 + $0x920] ss:$16 sps:$4 sm:$0xff]  }
 0x3e6   :  { %8796 = vmatpush3.bf16.msra.mxu1 %v9725_v47  ;;  %8775 = vmatprep.subr.bf16.mxu0 %v9726_v25  ;;  %v9747_v44 = vld [vmem:[%s13697_s8 + $0xb20] ss:$16 sps:$4 sm:$0xff]  }
 0x3e7   :  { %8797 = vmatprep.subr.bf16.mxu1 %v9727_v12  ;;  %v9748_v48 = vld [vmem:[%s13697_s8 + $0x820] ss:$16 sps:$4 sm:$0xff]  }
 0x3e8   :  { %v9749_v11 = vld [vmem:[%s13697_s8 + $0xa20] ss:$16 sps:$4 sm:$0xff]  }
 0x3e9   :  { %8776 = vmatpush3.bf16.msra.mxu0 %v9728_v15  ;;  %v9750_v61 = vld [vmem:[%s13697_s8 + $0x940] ss:$16 sps:$4 sm:$0xff]  }
 0x3ea   :  { %8798 = vmatpush3.bf16.msra.mxu1 %v9729_v6  ;;  %8777 = vmatprep.subr.bf16.mxu0 %v9730_v57  ;;  %v9751_v53 = vld [vmem:[%s13697_s8 + $0xb40] ss:$16 sps:$4 sm:$0xff]  }
 0x3eb   :  { %8799 = vmatprep.subr.bf16.mxu1 %v9731_v58  ;;  %v9752_v54 = vld [vmem:[%s13697_s8 + $0x840] ss:$16 sps:$4 sm:$0xff]  }
 0x3ec   :  { %v9753_v5 = vld [vmem:[%s13697_s8 + $0xa40] ss:$16 sps:$4 sm:$0xff]  }
 0x3ed   :  { %8778 = vmatpush3.bf16.msra.mxu0 %v9732_v3  ;;  %v9754_v49 = vld [vmem:[%s13697_s8 + $0x960] ss:$16 sps:$4 sm:$0xff]  }
 0x3ee   :  { %8800 = vmatpush3.bf16.msra.mxu1 %v9733_v7  ;;  %8779 = vmatprep.subr.bf16.mxu0 %v9734_v4  ;;  %v9755_v20 = vld [vmem:[%s13697_s8 + $0xb60] ss:$16 sps:$4 sm:$0xff]   ;;  %v2008_v7 = vmul.f32 %v11441_v62, %v11396_v40  ;;  %v2010_v4 = vmul.f32 %v11443_v0, %v11399_v41  ;;  %v12025_v62 = vld [vmem:[%s13694_s7 + $0xc] ss:$48 sps:$4 sm:$0xff]  }
 0x3ef   :  { %8801 = vmatprep.subr.bf16.mxu1 %v9735_v59  ;;  %v9756_v60 = vld [vmem:[%s13697_s8 + $0x860] ss:$16 sps:$4 sm:$0xff]  }
 0x3f0   :  { %v9757_v50 = vld [vmem:[%s13697_s8 + $0xa60] ss:$16 sps:$4 sm:$0xff]   ;;  %v2020_v59 = vpack.c.bf16 %v2008_v7, %v2008_v7  ;;  %v12300_v7 = vld [vmem:[%s13694_s7 + $0x13c] ss:$48 sps:$4 sm:$0xff]  }
 0x3f1   :  { %8780 = vmatpush3.bf16.msra.mxu0 %v9736_v16  ;;  %v9758_v63 = vld [vmem:[%s13697_s8 + $0x980] ss:$16 sps:$4 sm:$0xff]   ;;  %v12019_v16 = vld [vmem:[%s13694_s7 + $0x4] ss:$48 sps:$4 sm:$0xff]   ;;  %13932 = vst [vmem:[#allocation22_spill] sm:$0xff] %v12300_v7 }
 0x3f2   :  { %8802 = vmatpush3.bf16.msra.mxu1 %v9737_v21  ;;  %8781 = vmatprep.subr.bf16.mxu0 %v9738_v22  ;;  %v9759_v55 = vld [vmem:[%s13697_s8 + $0xb80] ss:$16 sps:$4 sm:$0xff]   ;;  %v2022_v21 = vpack.c.bf16 %v2010_v4, %v2010_v4  ;;  %v12037_v22 = vld [vmem:[%s13694_s7 + $0x8] ss:$48 sps:$4 sm:$0xff]  }
 0x3f3   :  { %8803 = vmatprep.subr.bf16.mxu1 %v9739_v23  ;;  %v9760_v56 = vld [vmem:[%s13697_s8 + $0x880] ss:$16 sps:$4 sm:$0xff]   ;;  %v12043_v23 = vld [vmem:[%s13694_s7 + $0x64] ss:$48 sps:$4 sm:$0xff]  }
 0x3f4   :  { %v9761_v9 = vld [vmem:[%s13697_s8 + $0xa80] ss:$16 sps:$4 sm:$0xff]  }
 0x3f5   :  { %8782 = vmatpush3.bf16.msra.mxu0 %v9740_v24  ;;  %v9762_v51 = vld [vmem:[%s13697_s8 + $0x9a0] ss:$16 sps:$4 sm:$0xff]   ;;  %v12049_v24 = vld [vmem:[%s13694_s7 + $0x6c] ss:$48 sps:$4 sm:$0xff]  }
 0x3f6   :  { %8804 = vmatpush3.bf16.msra.mxu1 %v9741_v27  ;;  %8811 = vmatprep.subr.bf16.mxu0 %v9742_v28  ;;  %v9763_v52 = vld [vmem:[%s13697_s8 + $0xba0] ss:$16 sps:$4 sm:$0xff]   ;;  %v12063_v28 = vld [vmem:[%s13694_s7 + $0x68] ss:$48 sps:$4 sm:$0xff]  }
 0x3f7   :  { %8833 = vmatprep.subr.bf16.mxu1 %v9743_v29  ;;  %v9764_v39 = vld [vmem:[%s13697_s8 + $0x8a0] ss:$16 sps:$4 sm:$0xff]   ;;  %v12069_v29 = vld [vmem:[%s13694_s7 + $0xc4] ss:$48 sps:$4 sm:$0xff]  }
 0x3f8   :  { %4184 = vmatmul.mubr.bf16.vlgmr.msra.gmra.mrb[56].mxu0 %v2016_v43  ;;  %v9765_v42 = vld [vmem:[%s13697_s8 + $0xaa0] ss:$16 sps:$4 sm:$0xff]   ;;  %v12117_v43 = vld [vmem:[%s13694_s7 + $0x184] ss:$48 sps:$4 sm:$0xff]  }
 0x3f9   :  { %4224 = vmatmul.mubr.bf16.vlgmr.msra.gmra.mrb[56].mxu1 %v2018_v8  ;;  %8812 = vmatpush3.bf16.msra.mxu0 %v9744_v32  ;;  %v9766_v47 = vld [vmem:[%s13697_s8 + $0x9c0] ss:$16 sps:$4 sm:$0xff]   ;;  %v12087_v32 = vld [vmem:[%s13694_s7 + $0xc8] ss:$48 sps:$4 sm:$0xff]  }
 0x3fa   :  { %4263 = vmatprep.mubr.bf16.mxu0 %v2021_v19  ;;  %8834 = vmatpush3.bf16.msra.mxu1 %v9745_v34  ;;  %v9767_v25 = vld [vmem:[%s13697_s8 + $0xbc0] ss:$16 sps:$4 sm:$0xff]   ;;  %v12099_v34 = vld [vmem:[%s13694_s7 + $0x12c] ss:$48 sps:$4 sm:$0xff]   ;;  %v12141_v19 = vld [vmem:[%s13694_s7 + $0x1e4] ss:$48 sps:$4 sm:$0xff]  }
 0x3fb   :  { %4303 = vmatprep.mubr.bf16.mxu1 %v2023_v10  ;;  %8813 = vmatprep.subr.bf16.mxu0 %v9746_v2  ;;  %v9768_v12 = vld [vmem:[%s13697_s8 + $0x8c0] ss:$16 sps:$4 sm:$0xff]   ;;  %v12111_v2 = vld [vmem:[%s13694_s7 + $0x128] ss:$48 sps:$4 sm:$0xff]  }
 0x3fc   :  { %8835 = vmatprep.subr.bf16.mxu1 %v9747_v44  ;;  %v9769_v15 = vld [vmem:[%s13697_s8 + $0xac0] ss:$16 sps:$4 sm:$0xff]   ;;  %v12123_v44 = vld [vmem:[%s13694_s7 + $0x18c] ss:$48 sps:$4 sm:$0xff]   ;;  %v12159_v10 = vld [vmem:[%s13694_s7 + $0x1e8] ss:$48 sps:$4 sm:$0xff]  }
 0x3fd   :  { %8814 = vmatpush3.bf16.msra.mxu0 %v9748_v48  ;;  %v9770_v6 = vld [vmem:[%s13697_s8 + $0x9e0] ss:$16 sps:$4 sm:$0xff]   ;;  %v12135_v48 = vld [vmem:[%s13694_s7 + $0x188] ss:$48 sps:$4 sm:$0xff]  }
 0x3fe   :  { %8836 = vmatpush3.bf16.msra.mxu1 %v9749_v11  ;;  %8815 = vmatprep.subr.bf16.mxu0 %v9750_v61  ;;  %v9771_v57 = vld [vmem:[%s13697_s8 + $0xbe0] ss:$16 sps:$4 sm:$0xff]   ;;  %v12147_v11 = vld [vmem:[%s13694_s7 + $0x1ec] ss:$48 sps:$4 sm:$0xff]  }
 0x3ff   :  { %8837 = vmatprep.subr.bf16.mxu1 %v9751_v53  ;;  %v9772_v58 = vld [vmem:[%s13697_s8 + $0x8e0] ss:$16 sps:$4 sm:$0xff]   ;;  %v12165_v53 = vld [vmem:[%s13694_s7 + $0x244] ss:$48 sps:$4 sm:$0xff]  }
 0x400   :  { %v9773_v3 = vld [vmem:[%s13697_s8 + $0xae0] ss:$16 sps:$4 sm:$0xff]  }
 0x401   :  { %8816 = vmatpush3.bf16.msra.mxu0 %v9752_v54  ;;  %v12031_v0 = vld [vmem:[%s13694_s7] ss:$48 sps:$4 sm:$0xff]   ;;  %v12171_v54 = vld [vmem:[%s13694_s7 + $0x24c] ss:$48 sps:$4 sm:$0xff]  }
 0x402   :  { %8838 = vmatpush3.bf16.msra.mxu1 %v9753_v5  ;;  %8817 = vmatprep.subr.bf16.mxu0 %v9754_v49  ;;  %v12057_v27 = vld [vmem:[%s13694_s7 + $0x60] ss:$48 sps:$4 sm:$0xff]  }
 0x403   :  { %8839 = vmatprep.subr.bf16.mxu1 %v9755_v20  ;;  %v12081_v31 = vld [vmem:[%s13694_s7 + $0xc0] ss:$48 sps:$4 sm:$0xff]   ;;  %v12186_v20 = vld [vmem:[%s13694_s7 + $0x248] ss:$48 sps:$4 sm:$0xff]  }
 0x404   :  { %v12105_v17 = vld [vmem:[%s13694_s7 + $0x120] ss:$48 sps:$4 sm:$0xff]   ;;  %13914 = vst [vmem:[#allocation3_spill] sm:$0xff] %v12186_v20 }
 0x405   :  { %8818 = vmatpush3.bf16.msra.mxu0 %v9756_v60  ;;  %v12129_v8 = vld [vmem:[%s13694_s7 + $0x180] ss:$48 sps:$4 sm:$0xff]   ;;  %v12192_v60 = vld [vmem:[%s13694_s7 + $0x2a4] ss:$48 sps:$4 sm:$0xff]  }
 0x406   :  { %8840 = vmatpush3.bf16.msra.mxu1 %v9757_v50  ;;  %8819 = vmatprep.subr.bf16.mxu0 %v9758_v63  ;;  %v12153_v61 = vld [vmem:[%s13694_s7 + $0x1e0] ss:$48 sps:$4 sm:$0xff]   ;;  %13915 = vst [vmem:[#allocation4_spill] sm:$0xff] %v12192_v60  ;;  %v12198_v50 = vld [vmem:[%s13694_s7 + $0x2ac] ss:$48 sps:$4 sm:$0xff]  }
 0x407   :  { %8841 = vmatprep.subr.bf16.mxu1 %v9759_v55  ;;  %v12177_v5 = vld [vmem:[%s13694_s7 + $0x240] ss:$48 sps:$4 sm:$0xff]   ;;  %13916 = vst [vmem:[#allocation5_spill] sm:$0xff] %v12198_v50 }
 0x408   :  { %13913 = vst [vmem:[#allocation2_spill] sm:$0xff] %v12177_v5  ;;  %v59_v49 = vld [vmem:[%s13691_s0 + $0x10] sm:$0xff] }
 0x409   :  { %8820 = vmatpush3.bf16.msra.mxu0 %v9760_v56  ;;  %v12201_v63 = vpack.c.bf16 %v59_v49, %v59_v49  ;;  %v12206_v55 = vld [vmem:[%s13694_s7 + $0x2a0] ss:$48 sps:$4 sm:$0xff]   ;;  %v12212_v56 = vld [vmem:[%s13694_s7 + $0x2a8] ss:$48 sps:$4 sm:$0xff]   ;;  %v12324_v49 = vld [vmem:[%s13694_s7 + $0x19c] ss:$48 sps:$4 sm:$0xff]  }
 0x40a   :  { %8842 = vmatpush3.bf16.msra.mxu1 %v9761_v9  ;;  %8821 = vmatprep.subr.bf16.mxu0 %v9762_v51  ;;  %13917 = vst [vmem:[#allocation6_spill] sm:$0xff] %v12206_v55  ;;  %13918 = vst [vmem:[#allocation7_spill] sm:$0xff] %v12212_v56  ;;  %v12218_v9 = vld [vmem:[%s13694_s7 + $0x14] ss:$48 sps:$4 sm:$0xff]   ;;  %v12224_v51 = vld [vmem:[%s13694_s7 + $0x1c] ss:$48 sps:$4 sm:$0xff]  }
 0x40b   :  { %8843 = vmatprep.subr.bf16.mxu1 %v9763_v52  ;;  %13919 = vst [vmem:[#allocation8_spill] sm:$0xff] %v12218_v9  ;;  %13920 = vst [vmem:[#allocation9_spill] sm:$0xff] %v12224_v51  ;;  %v12232_v52 = vld [vmem:[%s13694_s7 + $0x10] ss:$48 sps:$4 sm:$0xff]  }
 0x40c   :  { %13921 = vst [vmem:[#allocation10_spill] sm:$0xff] %v12232_v52  ;;  %v12306_v4 = vld [vmem:[%s13694_s7 + $0x130] ss:$48 sps:$4 sm:$0xff]   ;;  %13936 = vst [vmem:[#allocation27_spill] sm:$0xff] %v12324_v49 }
 0x40d   :  { %8822 = vmatpush3.bf16.msra.mxu0 %v9764_v39  ;;  %v12238_v39 = vld [vmem:[%s13694_s7 + $0x18] ss:$48 sps:$4 sm:$0xff]   ;;  %13933 = vst [vmem:[#allocation23_spill] sm:$0xff] %v12306_v4 }
 0x40e   :  { %8844 = vmatpush3.bf16.msra.mxu1 %v9765_v42  ;;  %8823 = vmatprep.subr.bf16.mxu0 %v9766_v47  ;;  %13922 = vst [vmem:[#allocation11_spill] sm:$0xff] %v12238_v39  ;;  %v12244_v42 = vld [vmem:[%s13694_s7 + $0x74] ss:$48 sps:$4 sm:$0xff]   ;;  %v12250_v47 = vld [vmem:[%s13694_s7 + $0x7c] ss:$48 sps:$4 sm:$0xff]  }
 0x40f   :  { %8845 = vmatprep.subr.bf16.mxu1 %v9767_v25  ;;  %13923 = vst [vmem:[#allocation12_spill] sm:$0xff] %v12244_v42  ;;  %13924 = vst [vmem:[#allocation13_spill] sm:$0xff] %v12250_v47  ;;  %v12258_v25 = vld [vmem:[%s13694_s7 + $0x70] ss:$48 sps:$4 sm:$0xff]  }
 0x410   :  { %13925 = vst [vmem:[#allocation14_spill] sm:$0xff] %v12258_v25 }
 0x411   :  { %8824 = vmatpush3.bf16.msra.mxu0 %v9768_v12  ;;  %v12264_v12 = vld [vmem:[%s13694_s7 + $0x78] ss:$48 sps:$4 sm:$0xff]  }
 0x412   :  { %8846 = vmatpush3.bf16.msra.mxu1 %v9769_v15  ;;  %8825 = vmatprep.subr.bf16.mxu0 %v9770_v6  ;;  %13926 = vst [vmem:[#allocation15_spill] sm:$0xff] %v12264_v12  ;;  %v12270_v15 = vld [vmem:[%s13694_s7 + $0xd4] ss:$48 sps:$4 sm:$0xff]   ;;  %v12276_v6 = vld [vmem:[%s13694_s7 + $0xdc] ss:$48 sps:$4 sm:$0xff]  }
 0x413   :  { %8847 = vmatprep.subr.bf16.mxu1 %v9771_v57  ;;  %13927 = vst [vmem:[#allocation16_spill] sm:$0xff] %v12270_v15  ;;  %13928 = vst [vmem:[#allocation17_spill] sm:$0xff] %v12276_v6  ;;  %v12282_v57 = vld [vmem:[%s13694_s7 + $0xd0] ss:$48 sps:$4 sm:$0xff]  }
 0x414   :  { %13929 = vst [vmem:[#allocation18_spill] sm:$0xff] %v12282_v57 }
 0x415   :  { %8826 = vmatpush3.bf16.msra.mxu0 %v9772_v58  ;;  %v12288_v58 = vld [vmem:[%s13694_s7 + $0xd8] ss:$48 sps:$4 sm:$0xff]  }
 0x416   :  { %8848 = vmatpush3.bf16.msra.mxu1 %v9773_v3  ;;  %4312 = vmatprep.subr.bf16.mxu0 %v12019_v16  ;;  %13930 = vst [vmem:[#allocation20_spill] sm:$0xff] %v12288_v58  ;;  %v12294_v3 = vld [vmem:[%s13694_s7 + $0x134] ss:$48 sps:$4 sm:$0xff]  }
 0x417   :  { %4353 = vmatprep.subr.bf16.mxu1 %v12025_v62  ;;  %13931 = vst [vmem:[#allocation21_spill] sm:$0xff] %v12294_v3 }
 0x418   :  { %4264 = vmatmul.mubr.bf16.vlgmr.msra.gmra.mrb[60].mxu0 %v2020_v59  ;;  %v12312_v59 = vld [vmem:[%s13694_s7 + $0x138] ss:$48 sps:$4 sm:$0xff]  }
 0x419   :  { %4304 = vmatmul.mubr.bf16.vlgmr.msra.gmra.mrb[60].mxu1 %v2022_v21  ;;  %4313 = vmatpush1.bf16.msra.mxu0 %v12031_v0  ;;  %13934 = vst [vmem:[#allocation24_spill] sm:$0xff] %v12312_v59  ;;  %v12318_v21 = vld [vmem:[%s13694_s7 + $0x194] ss:$48 sps:$4 sm:$0xff]  }
 0x41a   :  { %4354 = vmatpush1.bf16.msra.mxu1 %v12037_v22  ;;  %4314 = vmatprep.subr.bf16.mxu0 %v12043_v23  ;;  %13935 = vst [vmem:[#allocation25_spill] sm:$0xff] %v12318_v21 }
 0x41b   :  { %4355 = vmatprep.subr.bf16.mxu1 %v12049_v24  ;;  %4344 = vmatprep.mubr.bf16.mxu0 %v13855_v1 }
 0x41c   :  { %4385 = vmatprep.mubr.bf16.mxu1 %v13855_v1 }
 0x41d   :  { %4315 = vmatpush1.bf16.msra.mxu0 %v12057_v27 }
 0x41e   :  { %4356 = vmatpush1.bf16.msra.mxu1 %v12063_v28  ;;  %4316 = vmatprep.subr.bf16.mxu0 %v12069_v29 }
 0x41f   :  { %4357 = vmatprep.subr.bf16.mxu1 %v12075_v30 }
 0x421   :  { %4317 = vmatpush1.bf16.msra.mxu0 %v12081_v31 }
 0x422   :  { %4358 = vmatpush1.bf16.msra.mxu1 %v12087_v32  ;;  %4318 = vmatprep.subr.bf16.mxu0 %v12093_v33 }
 0x423   :  { %4359 = vmatprep.subr.bf16.mxu1 %v12099_v34 }
 0x425   :  { %4319 = vmatpush1.bf16.msra.mxu0 %v12105_v17 }
 0x426   :  { %4360 = vmatpush1.bf16.msra.mxu1 %v12111_v2  ;;  %4320 = vmatprep.subr.bf16.mxu0 %v12117_v43 }
 0x427   :  { %4361 = vmatprep.subr.bf16.mxu1 %v12123_v44 }
 0x429   :  { %4321 = vmatpush1.bf16.msra.mxu0 %v12129_v8 }
 0x42a   :  { %4362 = vmatpush1.bf16.msra.mxu1 %v12135_v48  ;;  %4322 = vmatprep.subr.bf16.mxu0 %v12141_v19 }
 0x42b   :  { %4363 = vmatprep.subr.bf16.mxu1 %v12147_v11 }
 0x42d   :  { %4323 = vmatpush1.bf16.msra.mxu0 %v12153_v61 }
 0x42e   :  { %4364 = vmatpush1.bf16.msra.mxu1 %v12159_v10  ;;  %4324 = vmatprep.subr.bf16.mxu0 %v12165_v53 }
 0x42f   :  { %4365 = vmatprep.subr.bf16.mxu1 %v12171_v54 }
 0x431   :  { %4325 = vmatpush1.bf16.msra.mxu0 %v12177_v5 }
 0x432   :  { %4366 = vmatpush1.bf16.msra.mxu1 %v12186_v20  ;;  %4326 = vmatprep.subr.bf16.mxu0 %v12192_v60 }
 0x433   :  { %4367 = vmatprep.subr.bf16.mxu1 %v12198_v50 }
 0x435   :  { %4327 = vmatpush1.bf16.msra.mxu0 %v12206_v55 }
 0x436   :  { %4368 = vmatpush1.bf16.msra.mxu1 %v12212_v56  ;;  %4394 = vmatprep.subr.bf16.mxu0 %v12218_v9 }
 0x437   :  { %4435 = vmatprep.subr.bf16.mxu1 %v12224_v51 }
 0x438   :  { %4345 = vmatmul.mubr.bf16.vlgmr.msra.gmra.mrb[64].mxu0 %v12201_v63 }
 0x439   :  { %4386 = vmatmul.mubr.bf16.vlgmr.msra.gmra.mrb[64].mxu1 %v12201_v63  ;;  %4395 = vmatpush1.bf16.msra.mxu0 %v12232_v52 }
 0x43a   :  { %4436 = vmatpush1.bf16.msra.mxu1 %v12238_v39  ;;  %4396 = vmatprep.subr.bf16.mxu0 %v12244_v42  ;;  %v9800_v42 = vld [vmem:[%s13697_s8 + $0xc8] ss:$16 sps:$4 sm:$0xff]  }
 0x43b   :  { %4437 = vmatprep.subr.bf16.mxu1 %v12250_v47  ;;  %4426 = vmatprep.mubr.bf16.mxu0 %v13855_v1 }
 0x43c   :  { %4467 = vmatprep.mubr.bf16.mxu1 %v13855_v1 }
 0x43d   :  { %4397 = vmatpush1.bf16.msra.mxu0 %v12258_v25 }
 0x43e   :  { %4438 = vmatpush1.bf16.msra.mxu1 %v12264_v12  ;;  %4398 = vmatprep.subr.bf16.mxu0 %v12270_v15  ;;  %v12360_v12 = vld [vmem:[%s13694_s7 + $0x1f8] ss:$48 sps:$4 sm:$0xff]  }
 0x43f   :  { %4439 = vmatprep.subr.bf16.mxu1 %v12276_v6  ;;  %v12354_v6 = vld [vmem:[%s13694_s7 + $0x1f0] ss:$48 sps:$4 sm:$0xff]   ;;  %13942 = vst [vmem:[#allocation33_spill] sm:$0xff] %v12360_v12 }
 0x440   :  { %13941 = vst [vmem:[#allocation32_spill] sm:$0xff] %v12354_v6 }
 0x441   :  { %4399 = vmatpush1.bf16.msra.mxu0 %v12282_v57 }
 0x442   :  { %4440 = vmatpush1.bf16.msra.mxu1 %v12288_v58  ;;  %4400 = vmatprep.subr.bf16.mxu0 %v12294_v3 }
 0x443   :  { %4441 = vmatprep.subr.bf16.mxu1 %v12300_v7 }
 0x445   :  { %4401 = vmatpush1.bf16.msra.mxu0 %v12306_v4  ;;  %v12330_v4 = vld [vmem:[%s13694_s7 + $0x190] ss:$48 sps:$4 sm:$0xff]  }
 0x446   :  { %4442 = vmatpush1.bf16.msra.mxu1 %v12312_v59  ;;  %4402 = vmatprep.subr.bf16.mxu0 %v12318_v21  ;;  %13937 = vst [vmem:[#allocation28_spill] sm:$0xff] %v12330_v4  ;;  %v12336_v59 = vld [vmem:[%s13694_s7 + $0x198] ss:$48 sps:$4 sm:$0xff]   ;;  %v12342_v21 = vld [vmem:[%s13694_s7 + $0x1f4] ss:$48 sps:$4 sm:$0xff]  }
 0x447   :  { %4443 = vmatprep.subr.bf16.mxu1 %v12324_v49  ;;  %13938 = vst [vmem:[#allocation29_spill] sm:$0xff] %v12336_v59  ;;  %13939 = vst [vmem:[#allocation30_spill] sm:$0xff] %v12342_v21 }
 0x449   :  { %4403 = vmatpush1.bf16.msra.mxu0 %v12330_v4  ;;  %v12348_v4 = vld [vmem:[%s13694_s7 + $0x1fc] ss:$48 sps:$4 sm:$0xff]  }
 0x44a   :  { %4444 = vmatpush1.bf16.msra.mxu1 %v12336_v59  ;;  %4404 = vmatprep.subr.bf16.mxu0 %v12342_v21  ;;  %13940 = vst [vmem:[#allocation31_spill] sm:$0xff] %v12348_v4 }
 0x44b   :  { %v8607_v49 = vpop.f32.mrb[40].mxu0  ;;  %v8629_v7 = vpop.f32.mrb[40].mxu1  ;;  %4445 = vmatprep.subr.bf16.mxu1 %v12348_v4 }
 0x44c   :  { %v8608_v3 = vpop.f32.mrb[41].mxu0  ;;  %v8630_v58 = vpop.f32.mrb[41].mxu1 }
 0x44d   :  { %v8609_v57 = vadd.f32 %v8608_v3, %v8607_v49  ;;  %v8631_v59 = vadd.f32 %v8630_v58, %v8629_v7  ;;  %4405 = vmatpush1.bf16.msra.mxu0 %v12354_v6  ;;  %v8610_v21 = vpop.f32.mrb[42].mxu0  ;;  %v8632_v15 = vpop.f32.mrb[42].mxu1  ;;  %v12366_v58 = vld [vmem:[%s13694_s7 + $0x254] ss:$48 sps:$4 sm:$0xff]   ;;  %v12386_v7 = vld [vmem:[%s13694_s7 + $0x258] ss:$48 sps:$4 sm:$0xff]  }
 0x44e   :  { %4446 = vmatpush1.bf16.msra.mxu1 %v12360_v12  ;;  %v8611_v4 = vpop.f32.mrb[43].mxu0  ;;  %v8633_v25 = vpop.f32.mrb[43].mxu1  ;;  %13943 = vst [vmem:[#allocation34_spill] sm:$0xff] %v12366_v58  ;;  %4406 = vmatprep.subr.bf16.mxu0 %v12366_v58  ;;  %v12374_v15 = vld [vmem:[%s13694_s7 + $0x25c] ss:$48 sps:$4 sm:$0xff]   ;;  %13946 = vst [vmem:[#allocation37_spill] sm:$0xff] %v12386_v7 }
 0x44f   :  { %v12369_v3 = vadd.f32 %v8631_v59, %v8609_v57  ;;  %13944 = vst [vmem:[#allocation35_spill] sm:$0xff] %v12374_v15  ;;  %4447 = vmatprep.subr.bf16.mxu1 %v12374_v15  ;;  %v12380_v25 = vld [vmem:[%s13694_s7 + $0x250] ss:$48 sps:$4 sm:$0xff]   ;;  %v12392_v57 = vld [vmem:[%s13694_s7 + $0x2b4] ss:$48 sps:$4 sm:$0xff]  }
 0x450   :  { %13945 = vst [vmem:[#allocation36_spill] sm:$0xff] %v12380_v25  ;;  %13947 = vst [vmem:[#allocation38_spill] sm:$0xff] %v12392_v57  ;;  %v12398_v4 = vld [vmem:[%s13694_s7 + $0x2bc] ss:$48 sps:$4 sm:$0xff]   ;;  %v12404_v59 = vld [vmem:[%s13694_s7 + $0x2b0] ss:$48 sps:$4 sm:$0xff]  }
 0x451   :  { %4407 = vmatpush1.bf16.msra.mxu0 %v12380_v25  ;;  %13948 = vst [vmem:[#allocation39_spill] sm:$0xff] %v12398_v4  ;;  %13949 = vst [vmem:[#allocation40_spill] sm:$0xff] %v12404_v59  ;;  %v12410_v21 = vld [vmem:[%s13694_s7 + $0x2b8] ss:$48 sps:$4 sm:$0xff]   ;;  %v12416_v49 = vld [vmem:[%s13694_s7 + $0x24] ss:$48 sps:$4 sm:$0xff]  }
 0x452   :  { %4448 = vmatpush1.bf16.msra.mxu1 %v12386_v7  ;;  %4408 = vmatprep.subr.bf16.mxu0 %v12392_v57  ;;  %13950 = vst [vmem:[#allocation26_spill] sm:$0xff] %v12410_v21  ;;  %13951 = vst [vmem:[#allocation19_spill] sm:$0xff] %v12416_v49  ;;  %v12552_v58 = vld [vmem:[%s13694_s7 + $0x200] ss:$48 sps:$4 sm:$0xff]   ;;  %v12558_v6 = vld [vmem:[%s13694_s7 + $0x208] ss:$48 sps:$4 sm:$0xff]  }
 0x453   :  { %4449 = vmatprep.subr.bf16.mxu1 %v12398_v4  ;;  %v12422_v4 = vld [vmem:[%s13694_s7 + $0x2c] ss:$48 sps:$4 sm:$0xff]   ;;  %13973 = vst [vmem:[#allocation62_spill] sm:$0xff] %v12552_v58  ;;  %13974 = vst [vmem:[#allocation63_spill] sm:$0xff] %v12558_v6 }
 0x454   :  { %13952 = vst [vmem:[#allocation41_spill] sm:$0xff] %v12422_v4 }
 0x455   :  { %4409 = vmatpush1.bf16.msra.mxu0 %v12404_v59  ;;  %v12448_v59 = vld [vmem:[%s13694_s7 + $0x8c] ss:$48 sps:$4 sm:$0xff]  }
 0x456   :  { %4450 = vmatpush1.bf16.msra.mxu1 %v12410_v21  ;;  %4476 = vmatprep.subr.bf16.mxu0 %v12416_v49  ;;  %v12430_v21 = vld [vmem:[%s13694_s7 + $0x20] ss:$48 sps:$4 sm:$0xff]   ;;  %v12436_v49 = vld [vmem:[%s13694_s7 + $0x28] ss:$48 sps:$4 sm:$0xff]   ;;  %13956 = vst [vmem:[#allocation45_spill] sm:$0xff] %v12448_v59 }
 0x457   :  { %4517 = vmatprep.subr.bf16.mxu1 %v12422_v4  ;;  %13953 = vst [vmem:[#allocation42_spill] sm:$0xff] %v12430_v21  ;;  %13954 = vst [vmem:[#allocation43_spill] sm:$0xff] %v12436_v49  ;;  %v12442_v4 = vld [vmem:[%s13694_s7 + $0x84] ss:$48 sps:$4 sm:$0xff]  }
 0x458   :  { %4427 = vmatmul.mubr.bf16.vlgmr.msra.gmra.mrb[68].mxu0 %v12201_v63  ;;  %13955 = vst [vmem:[#allocation44_spill] sm:$0xff] %v12442_v4 }
 0x459   :  { %4468 = vmatmul.mubr.bf16.vlgmr.msra.gmra.mrb[68].mxu1 %v12201_v63  ;;  %4477 = vmatpush1.bf16.msra.mxu0 %v12430_v21  ;;  %v12474_v21 = vld [vmem:[%s13694_s7 + $0xec] ss:$48 sps:$4 sm:$0xff]  }
 0x45a   :  { %4518 = vmatpush1.bf16.msra.mxu1 %v12436_v49  ;;  %4478 = vmatprep.subr.bf16.mxu0 %v12442_v4  ;;  %v12456_v49 = vld [vmem:[%s13694_s7 + $0x80] ss:$48 sps:$4 sm:$0xff]   ;;  %v12462_v4 = vld [vmem:[%s13694_s7 + $0x88] ss:$48 sps:$4 sm:$0xff]   ;;  %13960 = vst [vmem:[#allocation49_spill] sm:$0xff] %v12474_v21 }
 0x45b   :  { %4519 = vmatprep.subr.bf16.mxu1 %v12448_v59  ;;  %4508 = vmatprep.mubr.bf16.mxu0 %v13855_v1  ;;  %13957 = vst [vmem:[#allocation46_spill] sm:$0xff] %v12456_v49  ;;  %13958 = vst [vmem:[#allocation47_spill] sm:$0xff] %v12462_v4  ;;  %v12468_v59 = vld [vmem:[%s13694_s7 + $0xe4] ss:$48 sps:$4 sm:$0xff]  }
 0x45c   :  { %4549 = vmatprep.mubr.bf16.mxu1 %v13855_v1  ;;  %13959 = vst [vmem:[#allocation48_spill] sm:$0xff] %v12468_v59 }
 0x45d   :  { %4479 = vmatpush1.bf16.msra.mxu0 %v12456_v49  ;;  %v12480_v49 = vld [vmem:[%s13694_s7 + $0xe0] ss:$48 sps:$4 sm:$0xff]  }
 0x45e   :  { %4520 = vmatpush1.bf16.msra.mxu1 %v12462_v4  ;;  %4480 = vmatprep.subr.bf16.mxu0 %v12468_v59  ;;  %13961 = vst [vmem:[#allocation50_spill] sm:$0xff] %v12480_v49  ;;  %v12486_v4 = vld [vmem:[%s13694_s7 + $0xe8] ss:$48 sps:$4 sm:$0xff]   ;;  %v12492_v59 = vld [vmem:[%s13694_s7 + $0x144] ss:$48 sps:$4 sm:$0xff]  }
 0x45f   :  { %4521 = vmatprep.subr.bf16.mxu1 %v12474_v21  ;;  %13962 = vst [vmem:[#allocation51_spill] sm:$0xff] %v12486_v4  ;;  %13963 = vst [vmem:[#allocation52_spill] sm:$0xff] %v12492_v59  ;;  %v12498_v21 = vld [vmem:[%s13694_s7 + $0x14c] ss:$48 sps:$4 sm:$0xff]  }
 0x460   :  { %13964 = vst [vmem:[#allocation53_spill] sm:$0xff] %v12498_v21 }
 0x461   :  { %4481 = vmatpush1.bf16.msra.mxu0 %v12480_v49  ;;  %v12504_v49 = vld [vmem:[%s13694_s7 + $0x140] ss:$48 sps:$4 sm:$0xff]  }
 0x462   :  { %4522 = vmatpush1.bf16.msra.mxu1 %v12486_v4  ;;  %4482 = vmatprep.subr.bf16.mxu0 %v12492_v59  ;;  %13965 = vst [vmem:[#allocation54_spill] sm:$0xff] %v12504_v49  ;;  %v12510_v4 = vld [vmem:[%s13694_s7 + $0x148] ss:$48 sps:$4 sm:$0xff]   ;;  %v12516_v59 = vld [vmem:[%s13694_s7 + $0x1a4] ss:$48 sps:$4 sm:$0xff]  }
 0x463   :  { %4523 = vmatprep.subr.bf16.mxu1 %v12498_v21  ;;  %13966 = vst [vmem:[#allocation55_spill] sm:$0xff] %v12510_v4  ;;  %13967 = vst [vmem:[#allocation56_spill] sm:$0xff] %v12516_v59  ;;  %v12522_v21 = vld [vmem:[%s13694_s7 + $0x1ac] ss:$48 sps:$4 sm:$0xff]  }
 0x464   :  { %13968 = vst [vmem:[#allocation57_spill] sm:$0xff] %v12522_v21 }
 0x465   :  { %4483 = vmatpush1.bf16.msra.mxu0 %v12504_v49  ;;  %v12528_v49 = vld [vmem:[%s13694_s7 + $0x1a0] ss:$48 sps:$4 sm:$0xff]  }
 0x466   :  { %4524 = vmatpush1.bf16.msra.mxu1 %v12510_v4  ;;  %4484 = vmatprep.subr.bf16.mxu0 %v12516_v59  ;;  %13969 = vst [vmem:[#allocation58_spill] sm:$0xff] %v12528_v49  ;;  %v12534_v4 = vld [vmem:[%s13694_s7 + $0x1a8] ss:$48 sps:$4 sm:$0xff]   ;;  %v12540_v59 = vld [vmem:[%s13694_s7 + $0x204] ss:$48 sps:$4 sm:$0xff]  }
 0x467   :  { %4525 = vmatprep.subr.bf16.mxu1 %v12522_v21  ;;  %13970 = vst [vmem:[#allocation59_spill] sm:$0xff] %v12534_v4  ;;  %13971 = vst [vmem:[#allocation60_spill] sm:$0xff] %v12540_v59 }
 0x469   :  { %4485 = vmatpush1.bf16.msra.mxu0 %v12528_v49  ;;  %v12546_v49 = vld [vmem:[%s13694_s7 + $0x20c] ss:$48 sps:$4 sm:$0xff]  }
 0x46a   :  { %4526 = vmatpush1.bf16.msra.mxu1 %v12534_v4  ;;  %4486 = vmatprep.subr.bf16.mxu0 %v12540_v59  ;;  %13972 = vst [vmem:[#allocation61_spill] sm:$0xff] %v12546_v49 }
 0x46b   :  { %v8651_v21 = vpop.f32.mrb[44].mxu0  ;;  %v8673_v57 = vpop.f32.mrb[44].mxu1  ;;  %4527 = vmatprep.subr.bf16.mxu1 %v12546_v49 }
 0x46c   :  { %v8652_v7 = vpop.f32.mrb[45].mxu0  ;;  %v8674_v25 = vpop.f32.mrb[45].mxu1 }
 0x46d   :  { %v8653_v15 = vadd.f32 %v8652_v7, %v8651_v21  ;;  %v8675_v4 = vadd.f32 %v8674_v25, %v8673_v57  ;;  %4487 = vmatpush1.bf16.msra.mxu0 %v12552_v58  ;;  %v8654_v59 = vpop.f32.mrb[46].mxu0  ;;  %v8676_v12 = vpop.f32.mrb[46].mxu1  ;;  %v12564_v25 = vld [vmem:[%s13694_s7 + $0x264] ss:$48 sps:$4 sm:$0xff]   ;;  %v9775_v21 = vld [vmem:[%s13697_s8 + $0x308] ss:$16 sps:$4 sm:$0xff]  }
 0x46e   :  { %4528 = vmatpush1.bf16.msra.mxu1 %v12558_v6  ;;  %v8655_v49 = vpop.f32.mrb[47].mxu0  ;;  %v8677_v47 = vpop.f32.mrb[47].mxu1  ;;  %13975 = vst [vmem:[#allocation64_spill] sm:$0xff] %v12564_v25  ;;  %4488 = vmatprep.subr.bf16.mxu0 %v12564_v25  ;;  %v12571_v12 = vld [vmem:[%s13694_s7 + $0x26c] ss:$48 sps:$4 sm:$0xff]  }
 0x46f   :  { %v3370_v7 = vadd.f32 %v8653_v15, %v12369_v3  ;;  %13976 = vst [vmem:[#allocation65_spill] sm:$0xff] %v12571_v12  ;;  %4529 = vmatprep.subr.bf16.mxu1 %v12571_v12  ;;  %v12579_v47 = vld [vmem:[%s13694_s7 + $0x260] ss:$48 sps:$4 sm:$0xff]   ;;  %v12585_v3 = vld [vmem:[%s13694_s7 + $0x268] ss:$48 sps:$4 sm:$0xff]  }
 0x470   :  { %13977 = vst [vmem:[#allocation66_spill] sm:$0xff] %v12579_v47  ;;  %13978 = vst [vmem:[#allocation67_spill] sm:$0xff] %v12585_v3  ;;  %v12591_v15 = vld [vmem:[%s13694_s7 + $0x2c4] ss:$48 sps:$4 sm:$0xff]   ;;  %v12600_v59 = vld [vmem:[%s13694_s7 + $0x2cc] ss:$48 sps:$4 sm:$0xff]  }
 0x471   :  { %v12574_v57 = vadd.f32 %v8675_v4, %v3370_v7  ;;  %4489 = vmatpush1.bf16.msra.mxu0 %v12579_v47  ;;  %13979 = vst [vmem:[#allocation68_spill] sm:$0xff] %v12591_v15  ;;  %v9774_v4 = vld [vmem:[%s13697_s8 + $0x108] ss:$16 sps:$4 sm:$0xff]   ;;  %13980 = vst [vmem:[#allocation69_spill] sm:$0xff] %v12600_v59  ;;  %v12609_v49 = vld [vmem:[%s13694_s7 + $0x2c0] ss:$48 sps:$4 sm:$0xff]  }
 0x472   :  { %4530 = vmatpush1.bf16.msra.mxu1 %v12585_v3  ;;  %4490 = vmatprep.subr.bf16.mxu0 %v12591_v15  ;;  %13981 = vst [vmem:[#allocation70_spill] sm:$0xff] %v12609_v49  ;;  %v9776_v7 = vld [vmem:[%s13697_s8 + $0x8] ss:$16 sps:$4 sm:$0xff]  }
 0x473   :  { %4531 = vmatprep.subr.bf16.mxu1 %v12600_v59  ;;  %v12618_v15 = vld [vmem:[%s13694_s7 + $0x2c8] ss:$48 sps:$4 sm:$0xff]  }
 0x474   :  { %13982 = vst [vmem:[#allocation71_spill] sm:$0xff] %v12618_v15  ;;  %v9777_v59 = vld [vmem:[%s13697_s8 + $0x208] ss:$16 sps:$4 sm:$0xff]  }
 0x475   :  { %4491 = vmatpush1.bf16.msra.mxu0 %v12609_v49  ;;  %v9778_v49 = vld [vmem:[%s13697_s8 + $0x128] ss:$16 sps:$4 sm:$0xff]  }
 0x476   :  { %4532 = vmatpush1.bf16.msra.mxu1 %v12618_v15  ;;  %8855 = vmatprep.subr.bf16.mxu0 %v9774_v4  ;;  %v9779_v3 = vld [vmem:[%s13697_s8 + $0x328] ss:$16 sps:$4 sm:$0xff]  }
 0x477   :  { %8877 = vmatprep.subr.bf16.mxu1 %v9775_v21  ;;  %v9780_v4 = vld [vmem:[%s13697_s8 + $0x28] ss:$16 sps:$4 sm:$0xff]  }
 0x478   :  { %4509 = vmatmul.mubr.bf16.vlgmr.msra.gmra.mrb[72].mxu0 %v12201_v63  ;;  %v9781_v15 = vld [vmem:[%s13697_s8 + $0x228] ss:$16 sps:$4 sm:$0xff]  }
 0x479   :  { %4550 = vmatmul.mubr.bf16.vlgmr.msra.gmra.mrb[72].mxu1 %v12201_v63  ;;  %8856 = vmatpush3.bf16.msra.mxu0 %v9776_v7  ;;  %v9782_v21 = vld [vmem:[%s13697_s8 + $0x148] ss:$16 sps:$4 sm:$0xff]  }
 0x47a   :  { %8878 = vmatpush3.bf16.msra.mxu1 %v9777_v59  ;;  %8857 = vmatprep.subr.bf16.mxu0 %v9778_v49  ;;  %v9783_v63 = vld [vmem:[%s13697_s8 + $0x348] ss:$16 sps:$4 sm:$0xff]  }
 0x47b   :  { %8879 = vmatprep.subr.bf16.mxu1 %v9779_v3  ;;  %v9784_v7 = vld [vmem:[%s13697_s8 + $0x48] ss:$16 sps:$4 sm:$0xff]  }
 0x47c   :  { %v9785_v59 = vld [vmem:[%s13697_s8 + $0x248] ss:$16 sps:$4 sm:$0xff]  }
 0x47d   :  { %8858 = vmatpush3.bf16.msra.mxu0 %v9780_v4  ;;  %v9786_v49 = vld [vmem:[%s13697_s8 + $0x168] ss:$16 sps:$4 sm:$0xff]  }
 0x47e   :  { %8880 = vmatpush3.bf16.msra.mxu1 %v9781_v15  ;;  %8859 = vmatprep.subr.bf16.mxu0 %v9782_v21  ;;  %v9787_v3 = vld [vmem:[%s13697_s8 + $0x368] ss:$16 sps:$4 sm:$0xff]  }
 0x47f   :  { %8881 = vmatprep.subr.bf16.mxu1 %v9783_v63  ;;  %v9788_v4 = vld [vmem:[%s13697_s8 + $0x68] ss:$16 sps:$4 sm:$0xff]  }
 0x480   :  { %v9789_v15 = vld [vmem:[%s13697_s8 + $0x268] ss:$16 sps:$4 sm:$0xff]  }
 0x481   :  { %8860 = vmatpush3.bf16.msra.mxu0 %v9784_v7  ;;  %v9790_v21 = vld [vmem:[%s13697_s8 + $0x188] ss:$16 sps:$4 sm:$0xff]  }
 0x482   :  { %8882 = vmatpush3.bf16.msra.mxu1 %v9785_v59  ;;  %8861 = vmatprep.subr.bf16.mxu0 %v9786_v49  ;;  %v9791_v63 = vld [vmem:[%s13697_s8 + $0x388] ss:$16 sps:$4 sm:$0xff]  }
 0x483   :  { %8883 = vmatprep.subr.bf16.mxu1 %v9787_v3  ;;  %v9792_v7 = vld [vmem:[%s13697_s8 + $0x88] ss:$16 sps:$4 sm:$0xff]  }
 0x484   :  { %v9793_v59 = vld [vmem:[%s13697_s8 + $0x288] ss:$16 sps:$4 sm:$0xff]  }
 0x485   :  { %8862 = vmatpush3.bf16.msra.mxu0 %v9788_v4  ;;  %v9794_v49 = vld [vmem:[%s13697_s8 + $0x1a8] ss:$16 sps:$4 sm:$0xff]  }
 0x486   :  { %8884 = vmatpush3.bf16.msra.mxu1 %v9789_v15  ;;  %8863 = vmatprep.subr.bf16.mxu0 %v9790_v21  ;;  %v9795_v3 = vld [vmem:[%s13697_s8 + $0x3a8] ss:$16 sps:$4 sm:$0xff]  }
 0x487   :  { %8885 = vmatprep.subr.bf16.mxu1 %v9791_v63  ;;  %v9796_v4 = vld [vmem:[%s13697_s8 + $0xa8] ss:$16 sps:$4 sm:$0xff]  }
 0x488   :  { %v9797_v15 = vld [vmem:[%s13697_s8 + $0x2a8] ss:$16 sps:$4 sm:$0xff]  }
 0x489   :  { %8864 = vmatpush3.bf16.msra.mxu0 %v9792_v7  ;;  %v9798_v21 = vld [vmem:[%s13697_s8 + $0x1c8] ss:$16 sps:$4 sm:$0xff]  }
 0x48a   :  { %8886 = vmatpush3.bf16.msra.mxu1 %v9793_v59  ;;  %8865 = vmatprep.subr.bf16.mxu0 %v9794_v49  ;;  %v9799_v7 = vld [vmem:[%s13697_s8 + $0x3c8] ss:$16 sps:$4 sm:$0xff]  }
 0x48b   :  { %v8695_v63 = vpop.f32.mrb[48].mxu0  ;;  %v8717_v47 = vpop.f32.mrb[48].mxu1  ;;  %8887 = vmatprep.subr.bf16.mxu1 %v9795_v3  ;;  %v9801_v3 = vld [vmem:[%s13697_s8 + $0x2c8] ss:$16 sps:$4 sm:$0xff]  }
 0x48c   :  { %v8696_v12 = vpop.f32.mrb[49].mxu0  ;;  %v8718_v25 = vpop.f32.mrb[49].mxu1 }
 0x48d   :  { %v8697_v6 = vadd.f32 %v8696_v12, %v8695_v63  ;;  %v8719_v59 = vadd.f32 %v8718_v25, %v8717_v47  ;;  %v8698_v49 = vpop.f32.mrb[50].mxu0  ;;  %v8720_v58 = vpop.f32.mrb[50].mxu1  ;;  %8866 = vmatpush3.bf16.msra.mxu0 %v9796_v4  ;;  %v9802_v12 = vld [vmem:[%s13697_s8 + $0x1e8] ss:$16 sps:$4 sm:$0xff]  }
 0x48e   :  { %v8699_v39 = vpop.f32.mrb[51].mxu0  ;;  %v8721_v52 = vpop.f32.mrb[51].mxu1  ;;  %8888 = vmatpush3.bf16.msra.mxu1 %v9797_v15  ;;  %8867 = vmatprep.subr.bf16.mxu0 %v9798_v21  ;;  %v9803_v58 = vld [vmem:[%s13697_s8 + $0x3e8] ss:$16 sps:$4 sm:$0xff]  }
 0x48f   :  { %v3450_v25 = vadd.f32 %v8697_v6, %v12574_v57  ;;  %8889 = vmatprep.subr.bf16.mxu1 %v9799_v7  ;;  %v9804_v52 = vld [vmem:[%s13697_s8 + $0xe8] ss:$16 sps:$4 sm:$0xff]  }
 0x490   :  { %v9805_v39 = vld [vmem:[%s13697_s8 + $0x2e8] ss:$16 sps:$4 sm:$0xff]  }
 0x491   :  { %v3490_v47 = vadd.f32 %v8719_v59, %v3450_v25  ;;  %8868 = vmatpush3.bf16.msra.mxu0 %v9800_v42  ;;  %v9806_v6 = vld [vmem:[%s13697_s8 + $0x508] ss:$16 sps:$4 sm:$0xff]  }
 0x492   :  { %8890 = vmatpush3.bf16.msra.mxu1 %v9801_v3  ;;  %8869 = vmatprep.subr.bf16.mxu0 %v9802_v12  ;;  %v9807_v57 = vld [vmem:[%s13697_s8 + $0x708] ss:$16 sps:$4 sm:$0xff]  }
 0x493   :  { %8891 = vmatprep.subr.bf16.mxu1 %v9803_v58 }
 0x495   :  { %8870 = vmatpush3.bf16.msra.mxu0 %v9804_v52 }
 0x496   :  { %8892 = vmatpush3.bf16.msra.mxu1 %v9805_v39  ;;  %8899 = vmatprep.subr.bf16.mxu0 %v9806_v6 }
 0x497   :  { %8921 = vmatprep.subr.bf16.mxu1 %v9807_v57 }
 0x4ab   :  { %v8739_v42 = vpop.f32.mrb[52].mxu0  ;;  %v8761_v4 = vpop.f32.mrb[52].mxu1 }
 0x4ac   :  { %v8740_v15 = vpop.f32.mrb[53].mxu0  ;;  %v8762_v21 = vpop.f32.mrb[53].mxu1 }
 0x4ad   :  { %v8741_v63 = vadd.f32 %v8740_v15, %v8739_v42  ;;  %v8763_v7 = vadd.f32 %v8762_v21, %v8761_v4  ;;  %v8742_v59 = vpop.f32.mrb[54].mxu0  ;;  %v8764_v49 = vpop.f32.mrb[54].mxu1 }
 0x4ae   :  { %v8743_v3 = vpop.f32.mrb[55].mxu0  ;;  %v8765_v12 = vpop.f32.mrb[55].mxu1 }
 0x4af   :  { %v4106_v25 = vadd.f32 %v8741_v63, %v3490_v47 }
 0x4b1   :  { %v4146_v58 = vadd.f32 %v8763_v7, %v4106_v25 }
 0x4cb   :  { %v8783_v51 = vpop.f32.mrb[56].mxu0 }
 0x4cc   :  { %v8805_v9 = vpop.f32.mrb[56].mxu1  ;;  %v8784_v56 = vpop.f32.mrb[57].mxu0 }
 0x4cd   :  { %v8785_v55 = vadd.f32 %v8784_v56, %v8783_v51  ;;  %v8806_v52 = vpop.f32.mrb[57].mxu1  ;;  %v8786_v39 = vpop.f32.mrb[58].mxu0 }
 0x4ce   :  { %v8807_v6 = vadd.f32 %v8806_v52, %v8805_v9  ;;  %v8808_v57 = vpop.f32.mrb[58].mxu1  ;;  %v8787_v50 = vpop.f32.mrb[59].mxu0 }
 0x4cf   :  { %v4186_v60 = vadd.f32 %v8785_v55, %v4146_v58  ;;  %v8809_v20 = vpop.f32.mrb[59].mxu1 }
 0x4d1   :  { %v4226_v5 = vadd.f32 %v8807_v6, %v4186_v60 }
 0x4eb   :  { %v8827_v42 = vpop.f32.mrb[60].mxu0 }
 0x4ec   :  { %v8849_v4 = vpop.f32.mrb[60].mxu1  ;;  %v8828_v15 = vpop.f32.mrb[61].mxu0 }
 0x4ed   :  { %v8829_v21 = vadd.f32 %v8828_v15, %v8827_v42  ;;  %v8850_v59 = vpop.f32.mrb[61].mxu1  ;;  %v8830_v49 = vpop.f32.mrb[62].mxu0  ;;  %v9808_v42 = vld [vmem:[%s13697_s8 + $0x408] ss:$16 sps:$4 sm:$0xff]  }
 0x4ee   :  { %v8851_v47 = vadd.f32 %v8850_v59, %v8849_v4  ;;  %v8852_v63 = vpop.f32.mrb[62].mxu1  ;;  %v8831_v7 = vpop.f32.mrb[63].mxu0  ;;  %v9810_v59 = vld [vmem:[%s13697_s8 + $0x528] ss:$16 sps:$4 sm:$0xff]  }
 0x4ef   :  { %v4266_v3 = vadd.f32 %v8829_v21, %v4226_v5  ;;  %v8853_v12 = vpop.f32.mrb[63].mxu1  ;;  %v9809_v21 = vld [vmem:[%s13697_s8 + $0x608] ss:$16 sps:$4 sm:$0xff]  }
 0x4f0   :  { %v9812_v63 = vld [vmem:[%s13697_s8 + $0x428] ss:$16 sps:$4 sm:$0xff]  }
 0x4f1   :  { %v12717_v56 = vadd.f32 %v8851_v47, %v4266_v3  ;;  %v9811_v47 = vld [vmem:[%s13697_s8 + $0x728] ss:$16 sps:$4 sm:$0xff]  }
 0x4f2   :  { %v9813_v7 = vld [vmem:[%s13697_s8 + $0x628] ss:$16 sps:$4 sm:$0xff]  }
 0x4f3   :  { %v9814_v3 = vld [vmem:[%s13697_s8 + $0x548] ss:$16 sps:$4 sm:$0xff]  }
 0x4f4   :  { %v9815_v12 = vld [vmem:[%s13697_s8 + $0x748] ss:$16 sps:$4 sm:$0xff]  }
 0x50b   :  { %v4346_v51 = vpop.f32.mrb[64].mxu0 }
 0x50c   :  { %v4558_v9 = vmul.f32 %v4346_v51, %v11467_v35  ;;  %v4387_v50 = vpop.f32.mrb[64].mxu1  ;;  %v4348_v55 = vpop.f32.mrb[65].mxu0  ;;  %v9816_v51 = vld [vmem:[%s13697_s8 + $0x448] ss:$16 sps:$4 sm:$0xff]  }
 0x50d   :  { %v4560_v20 = vmul.f32 %v4387_v50, %v11470_v36  ;;  %v4559_v60 = vmul.f32 %v4348_v55, %v11473_v37  ;;  %v4389_v25 = vpop.f32.mrb[65].mxu1  ;;  %v4350_v58 = vpop.f32.mrb[66].mxu0  ;;  %v9818_v50 = vld [vmem:[%s13697_s8 + $0x568] ss:$16 sps:$4 sm:$0xff]  }
 0x50e   :  { %v4561_v52 = vmul.f32 %v4389_v25, %v11476_v38  ;;  %v4391_v39 = vpop.f32.mrb[66].mxu1  ;;  %v4351_v6 = vpop.f32.mrb[67].mxu0  ;;  %v4570_v4 = vpack.c.bf16 %v4558_v9, %v4558_v9  ;;  %v9817_v9 = vld [vmem:[%s13697_s8 + $0x648] ss:$16 sps:$4 sm:$0xff]  }
 0x50f   :  { %v4571_v57 = vpack.c.bf16 %v4559_v60, %v4559_v60  ;;  %v4392_v5 = vpop.f32.mrb[67].mxu1  ;;  %v4572_v49 = vpack.c.bf16 %v4560_v20, %v4560_v20  ;;  %v9819_v55 = vld [vmem:[%s13697_s8 + $0x768] ss:$16 sps:$4 sm:$0xff]  }
 0x510   :  { %v4573_v15 = vpack.c.bf16 %v4561_v52, %v4561_v52  ;;  %v9820_v20 = vld [vmem:[%s13697_s8 + $0x468] ss:$16 sps:$4 sm:$0xff]  }
 0x511   :  { %5382 = vmatprep.mubr.bf16.mxu0 %v4571_v57  ;;  %v9821_v60 = vld [vmem:[%s13697_s8 + $0x668] ss:$16 sps:$4 sm:$0xff]  }
 0x512   :  { %5422 = vmatprep.mubr.bf16.mxu1 %v4573_v15  ;;  %5383 = vmatmul.mubr.bf16.vlgmr.msra.gmra.mrb[76].mxu0 %v4570_v4  ;;  %v9822_v25 = vld [vmem:[%s13697_s8 + $0x588] ss:$16 sps:$4 sm:$0xff]  }
 0x513   :  { %5423 = vmatmul.mubr.bf16.vlgmr.msra.gmra.mrb[76].mxu1 %v4572_v49  ;;  %8900 = vmatpush3.bf16.msra.mxu0 %v9808_v42  ;;  %v9823_v58 = vld [vmem:[%s13697_s8 + $0x788] ss:$16 sps:$4 sm:$0xff]  }
 0x514   :  { %8922 = vmatpush3.bf16.msra.mxu1 %v9809_v21  ;;  %8901 = vmatprep.subr.bf16.mxu0 %v9810_v59  ;;  %v9824_v52 = vld [vmem:[%s13697_s8 + $0x488] ss:$16 sps:$4 sm:$0xff]  }
 0x515   :  { %8923 = vmatprep.subr.bf16.mxu1 %v9811_v47  ;;  %v9825_v39 = vld [vmem:[%s13697_s8 + $0x688] ss:$16 sps:$4 sm:$0xff]  }
 0x516   :  { %v9826_v6 = vld [vmem:[%s13697_s8 + $0x5a8] ss:$16 sps:$4 sm:$0xff]  }
 0x517   :  { %8902 = vmatpush3.bf16.msra.mxu0 %v9812_v63  ;;  %v9827_v57 = vld [vmem:[%s13697_s8 + $0x7a8] ss:$16 sps:$4 sm:$0xff]  }
 0x518   :  { %8924 = vmatpush3.bf16.msra.mxu1 %v9813_v7  ;;  %8903 = vmatprep.subr.bf16.mxu0 %v9814_v3  ;;  %v9828_v5 = vld [vmem:[%s13697_s8 + $0x4a8] ss:$16 sps:$4 sm:$0xff]  }
 0x519   :  { %8925 = vmatprep.subr.bf16.mxu1 %v9815_v12  ;;  %v9829_v42 = vld [vmem:[%s13697_s8 + $0x6a8] ss:$16 sps:$4 sm:$0xff]  }
 0x51a   :  { %v9830_v4 = vld [vmem:[%s13697_s8 + $0x5c8] ss:$16 sps:$4 sm:$0xff]  }
 0x51b   :  { %8904 = vmatpush3.bf16.msra.mxu0 %v9816_v51  ;;  %v9831_v15 = vld [vmem:[%s13697_s8 + $0x7c8] ss:$16 sps:$4 sm:$0xff]  }
 0x51c   :  { %8926 = vmatpush3.bf16.msra.mxu1 %v9817_v9  ;;  %8905 = vmatprep.subr.bf16.mxu0 %v9818_v50  ;;  %v9832_v21 = vld [vmem:[%s13697_s8 + $0x4c8] ss:$16 sps:$4 sm:$0xff]  }
 0x51d   :  { %8927 = vmatprep.subr.bf16.mxu1 %v9819_v55  ;;  %v9833_v59 = vld [vmem:[%s13697_s8 + $0x6c8] ss:$16 sps:$4 sm:$0xff]  }
 0x51e   :  { %v9834_v49 = vld [vmem:[%s13697_s8 + $0x5e8] ss:$16 sps:$4 sm:$0xff]  }
 0x51f   :  { %8906 = vmatpush3.bf16.msra.mxu0 %v9820_v20  ;;  %v9835_v47 = vld [vmem:[%s13697_s8 + $0x7e8] ss:$16 sps:$4 sm:$0xff]  }
 0x520   :  { %8928 = vmatpush3.bf16.msra.mxu1 %v9821_v60  ;;  %8907 = vmatprep.subr.bf16.mxu0 %v9822_v25  ;;  %v9836_v7 = vld [vmem:[%s13697_s8 + $0x4e8] ss:$16 sps:$4 sm:$0xff]  }
 0x521   :  { %8929 = vmatprep.subr.bf16.mxu1 %v9823_v58  ;;  %v9837_v9 = vld [vmem:[%s13697_s8 + $0x6e8] ss:$16 sps:$4 sm:$0xff]  }
 0x522   :  { %v9838_v50 = vld [vmem:[%s13697_s8 + $0x908] ss:$16 sps:$4 sm:$0xff]  }
 0x523   :  { %8908 = vmatpush3.bf16.msra.mxu0 %v9824_v52  ;;  %v9839_v58 = vld [vmem:[%s13697_s8 + $0xb08] ss:$16 sps:$4 sm:$0xff]  }
 0x524   :  { %8930 = vmatpush3.bf16.msra.mxu1 %v9825_v39  ;;  %8909 = vmatprep.subr.bf16.mxu0 %v9826_v6 }
 0x525   :  { %8931 = vmatprep.subr.bf16.mxu1 %v9827_v57 }
 0x527   :  { %8910 = vmatpush3.bf16.msra.mxu0 %v9828_v5 }
 0x528   :  { %8932 = vmatpush3.bf16.msra.mxu1 %v9829_v42  ;;  %8911 = vmatprep.subr.bf16.mxu0 %v9830_v4  ;;  %v9840_v42 = vld [vmem:[%s13697_s8 + $0x808] ss:$16 sps:$4 sm:$0xff]  }
 0x529   :  { %8933 = vmatprep.subr.bf16.mxu1 %v9831_v15 }
 0x52b   :  { %8912 = vmatpush3.bf16.msra.mxu0 %v9832_v21  ;;  %v4428_v63 = vpop.f32.mrb[68].mxu0  ;;  %v9841_v21 = vld [vmem:[%s13697_s8 + $0xa08] ss:$16 sps:$4 sm:$0xff]  }
 0x52c   :  { %8934 = vmatpush3.bf16.msra.mxu1 %v9833_v59  ;;  %v4562_v3 = vmul.f32 %v4428_v63, %v11589_v26  ;;  %v4469_v12 = vpop.f32.mrb[68].mxu1  ;;  %v4430_v51 = vpop.f32.mrb[69].mxu0  ;;  %8913 = vmatprep.subr.bf16.mxu0 %v9834_v49  ;;  %v9842_v59 = vld [vmem:[%s13697_s8 + $0x928] ss:$16 sps:$4 sm:$0xff]  }
 0x52d   :  { %v4564_v55 = vmul.f32 %v4469_v12, %v11592_v18  ;;  %v4563_v20 = vmul.f32 %v4430_v51, %v11598_v13  ;;  %v4471_v60 = vpop.f32.mrb[69].mxu1  ;;  %v4432_v25 = vpop.f32.mrb[70].mxu0  ;;  %8935 = vmatprep.subr.bf16.mxu1 %v9835_v47  ;;  %v9843_v47 = vld [vmem:[%s13697_s8 + $0xb28] ss:$16 sps:$4 sm:$0xff]  }
 0x52e   :  { %v4565_v52 = vmul.f32 %v4471_v60, %v11601_v14  ;;  %v4473_v39 = vpop.f32.mrb[70].mxu1  ;;  %v4433_v6 = vpop.f32.mrb[71].mxu0  ;;  %v4574_v4 = vpack.c.bf16 %v4562_v3, %v4562_v3  ;;  %v9844_v63 = vld [vmem:[%s13697_s8 + $0x828] ss:$16 sps:$4 sm:$0xff]  }
 0x52f   :  { %v4575_v57 = vpack.c.bf16 %v4563_v20, %v4563_v20  ;;  %v4474_v5 = vpop.f32.mrb[71].mxu1  ;;  %8914 = vmatpush3.bf16.msra.mxu0 %v9836_v7  ;;  %v4576_v49 = vpack.c.bf16 %v4564_v55, %v4564_v55  ;;  %v9845_v7 = vld [vmem:[%s13697_s8 + $0xa28] ss:$16 sps:$4 sm:$0xff]  }
 0x530   :  { %v4577_v15 = vpack.c.bf16 %v4565_v52, %v4565_v52  ;;  %8936 = vmatpush3.bf16.msra.mxu1 %v9837_v9  ;;  %8943 = vmatprep.subr.bf16.mxu0 %v9838_v50  ;;  %v9846_v3 = vld [vmem:[%s13697_s8 + $0x948] ss:$16 sps:$4 sm:$0xff]  }
 0x531   :  { %5462 = vmatprep.mubr.bf16.mxu0 %v4575_v57  ;;  %8965 = vmatprep.subr.bf16.mxu1 %v9839_v58  ;;  %v9847_v12 = vld [vmem:[%s13697_s8 + $0xb48] ss:$16 sps:$4 sm:$0xff]  }
 0x532   :  { %5502 = vmatprep.mubr.bf16.mxu1 %v4577_v15  ;;  %5463 = vmatmul.mubr.bf16.vlgmr.msra.gmra.mrb[80].mxu0 %v4574_v4  ;;  %v9848_v51 = vld [vmem:[%s13697_s8 + $0x848] ss:$16 sps:$4 sm:$0xff]  }
 0x533   :  { %5503 = vmatmul.mubr.bf16.vlgmr.msra.gmra.mrb[80].mxu1 %v4576_v49  ;;  %8944 = vmatpush3.bf16.msra.mxu0 %v9840_v42  ;;  %v9849_v9 = vld [vmem:[%s13697_s8 + $0xa48] ss:$16 sps:$4 sm:$0xff]  }
 0x534   :  { %8966 = vmatpush3.bf16.msra.mxu1 %v9841_v21  ;;  %8945 = vmatprep.subr.bf16.mxu0 %v9842_v59  ;;  %v9850_v50 = vld [vmem:[%s13697_s8 + $0x968] ss:$16 sps:$4 sm:$0xff]  }
 0x535   :  { %8967 = vmatprep.subr.bf16.mxu1 %v9843_v47  ;;  %v9851_v55 = vld [vmem:[%s13697_s8 + $0xb68] ss:$16 sps:$4 sm:$0xff]  }
 0x536   :  { %v9852_v20 = vld [vmem:[%s13697_s8 + $0x868] ss:$16 sps:$4 sm:$0xff]  }
 0x537   :  { %8946 = vmatpush3.bf16.msra.mxu0 %v9844_v63  ;;  %v9853_v60 = vld [vmem:[%s13697_s8 + $0xa68] ss:$16 sps:$4 sm:$0xff]  }
 0x538   :  { %8968 = vmatpush3.bf16.msra.mxu1 %v9845_v7  ;;  %8947 = vmatprep.subr.bf16.mxu0 %v9846_v3  ;;  %v9854_v25 = vld [vmem:[%s13697_s8 + $0x988] ss:$16 sps:$4 sm:$0xff]  }
 0x539   :  { %8969 = vmatprep.subr.bf16.mxu1 %v9847_v12  ;;  %v9855_v58 = vld [vmem:[%s13697_s8 + $0xb88] ss:$16 sps:$4 sm:$0xff]  }
 0x53a   :  { %v9856_v52 = vld [vmem:[%s13697_s8 + $0x888] ss:$16 sps:$4 sm:$0xff]  }
 0x53b   :  { %8948 = vmatpush3.bf16.msra.mxu0 %v9848_v51  ;;  %v9857_v39 = vld [vmem:[%s13697_s8 + $0xa88] ss:$16 sps:$4 sm:$0xff]  }
 0x53c   :  { %8970 = vmatpush3.bf16.msra.mxu1 %v9849_v9  ;;  %8949 = vmatprep.subr.bf16.mxu0 %v9850_v50  ;;  %v9858_v6 = vld [vmem:[%s13697_s8 + $0x9a8] ss:$16 sps:$4 sm:$0xff]  }
 0x53d   :  { %8971 = vmatprep.subr.bf16.mxu1 %v9851_v55  ;;  %v9859_v57 = vld [vmem:[%s13697_s8 + $0xba8] ss:$16 sps:$4 sm:$0xff]  }
 0x53e   :  { %v9860_v5 = vld [vmem:[%s13697_s8 + $0x8a8] ss:$16 sps:$4 sm:$0xff]  }
 0x53f   :  { %8950 = vmatpush3.bf16.msra.mxu0 %v9852_v20  ;;  %v9861_v42 = vld [vmem:[%s13697_s8 + $0xaa8] ss:$16 sps:$4 sm:$0xff]  }
 0x540   :  { %8972 = vmatpush3.bf16.msra.mxu1 %v9853_v60  ;;  %8951 = vmatprep.subr.bf16.mxu0 %v9854_v25  ;;  %v9862_v4 = vld [vmem:[%s13697_s8 + $0x9c8] ss:$16 sps:$4 sm:$0xff]  }
 0x541   :  { %8973 = vmatprep.subr.bf16.mxu1 %v9855_v58  ;;  %v9863_v15 = vld [vmem:[%s13697_s8 + $0xbc8] ss:$16 sps:$4 sm:$0xff]  }
 0x542   :  { %v9864_v21 = vld [vmem:[%s13697_s8 + $0x8c8] ss:$16 sps:$4 sm:$0xff]  }
 0x543   :  { %8952 = vmatpush3.bf16.msra.mxu0 %v9856_v52  ;;  %v9865_v59 = vld [vmem:[%s13697_s8 + $0xac8] ss:$16 sps:$4 sm:$0xff]  }
 0x544   :  { %8974 = vmatpush3.bf16.msra.mxu1 %v9857_v39  ;;  %8953 = vmatprep.subr.bf16.mxu0 %v9858_v6  ;;  %v9866_v49 = vld [vmem:[%s13697_s8 + $0x9e8] ss:$16 sps:$4 sm:$0xff]  }
 0x545   :  { %8975 = vmatprep.subr.bf16.mxu1 %v9859_v57  ;;  %v9867_v47 = vld [vmem:[%s13697_s8 + $0xbe8] ss:$16 sps:$4 sm:$0xff]  }
 0x546   :  { %v9868_v7 = vld [vmem:[%s13697_s8 + $0x8e8] ss:$16 sps:$4 sm:$0xff]  }
 0x547   :  { %8954 = vmatpush3.bf16.msra.mxu0 %v9860_v5  ;;  %v9869_v9 = vld [vmem:[%s13697_s8 + $0xae8] ss:$16 sps:$4 sm:$0xff]  }
 0x548   :  { %8976 = vmatpush3.bf16.msra.mxu1 %v9861_v42  ;;  %8955 = vmatprep.subr.bf16.mxu0 %v9862_v4  ;;  %v14007_v4 = vld [vmem:[#allocation28_spill] sm:$0xff] }
 0x549   :  { %8977 = vmatprep.subr.bf16.mxu1 %v9863_v15  ;;  %v14008_v15 = vld [vmem:[#allocation29_spill] sm:$0xff] }
 0x54b   :  { %8956 = vmatpush3.bf16.msra.mxu0 %v9864_v21  ;;  %v4510_v63 = vpop.f32.mrb[72].mxu0  ;;  %v14009_v21 = vld [vmem:[#allocation30_spill] sm:$0xff] }
 0x54c   :  { %8978 = vmatpush3.bf16.msra.mxu1 %v9865_v59  ;;  %v4566_v3 = vmul.f32 %v4510_v63, %v11396_v40  ;;  %v4551_v12 = vpop.f32.mrb[72].mxu1  ;;  %v4512_v51 = vpop.f32.mrb[73].mxu0  ;;  %8957 = vmatprep.subr.bf16.mxu0 %v9866_v49  ;;  %v14010_v59 = vld [vmem:[#allocation31_spill] sm:$0xff]  ;;  %v14011_v49 = vld [vmem:[#allocation32_spill] sm:$0xff]  ;;  %v14013_v63 = vld [vmem:[#allocation34_spill] sm:$0xff] }
 0x54d   :  { %v4568_v50 = vmul.f32 %v4551_v12, %v11399_v41  ;;  %v4567_v55 = vmul.f32 %v4512_v51, %v11405_v45  ;;  %v4553_v20 = vpop.f32.mrb[73].mxu1  ;;  %v4514_v60 = vpop.f32.mrb[74].mxu0  ;;  %8979 = vmatprep.subr.bf16.mxu1 %v9867_v47  ;;  %v14012_v47 = vld [vmem:[#allocation33_spill] sm:$0xff]  ;;  %v14017_v51 = vld [vmem:[#allocation38_spill] sm:$0xff] }
 0x54e   :  { %v4569_v25 = vmul.f32 %v4553_v20, %v11408_v46  ;;  %v4555_v58 = vpop.f32.mrb[74].mxu1  ;;  %v4515_v52 = vpop.f32.mrb[75].mxu0  ;;  %v4578_v57 = vpack.c.bf16 %v4566_v3, %v4566_v3  ;;  %v14015_v3 = vld [vmem:[#allocation36_spill] sm:$0xff]  ;;  %v14016_v12 = vld [vmem:[#allocation37_spill] sm:$0xff]  ;;  %v14021_v20 = vld [vmem:[#allocation19_spill] sm:$0xff] }
 0x54f   :  { %v4579_v39 = vpack.c.bf16 %v4567_v55, %v4567_v55  ;;  %v4556_v6 = vpop.f32.mrb[75].mxu1  ;;  %8958 = vmatpush3.bf16.msra.mxu0 %v9868_v7  ;;  %v4580_v42 = vpack.c.bf16 %v4568_v50, %v4568_v50  ;;  %v14014_v7 = vld [vmem:[#allocation35_spill] sm:$0xff]  ;;  %v14019_v50 = vld [vmem:[#allocation40_spill] sm:$0xff]  ;;  %v14020_v55 = vld [vmem:[#allocation26_spill] sm:$0xff] }
 0x550   :  { %v4581_v5 = vpack.c.bf16 %v4569_v25, %v4569_v25  ;;  %8980 = vmatpush3.bf16.msra.mxu1 %v9869_v9  ;;  %5592 = vmatprep.subr.bf16.mxu0 %v12019_v16  ;;  %v13983_v16 = vld [vmem:[#allocation2_spill] sm:$0xff]  ;;  %v14018_v9 = vld [vmem:[#allocation39_spill] sm:$0xff]  ;;  %v14022_v60 = vld [vmem:[#allocation41_spill] sm:$0xff] }
 0x551   :  { %5542 = vmatprep.mubr.bf16.mxu0 %v4579_v39  ;;  %5633 = vmatprep.subr.bf16.mxu1 %v12025_v62  ;;  %v60_v62 = vld [vmem:[%s13691_s0 + $0x18] sm:$0xff]  ;;  %v14023_v25 = vld [vmem:[#allocation42_spill] sm:$0xff]  ;;  %v14024_v58 = vld [vmem:[#allocation43_spill] sm:$0xff] }
 0x552   :  { %5582 = vmatprep.mubr.bf16.mxu1 %v4581_v5  ;;  %5543 = vmatmul.mubr.bf16.vlgmr.msra.gmra.mrb[84].mxu0 %v4578_v57  ;;  %v14025_v52 = vld [vmem:[#allocation44_spill] sm:$0xff]  ;;  %v14026_v39 = vld [vmem:[#allocation45_spill] sm:$0xff]  ;;  %v14027_v6 = vld [vmem:[#allocation46_spill] sm:$0xff] }
 0x553   :  { %5583 = vmatmul.mubr.bf16.vlgmr.msra.gmra.mrb[84].mxu1 %v4580_v42  ;;  %5593 = vmatpush1.bf16.msra.mxu0 %v12031_v0  ;;  %v13984_v0 = vld [vmem:[#allocation3_spill] sm:$0xff]  ;;  %v14029_v5 = vld [vmem:[#allocation48_spill] sm:$0xff]  ;;  %v14030_v42 = vld [vmem:[#allocation49_spill] sm:$0xff] }
 0x554   :  { %5634 = vmatpush1.bf16.msra.mxu1 %v12037_v22  ;;  %5594 = vmatprep.subr.bf16.mxu0 %v12043_v23  ;;  %v13985_v22 = vld [vmem:[#allocation4_spill] sm:$0xff]  ;;  %v13986_v23 = vld [vmem:[#allocation5_spill] sm:$0xff]  ;;  %v14028_v57 = vld [vmem:[#allocation47_spill] sm:$0xff] }
 0x555   :  { %5635 = vmatprep.subr.bf16.mxu1 %v12049_v24  ;;  %5624 = vmatprep.mubr.bf16.mxu0 %v13855_v1  ;;  %v12952_v24 = vpack.c.bf16 %v60_v62, %v60_v62  ;;  %v14032_v62 = vld [vmem:[#allocation51_spill] sm:$0xff] }
 0x556   :  { %5665 = vmatprep.mubr.bf16.mxu1 %v13855_v1 }
 0x557   :  { %5595 = vmatpush1.bf16.msra.mxu0 %v12057_v27  ;;  %v13987_v27 = vld [vmem:[#allocation6_spill] sm:$0xff] }
 0x558   :  { %5636 = vmatpush1.bf16.msra.mxu1 %v12063_v28  ;;  %5596 = vmatprep.subr.bf16.mxu0 %v12069_v29  ;;  %v13988_v28 = vld [vmem:[#allocation7_spill] sm:$0xff]  ;;  %v13989_v29 = vld [vmem:[#allocation8_spill] sm:$0xff] }
 0x559   :  { %5637 = vmatprep.subr.bf16.mxu1 %v12075_v30  ;;  %v13990_v30 = vld [vmem:[#allocation9_spill] sm:$0xff] }
 0x55b   :  { %5597 = vmatpush1.bf16.msra.mxu0 %v12081_v31  ;;  %v13991_v31 = vld [vmem:[#allocation10_spill] sm:$0xff] }
 0x55c   :  { %5638 = vmatpush1.bf16.msra.mxu1 %v12087_v32  ;;  %5598 = vmatprep.subr.bf16.mxu0 %v12093_v33  ;;  %v13992_v32 = vld [vmem:[#allocation11_spill] sm:$0xff]  ;;  %v13993_v33 = vld [vmem:[#allocation12_spill] sm:$0xff] }
 0x55d   :  { %5639 = vmatprep.subr.bf16.mxu1 %v12099_v34  ;;  %v13994_v34 = vld [vmem:[#allocation13_spill] sm:$0xff] }
 0x55f   :  { %5599 = vmatpush1.bf16.msra.mxu0 %v12105_v17  ;;  %v13995_v17 = vld [vmem:[#allocation14_spill] sm:$0xff] }
 0x560   :  { %5640 = vmatpush1.bf16.msra.mxu1 %v12111_v2  ;;  %5600 = vmatprep.subr.bf16.mxu0 %v12117_v43  ;;  %v13996_v2 = vld [vmem:[#allocation15_spill] sm:$0xff]  ;;  %v13997_v43 = vld [vmem:[#allocation16_spill] sm:$0xff] }
 0x561   :  { %5641 = vmatprep.subr.bf16.mxu1 %v12123_v44  ;;  %v13998_v44 = vld [vmem:[#allocation17_spill] sm:$0xff] }
 0x563   :  { %5601 = vmatpush1.bf16.msra.mxu0 %v12129_v8  ;;  %v13999_v8 = vld [vmem:[#allocation18_spill] sm:$0xff] }
 0x564   :  { %5642 = vmatpush1.bf16.msra.mxu1 %v12135_v48  ;;  %5602 = vmatprep.subr.bf16.mxu0 %v12141_v19  ;;  %v14000_v48 = vld [vmem:[#allocation20_spill] sm:$0xff]  ;;  %v14001_v19 = vld [vmem:[#allocation21_spill] sm:$0xff] }
 0x565   :  { %5643 = vmatprep.subr.bf16.mxu1 %v12147_v11  ;;  %v14002_v11 = vld [vmem:[#allocation22_spill] sm:$0xff] }
 0x567   :  { %5603 = vmatpush1.bf16.msra.mxu0 %v12153_v61  ;;  %v14003_v61 = vld [vmem:[#allocation23_spill] sm:$0xff] }
 0x568   :  { %5644 = vmatpush1.bf16.msra.mxu1 %v12159_v10  ;;  %5604 = vmatprep.subr.bf16.mxu0 %v12165_v53  ;;  %v14004_v10 = vld [vmem:[#allocation24_spill] sm:$0xff]  ;;  %v14005_v53 = vld [vmem:[#allocation25_spill] sm:$0xff] }
 0x569   :  { %5645 = vmatprep.subr.bf16.mxu1 %v12171_v54  ;;  %v14006_v54 = vld [vmem:[#allocation27_spill] sm:$0xff] }
 0x56b   :  { %5605 = vmatpush1.bf16.msra.mxu0 %v13983_v16  ;;  %v14031_v16 = vld [vmem:[#allocation50_spill] sm:$0xff] }
 0x56c   :  { %5646 = vmatpush1.bf16.msra.mxu1 %v13984_v0  ;;  %5606 = vmatprep.subr.bf16.mxu0 %v13985_v22  ;;  %v14033_v0 = vld [vmem:[#allocation52_spill] sm:$0xff]  ;;  %v14034_v22 = vld [vmem:[#allocation53_spill] sm:$0xff] }
 0x56d   :  { %5647 = vmatprep.subr.bf16.mxu1 %v13986_v23  ;;  %v14035_v23 = vld [vmem:[#allocation54_spill] sm:$0xff] }
 0x56f   :  { %5607 = vmatpush1.bf16.msra.mxu0 %v13987_v27  ;;  %v14036_v27 = vld [vmem:[#allocation55_spill] sm:$0xff] }
 0x570   :  { %5648 = vmatpush1.bf16.msra.mxu1 %v13988_v28  ;;  %5674 = vmatprep.subr.bf16.mxu0 %v13989_v29  ;;  %v14037_v28 = vld [vmem:[#allocation56_spill] sm:$0xff]  ;;  %v14038_v29 = vld [vmem:[#allocation57_spill] sm:$0xff] }
 0x571   :  { %5715 = vmatprep.subr.bf16.mxu1 %v13990_v30  ;;  %v14039_v30 = vld [vmem:[#allocation58_spill] sm:$0xff] }
 0x572   :  { %5625 = vmatmul.mubr.bf16.vlgmr.msra.gmra.mrb[88].mxu0 %v12952_v24 }
 0x573   :  { %5666 = vmatmul.mubr.bf16.vlgmr.msra.gmra.mrb[88].mxu1 %v12952_v24  ;;  %5675 = vmatpush1.bf16.msra.mxu0 %v13991_v31  ;;  %v14040_v31 = vld [vmem:[#allocation59_spill] sm:$0xff] }
 0x574   :  { %5716 = vmatpush1.bf16.msra.mxu1 %v13992_v32  ;;  %5676 = vmatprep.subr.bf16.mxu0 %v13993_v33  ;;  %v14041_v32 = vld [vmem:[#allocation60_spill] sm:$0xff]  ;;  %v14042_v33 = vld [vmem:[#allocation61_spill] sm:$0xff] }
 0x575   :  { %5717 = vmatprep.subr.bf16.mxu1 %v13994_v34  ;;  %5706 = vmatprep.mubr.bf16.mxu0 %v13855_v1  ;;  %v14043_v34 = vld [vmem:[#allocation62_spill] sm:$0xff] }
 0x576   :  { %5747 = vmatprep.mubr.bf16.mxu1 %v13855_v1 }
 0x577   :  { %5677 = vmatpush1.bf16.msra.mxu0 %v13995_v17  ;;  %v14044_v17 = vld [vmem:[#allocation63_spill] sm:$0xff] }
 0x578   :  { %5718 = vmatpush1.bf16.msra.mxu1 %v13996_v2  ;;  %5678 = vmatprep.subr.bf16.mxu0 %v13997_v43  ;;  %v14045_v2 = vld [vmem:[#allocation64_spill] sm:$0xff]  ;;  %v14046_v43 = vld [vmem:[#allocation65_spill] sm:$0xff] }
 0x579   :  { %5719 = vmatprep.subr.bf16.mxu1 %v13998_v44  ;;  %v14047_v44 = vld [vmem:[#allocation66_spill] sm:$0xff] }
 0x57b   :  { %5679 = vmatpush1.bf16.msra.mxu0 %v13999_v8  ;;  %v14048_v8 = vld [vmem:[#allocation67_spill] sm:$0xff] }
 0x57c   :  { %5720 = vmatpush1.bf16.msra.mxu1 %v14000_v48  ;;  %5680 = vmatprep.subr.bf16.mxu0 %v14001_v19  ;;  %v14049_v48 = vld [vmem:[#allocation68_spill] sm:$0xff]  ;;  %v9870_v19 = vld [vmem:[%s13697_s8 + $0x10c] ss:$16 sps:$4 sm:$0xff]  }
 0x57d   :  { %5721 = vmatprep.subr.bf16.mxu1 %v14002_v11  ;;  %v14050_v11 = vld [vmem:[#allocation69_spill] sm:$0xff] }
 0x57f   :  { %5681 = vmatpush1.bf16.msra.mxu0 %v14003_v61  ;;  %v9871_v61 = vld [vmem:[%s13697_s8 + $0x30c] ss:$16 sps:$4 sm:$0xff]  }
 0x580   :  { %5722 = vmatpush1.bf16.msra.mxu1 %v14004_v10  ;;  %5682 = vmatprep.subr.bf16.mxu0 %v14005_v53  ;;  %v14051_v10 = vld [vmem:[#allocation70_spill] sm:$0xff]  ;;  %v9872_v53 = vld [vmem:[%s13697_s8 + $0xc] ss:$16 sps:$4 sm:$0xff]  }
 0x581   :  { %5723 = vmatprep.subr.bf16.mxu1 %v14006_v54  ;;  %v14052_v54 = vld [vmem:[#allocation71_spill] sm:$0xff] }
 0x583   :  { %5683 = vmatpush1.bf16.msra.mxu0 %v14007_v4  ;;  %v9873_v4 = vld [vmem:[%s13697_s8 + $0x20c] ss:$16 sps:$4 sm:$0xff]  }
 0x584   :  { %5724 = vmatpush1.bf16.msra.mxu1 %v14008_v15  ;;  %5684 = vmatprep.subr.bf16.mxu0 %v14009_v21  ;;  %v9874_v15 = vld [vmem:[%s13697_s8 + $0x12c] ss:$16 sps:$4 sm:$0xff]  }
 0x585   :  { %5725 = vmatprep.subr.bf16.mxu1 %v14010_v59  ;;  %v9875_v21 = vld [vmem:[%s13697_s8 + $0x32c] ss:$16 sps:$4 sm:$0xff]  }
 0x586   :  { %v9876_v59 = vld [vmem:[%s13697_s8 + $0x2c] ss:$16 sps:$4 sm:$0xff]  }
 0x587   :  { %5685 = vmatpush1.bf16.msra.mxu0 %v14011_v49  ;;  %v9877_v49 = vld [vmem:[%s13697_s8 + $0x22c] ss:$16 sps:$4 sm:$0xff]  }
 0x588   :  { %5726 = vmatpush1.bf16.msra.mxu1 %v14012_v47  ;;  %5686 = vmatprep.subr.bf16.mxu0 %v14013_v63  ;;  %v9878_v47 = vld [vmem:[%s13697_s8 + $0x14c] ss:$16 sps:$4 sm:$0xff]  }
 0x589   :  { %5727 = vmatprep.subr.bf16.mxu1 %v14014_v7  ;;  %v9880_v63 = vld [vmem:[%s13697_s8 + $0x4c] ss:$16 sps:$4 sm:$0xff]  }
 0x58a   :  { %v9881_v7 = vld [vmem:[%s13697_s8 + $0x24c] ss:$16 sps:$4 sm:$0xff]  }
 0x58b   :  { %5687 = vmatpush1.bf16.msra.mxu0 %v14015_v3  ;;  %v9882_v3 = vld [vmem:[%s13697_s8 + $0x16c] ss:$16 sps:$4 sm:$0xff]  }
 0x58c   :  { %5728 = vmatpush1.bf16.msra.mxu1 %v14016_v12  ;;  %5688 = vmatprep.subr.bf16.mxu0 %v14017_v51  ;;  %v9883_v12 = vld [vmem:[%s13697_s8 + $0x36c] ss:$16 sps:$4 sm:$0xff]  }
 0x58d   :  { %5729 = vmatprep.subr.bf16.mxu1 %v14018_v9  ;;  %v9884_v51 = vld [vmem:[%s13697_s8 + $0x6c] ss:$16 sps:$4 sm:$0xff]  }
 0x58e   :  { %v9885_v9 = vld [vmem:[%s13697_s8 + $0x26c] ss:$16 sps:$4 sm:$0xff]  }
 0x58f   :  { %5689 = vmatpush1.bf16.msra.mxu0 %v14019_v50  ;;  %v9886_v50 = vld [vmem:[%s13697_s8 + $0x18c] ss:$16 sps:$4 sm:$0xff]  }
 0x590   :  { %5730 = vmatpush1.bf16.msra.mxu1 %v14020_v55  ;;  %5756 = vmatprep.subr.bf16.mxu0 %v14021_v20  ;;  %v9887_v55 = vld [vmem:[%s13697_s8 + $0x38c] ss:$16 sps:$4 sm:$0xff]  }
 0x591   :  { %5797 = vmatprep.subr.bf16.mxu1 %v14022_v60  ;;  %v9888_v20 = vld [vmem:[%s13697_s8 + $0x8c] ss:$16 sps:$4 sm:$0xff]  }
 0x592   :  { %5707 = vmatmul.mubr.bf16.vlgmr.msra.gmra.mrb[92].mxu0 %v12952_v24  ;;  %v9889_v60 = vld [vmem:[%s13697_s8 + $0x28c] ss:$16 sps:$4 sm:$0xff]  }
 0x593   :  { %5748 = vmatmul.mubr.bf16.vlgmr.msra.gmra.mrb[92].mxu1 %v12952_v24  ;;  %5757 = vmatpush1.bf16.msra.mxu0 %v14023_v25  ;;  %v9890_v25 = vld [vmem:[%s13697_s8 + $0x1ac] ss:$16 sps:$4 sm:$0xff]  }
 0x594   :  { %5798 = vmatpush1.bf16.msra.mxu1 %v14024_v58  ;;  %5758 = vmatprep.subr.bf16.mxu0 %v14025_v52  ;;  %v9891_v58 = vld [vmem:[%s13697_s8 + $0x3ac] ss:$16 sps:$4 sm:$0xff]  }
 0x595   :  { %5799 = vmatprep.subr.bf16.mxu1 %v14026_v39  ;;  %5788 = vmatprep.mubr.bf16.mxu0 %v13855_v1  ;;  %v9892_v52 = vld [vmem:[%s13697_s8 + $0xac] ss:$16 sps:$4 sm:$0xff]  }
 0x596   :  { %5829 = vmatprep.mubr.bf16.mxu1 %v13855_v1  ;;  %v9893_v39 = vld [vmem:[%s13697_s8 + $0x2ac] ss:$16 sps:$4 sm:$0xff]  }
 0x597   :  { %5759 = vmatpush1.bf16.msra.mxu0 %v14027_v6  ;;  %v9894_v6 = vld [vmem:[%s13697_s8 + $0x1cc] ss:$16 sps:$4 sm:$0xff]  }
 0x598   :  { %5800 = vmatpush1.bf16.msra.mxu1 %v14028_v57  ;;  %5760 = vmatprep.subr.bf16.mxu0 %v14029_v5  ;;  %v9895_v57 = vld [vmem:[%s13697_s8 + $0x3cc] ss:$16 sps:$4 sm:$0xff]  }
 0x599   :  { %5801 = vmatprep.subr.bf16.mxu1 %v14030_v42  ;;  %v9896_v5 = vld [vmem:[%s13697_s8 + $0xcc] ss:$16 sps:$4 sm:$0xff]  }
 0x59a   :  { %v9897_v42 = vld [vmem:[%s13697_s8 + $0x2cc] ss:$16 sps:$4 sm:$0xff]  }
 0x59b   :  { %5761 = vmatpush1.bf16.msra.mxu0 %v14031_v16  ;;  %v9898_v16 = vld [vmem:[%s13697_s8 + $0x1ec] ss:$16 sps:$4 sm:$0xff]  }
 0x59c   :  { %5802 = vmatpush1.bf16.msra.mxu1 %v14032_v62  ;;  %5762 = vmatprep.subr.bf16.mxu0 %v14033_v0  ;;  %v9899_v62 = vld [vmem:[%s13697_s8 + $0x3ec] ss:$16 sps:$4 sm:$0xff]  }
 0x59d   :  { %5803 = vmatprep.subr.bf16.mxu1 %v14034_v22  ;;  %v9900_v0 = vld [vmem:[%s13697_s8 + $0xec] ss:$16 sps:$4 sm:$0xff]  }
 0x59e   :  { %v9901_v22 = vld [vmem:[%s13697_s8 + $0x2ec] ss:$16 sps:$4 sm:$0xff]  }
 0x59f   :  { %5763 = vmatpush1.bf16.msra.mxu0 %v14035_v23  ;;  %v9902_v23 = vld [vmem:[%s13697_s8 + $0x50c] ss:$16 sps:$4 sm:$0xff]  }
 0x5a0   :  { %5804 = vmatpush1.bf16.msra.mxu1 %v14036_v27  ;;  %5764 = vmatprep.subr.bf16.mxu0 %v14037_v28  ;;  %v9903_v27 = vld [vmem:[%s13697_s8 + $0x70c] ss:$16 sps:$4 sm:$0xff]  }
 0x5a1   :  { %5805 = vmatprep.subr.bf16.mxu1 %v14038_v29 }
 0x5a3   :  { %5765 = vmatpush1.bf16.msra.mxu0 %v14039_v30 }
 0x5a4   :  { %5806 = vmatpush1.bf16.msra.mxu1 %v14040_v31  ;;  %5766 = vmatprep.subr.bf16.mxu0 %v14041_v32 }
 0x5a5   :  { %5807 = vmatprep.subr.bf16.mxu1 %v14042_v33 }
 0x5a7   :  { %5767 = vmatpush1.bf16.msra.mxu0 %v14043_v34 }
 0x5a8   :  { %5808 = vmatpush1.bf16.msra.mxu1 %v14044_v17  ;;  %5768 = vmatprep.subr.bf16.mxu0 %v14045_v2 }
 0x5a9   :  { %5809 = vmatprep.subr.bf16.mxu1 %v14046_v43 }
 0x5ab   :  { %5769 = vmatpush1.bf16.msra.mxu0 %v14047_v44 }
 0x5ac   :  { %5810 = vmatpush1.bf16.msra.mxu1 %v14048_v8  ;;  %5770 = vmatprep.subr.bf16.mxu0 %v14049_v48 }
 0x5ad   :  { %5811 = vmatprep.subr.bf16.mxu1 %v14050_v11 }
 0x5af   :  { %5771 = vmatpush1.bf16.msra.mxu0 %v14051_v10 }
 0x5b0   :  { %5812 = vmatpush1.bf16.msra.mxu1 %v14052_v54  ;;  %8987 = vmatprep.subr.bf16.mxu0 %v9870_v19 }
 0x5b1   :  { %9009 = vmatprep.subr.bf16.mxu1 %v9871_v61 }
 0x5b2   :  { %5789 = vmatmul.mubr.bf16.vlgmr.msra.gmra.mrb[96].mxu0 %v12952_v24 }
 0x5b3   :  { %5830 = vmatmul.mubr.bf16.vlgmr.msra.gmra.mrb[96].mxu1 %v12952_v24  ;;  %8988 = vmatpush3.bf16.msra.mxu0 %v9872_v53  ;;  %v9879_v24 = vld [vmem:[%s13697_s8 + $0x34c] ss:$16 sps:$4 sm:$0xff]  }
 0x5b4   :  { %9010 = vmatpush3.bf16.msra.mxu1 %v9873_v4  ;;  %8989 = vmatprep.subr.bf16.mxu0 %v9874_v15 }
 0x5b5   :  { %9011 = vmatprep.subr.bf16.mxu1 %v9875_v21 }
 0x5b7   :  { %8990 = vmatpush3.bf16.msra.mxu0 %v9876_v59 }
 0x5b8   :  { %9012 = vmatpush3.bf16.msra.mxu1 %v9877_v49  ;;  %8991 = vmatprep.subr.bf16.mxu0 %v9878_v47 }
 0x5b9   :  { %9013 = vmatprep.subr.bf16.mxu1 %v9879_v24 }
 0x5bb   :  { %8992 = vmatpush3.bf16.msra.mxu0 %v9880_v63 }
 0x5bc   :  { %9014 = vmatpush3.bf16.msra.mxu1 %v9881_v7  ;;  %8993 = vmatprep.subr.bf16.mxu0 %v9882_v3 }
 0x5bd   :  { %9015 = vmatprep.subr.bf16.mxu1 %v9883_v12 }
 0x5bf   :  { %8994 = vmatpush3.bf16.msra.mxu0 %v9884_v51 }
 0x5c0   :  { %9016 = vmatpush3.bf16.msra.mxu1 %v9885_v9  ;;  %8995 = vmatprep.subr.bf16.mxu0 %v9886_v50 }
 0x5c1   :  { %9017 = vmatprep.subr.bf16.mxu1 %v9887_v55 }
 0x5c3   :  { %8996 = vmatpush3.bf16.msra.mxu0 %v9888_v20 }
 0x5c4   :  { %9018 = vmatpush3.bf16.msra.mxu1 %v9889_v60  ;;  %8997 = vmatprep.subr.bf16.mxu0 %v9890_v25 }
 0x5c5   :  { %9019 = vmatprep.subr.bf16.mxu1 %v9891_v58 }
 0x5c7   :  { %8998 = vmatpush3.bf16.msra.mxu0 %v9892_v52 }
 0x5c8   :  { %9020 = vmatpush3.bf16.msra.mxu1 %v9893_v39  ;;  %8999 = vmatprep.subr.bf16.mxu0 %v9894_v6 }
 0x5c9   :  { %9021 = vmatprep.subr.bf16.mxu1 %v9895_v57 }
 0x5cb   :  { %9000 = vmatpush3.bf16.msra.mxu0 %v9896_v5 }
 0x5cc   :  { %9022 = vmatpush3.bf16.msra.mxu1 %v9897_v42  ;;  %9001 = vmatprep.subr.bf16.mxu0 %v9898_v16 }
 0x5cd   :  { %9023 = vmatprep.subr.bf16.mxu1 %v9899_v62 }
 0x5cf   :  { %9002 = vmatpush3.bf16.msra.mxu0 %v9900_v0 }
 0x5d0   :  { %9024 = vmatpush3.bf16.msra.mxu1 %v9901_v22  ;;  %9031 = vmatprep.subr.bf16.mxu0 %v9902_v23 }
 0x5d1   :  { %9053 = vmatprep.subr.bf16.mxu1 %v9903_v27 }
 0x5e5   :  { %v8871_v28 = vpop.f32.mrb[76].mxu0 }
 0x5e6   :  { %v8893_v29 = vpop.f32.mrb[76].mxu1  ;;  %v8872_v30 = vpop.f32.mrb[77].mxu0 }
 0x5e7   :  { %v8873_v31 = vadd.f32 %v8872_v30, %v8871_v28  ;;  %v8894_v32 = vpop.f32.mrb[77].mxu1  ;;  %v8874_v33 = vpop.f32.mrb[78].mxu0  ;;  %v9909_v30 = vld [vmem:[%s13697_s8 + $0x62c] ss:$16 sps:$4 sm:$0xff]  }
 0x5e8   :  { %v8895_v34 = vadd.f32 %v8894_v32, %v8893_v29  ;;  %v8896_v17 = vpop.f32.mrb[78].mxu1  ;;  %v8875_v2 = vpop.f32.mrb[79].mxu0  ;;  %v9908_v29 = vld [vmem:[%s13697_s8 + $0x42c] ss:$16 sps:$4 sm:$0xff]  }
 0x5e9   :  { %v8897_v43 = vpop.f32.mrb[79].mxu1  ;;  %v9911_v32 = vld [vmem:[%s13697_s8 + $0x74c] ss:$16 sps:$4 sm:$0xff]  }
 0x5ea   :  { %v5425_v44 = vadd.f32 %v8895_v34, %v8873_v31  ;;  %v9910_v31 = vld [vmem:[%s13697_s8 + $0x54c] ss:$16 sps:$4 sm:$0xff]  }
 0x5eb   :  { %v9912_v33 = vld [vmem:[%s13697_s8 + $0x44c] ss:$16 sps:$4 sm:$0xff]  }
 0x5ec   :  { %v9913_v34 = vld [vmem:[%s13697_s8 + $0x64c] ss:$16 sps:$4 sm:$0xff]  }
 0x5ed   :  { %v9914_v17 = vld [vmem:[%s13697_s8 + $0x56c] ss:$16 sps:$4 sm:$0xff]  }
 0x5ee   :  { %v9915_v2 = vld [vmem:[%s13697_s8 + $0x76c] ss:$16 sps:$4 sm:$0xff]  }
 0x5ef   :  { %v9916_v43 = vld [vmem:[%s13697_s8 + $0x46c] ss:$16 sps:$4 sm:$0xff]  }
 0x605   :  { %v8915_v8 = vpop.f32.mrb[80].mxu0 }
 0x606   :  { %v8937_v48 = vpop.f32.mrb[80].mxu1  ;;  %v8916_v19 = vpop.f32.mrb[81].mxu0 }
 0x607   :  { %v8917_v11 = vadd.f32 %v8916_v19, %v8915_v8  ;;  %v8938_v61 = vpop.f32.mrb[81].mxu1  ;;  %v8918_v10 = vpop.f32.mrb[82].mxu0  ;;  %v9918_v8 = vld [vmem:[%s13697_s8 + $0x58c] ss:$16 sps:$4 sm:$0xff]  }
 0x608   :  { %v8939_v53 = vadd.f32 %v8938_v61, %v8937_v48  ;;  %v8940_v54 = vpop.f32.mrb[82].mxu1  ;;  %v8919_v4 = vpop.f32.mrb[83].mxu0  ;;  %v9919_v48 = vld [vmem:[%s13697_s8 + $0x78c] ss:$16 sps:$4 sm:$0xff]  }
 0x609   :  { %v5465_v15 = vadd.f32 %v8917_v11, %v5425_v44  ;;  %v8941_v21 = vpop.f32.mrb[83].mxu1  ;;  %v9917_v44 = vld [vmem:[%s13697_s8 + $0x66c] ss:$16 sps:$4 sm:$0xff]  }
 0x60a   :  { %v9920_v19 = vld [vmem:[%s13697_s8 + $0x48c] ss:$16 sps:$4 sm:$0xff]  }
 0x60b   :  { %v5505_v59 = vadd.f32 %v8939_v53, %v5465_v15  ;;  %v9921_v11 = vld [vmem:[%s13697_s8 + $0x68c] ss:$16 sps:$4 sm:$0xff]  }
 0x60c   :  { %v9922_v61 = vld [vmem:[%s13697_s8 + $0x5ac] ss:$16 sps:$4 sm:$0xff]  }
 0x60d   :  { %v9923_v10 = vld [vmem:[%s13697_s8 + $0x7ac] ss:$16 sps:$4 sm:$0xff]  }
 0x60e   :  { %v9924_v53 = vld [vmem:[%s13697_s8 + $0x4ac] ss:$16 sps:$4 sm:$0xff]  }
 0x60f   :  { %v9925_v54 = vld [vmem:[%s13697_s8 + $0x6ac] ss:$16 sps:$4 sm:$0xff]  }
 0x610   :  { %v9926_v4 = vld [vmem:[%s13697_s8 + $0x5cc] ss:$16 sps:$4 sm:$0xff]  }
 0x611   :  { %v9927_v15 = vld [vmem:[%s13697_s8 + $0x7cc] ss:$16 sps:$4 sm:$0xff]  }
 0x612   :  { %v9928_v21 = vld [vmem:[%s13697_s8 + $0x4cc] ss:$16 sps:$4 sm:$0xff]  }
 0x625   :  { %v8959_v49 = vpop.f32.mrb[84].mxu0 }
 0x626   :  { %v8981_v47 = vpop.f32.mrb[84].mxu1  ;;  %v8960_v24 = vpop.f32.mrb[85].mxu0 }
 0x627   :  { %v8961_v63 = vadd.f32 %v8960_v24, %v8959_v49  ;;  %v8982_v7 = vpop.f32.mrb[85].mxu1  ;;  %v8962_v3 = vpop.f32.mrb[86].mxu0  ;;  %v9930_v49 = vld [vmem:[%s13697_s8 + $0x5ec] ss:$16 sps:$4 sm:$0xff]  }
 0x628   :  { %v8983_v12 = vadd.f32 %v8982_v7, %v8981_v47  ;;  %v8984_v51 = vpop.f32.mrb[86].mxu1  ;;  %v8963_v9 = vpop.f32.mrb[87].mxu0  ;;  %v9931_v47 = vld [vmem:[%s13697_s8 + $0x7ec] ss:$16 sps:$4 sm:$0xff]  }
 0x629   :  { %v5545_v50 = vadd.f32 %v8961_v63, %v5505_v59  ;;  %v8985_v55 = vpop.f32.mrb[87].mxu1  ;;  %v9929_v59 = vld [vmem:[%s13697_s8 + $0x6cc] ss:$16 sps:$4 sm:$0xff]  }
 0x62a   :  { %v9932_v63 = vld [vmem:[%s13697_s8 + $0x4ec] ss:$16 sps:$4 sm:$0xff]  }
 0x62b   :  { %v5585_v20 = vadd.f32 %v8983_v12, %v5545_v50  ;;  %v9933_v51 = vld [vmem:[%s13697_s8 + $0x6ec] ss:$16 sps:$4 sm:$0xff]  }
 0x62c   :  { %v9934_v9 = vld [vmem:[%s13697_s8 + $0x90c] ss:$16 sps:$4 sm:$0xff]  }
 0x62d   :  { %v13133_v60 = vadd.f32 %v5585_v20, %v12717_v56  ;;  %v9904_v56 = vld [vmem:[%s13697_s8 + $0x40c] ss:$16 sps:$4 sm:$0xff]  }
 0x645   :  { %v5626_v25 = vpop.f32.mrb[88].mxu0 }
 0x646   :  { %v5838_v58 = vmul.f32 %v5626_v25, %v11467_v35  ;;  %v5667_v52 = vpop.f32.mrb[88].mxu1  ;;  %v5628_v39 = vpop.f32.mrb[89].mxu0 }
 0x647   :  { %v5840_v6 = vmul.f32 %v5667_v52, %v11470_v36  ;;  %v5839_v57 = vmul.f32 %v5628_v39, %v11473_v37  ;;  %v5669_v5 = vpop.f32.mrb[89].mxu1  ;;  %v5630_v42 = vpop.f32.mrb[90].mxu0  ;;  %v9905_v36 = vld [vmem:[%s13697_s8 + $0x60c] ss:$16 sps:$4 sm:$0xff]  }
 0x648   :  { %v5841_v16 = vmul.f32 %v5669_v5, %v11476_v38  ;;  %v5671_v62 = vpop.f32.mrb[90].mxu1  ;;  %v5631_v0 = vpop.f32.mrb[91].mxu0  ;;  %v5850_v27 = vpack.c.bf16 %v5838_v58, %v5838_v58  ;;  %v9906_v37 = vld [vmem:[%s13697_s8 + $0x52c] ss:$16 sps:$4 sm:$0xff]  }
 0x649   :  { %v5851_v22 = vpack.c.bf16 %v5839_v57, %v5839_v57  ;;  %v5672_v23 = vpop.f32.mrb[91].mxu1  ;;  %v5852_v28 = vpack.c.bf16 %v5840_v6, %v5840_v6  ;;  %v9907_v38 = vld [vmem:[%s13697_s8 + $0x72c] ss:$16 sps:$4 sm:$0xff]  }
 0x64a   :  { %v5853_v35 = vpack.c.bf16 %v5841_v16, %v5841_v16  ;;  %v9937_v42 = vld [vmem:[%s13697_s8 + $0xa0c] ss:$16 sps:$4 sm:$0xff]  }
 0x64b   :  { %6662 = vmatprep.mubr.bf16.mxu0 %v5851_v22  ;;  %v9939_v62 = vld [vmem:[%s13697_s8 + $0xb2c] ss:$16 sps:$4 sm:$0xff]  }
 0x64c   :  { %6702 = vmatprep.mubr.bf16.mxu1 %v5853_v35  ;;  %6663 = vmatmul.mubr.bf16.vlgmr.msra.gmra.mrb[100].mxu0 %v5850_v27  ;;  %v9940_v0 = vld [vmem:[%s13697_s8 + $0x82c] ss:$16 sps:$4 sm:$0xff]  }
 0x64d   :  { %6703 = vmatmul.mubr.bf16.vlgmr.msra.gmra.mrb[100].mxu1 %v5852_v28  ;;  %9032 = vmatpush3.bf16.msra.mxu0 %v9904_v56  ;;  %v9941_v22 = vld [vmem:[%s13697_s8 + $0xa2c] ss:$16 sps:$4 sm:$0xff]  }
 0x64e   :  { %9054 = vmatpush3.bf16.msra.mxu1 %v9905_v36  ;;  %9033 = vmatprep.subr.bf16.mxu0 %v9906_v37  ;;  %v9942_v23 = vld [vmem:[%s13697_s8 + $0x94c] ss:$16 sps:$4 sm:$0xff]  }
 0x64f   :  { %9055 = vmatprep.subr.bf16.mxu1 %v9907_v38  ;;  %v9943_v56 = vld [vmem:[%s13697_s8 + $0xb4c] ss:$16 sps:$4 sm:$0xff]  }
 0x650   :  { %v9944_v27 = vld [vmem:[%s13697_s8 + $0x84c] ss:$16 sps:$4 sm:$0xff]  }
 0x651   :  { %9034 = vmatpush3.bf16.msra.mxu0 %v9908_v29  ;;  %v9945_v35 = vld [vmem:[%s13697_s8 + $0xa4c] ss:$16 sps:$4 sm:$0xff]  }
 0x652   :  { %9056 = vmatpush3.bf16.msra.mxu1 %v9909_v30  ;;  %9035 = vmatprep.subr.bf16.mxu0 %v9910_v31  ;;  %v9946_v36 = vld [vmem:[%s13697_s8 + $0x96c] ss:$16 sps:$4 sm:$0xff]  }
 0x653   :  { %9057 = vmatprep.subr.bf16.mxu1 %v9911_v32  ;;  %v9947_v37 = vld [vmem:[%s13697_s8 + $0xb6c] ss:$16 sps:$4 sm:$0xff]  }
 0x654   :  { %v9948_v28 = vld [vmem:[%s13697_s8 + $0x86c] ss:$16 sps:$4 sm:$0xff]  }
 0x655   :  { %9036 = vmatpush3.bf16.msra.mxu0 %v9912_v33  ;;  %v9949_v38 = vld [vmem:[%s13697_s8 + $0xa6c] ss:$16 sps:$4 sm:$0xff]  }
 0x656   :  { %9058 = vmatpush3.bf16.msra.mxu1 %v9913_v34  ;;  %9037 = vmatprep.subr.bf16.mxu0 %v9914_v17  ;;  %v9950_v29 = vld [vmem:[%s13697_s8 + $0x98c] ss:$16 sps:$4 sm:$0xff]  }
 0x657   :  { %9059 = vmatprep.subr.bf16.mxu1 %v9915_v2  ;;  %v9951_v30 = vld [vmem:[%s13697_s8 + $0xb8c] ss:$16 sps:$4 sm:$0xff]  }
 0x658   :  { %v9952_v31 = vld [vmem:[%s13697_s8 + $0x88c] ss:$16 sps:$4 sm:$0xff]  }
 0x659   :  { %9038 = vmatpush3.bf16.msra.mxu0 %v9916_v43  ;;  %v9953_v32 = vld [vmem:[%s13697_s8 + $0xa8c] ss:$16 sps:$4 sm:$0xff]  }
 0x65a   :  { %9060 = vmatpush3.bf16.msra.mxu1 %v9917_v44  ;;  %9039 = vmatprep.subr.bf16.mxu0 %v9918_v8  ;;  %v9954_v33 = vld [vmem:[%s13697_s8 + $0x9ac] ss:$16 sps:$4 sm:$0xff]  }
 0x65b   :  { %9061 = vmatprep.subr.bf16.mxu1 %v9919_v48  ;;  %v9955_v34 = vld [vmem:[%s13697_s8 + $0xbac] ss:$16 sps:$4 sm:$0xff]  }
 0x65c   :  { %v9956_v17 = vld [vmem:[%s13697_s8 + $0x8ac] ss:$16 sps:$4 sm:$0xff]  }
 0x65d   :  { %9040 = vmatpush3.bf16.msra.mxu0 %v9920_v19  ;;  %v9957_v2 = vld [vmem:[%s13697_s8 + $0xaac] ss:$16 sps:$4 sm:$0xff]  }
 0x65e   :  { %9062 = vmatpush3.bf16.msra.mxu1 %v9921_v11  ;;  %9041 = vmatprep.subr.bf16.mxu0 %v9922_v61  ;;  %v9958_v43 = vld [vmem:[%s13697_s8 + $0x9cc] ss:$16 sps:$4 sm:$0xff]  }
 0x65f   :  { %9063 = vmatprep.subr.bf16.mxu1 %v9923_v10  ;;  %v9959_v44 = vld [vmem:[%s13697_s8 + $0xbcc] ss:$16 sps:$4 sm:$0xff]  }
 0x660   :  { %v9960_v8 = vld [vmem:[%s13697_s8 + $0x8cc] ss:$16 sps:$4 sm:$0xff]  }
 0x661   :  { %9042 = vmatpush3.bf16.msra.mxu0 %v9924_v53  ;;  %v9961_v48 = vld [vmem:[%s13697_s8 + $0xacc] ss:$16 sps:$4 sm:$0xff]  }
 0x662   :  { %9064 = vmatpush3.bf16.msra.mxu1 %v9925_v54  ;;  %9043 = vmatprep.subr.bf16.mxu0 %v9926_v4  ;;  %v9962_v19 = vld [vmem:[%s13697_s8 + $0x9ec] ss:$16 sps:$4 sm:$0xff]  }
 0x663   :  { %9065 = vmatprep.subr.bf16.mxu1 %v9927_v15  ;;  %v9963_v11 = vld [vmem:[%s13697_s8 + $0xbec] ss:$16 sps:$4 sm:$0xff]  }
 0x664   :  { %v9964_v10 = vld [vmem:[%s13697_s8 + $0x8ec] ss:$16 sps:$4 sm:$0xff]  }
 0x665   :  { %v5708_v24 = vpop.f32.mrb[92].mxu0  ;;  %9044 = vmatpush3.bf16.msra.mxu0 %v9928_v21  ;;  %v9965_v15 = vld [vmem:[%s13697_s8 + $0xaec] ss:$16 sps:$4 sm:$0xff]  }
 0x666   :  { %v5842_v7 = vmul.f32 %v5708_v24, %v11589_v26  ;;  %v5749_v3 = vpop.f32.mrb[92].mxu1  ;;  %9066 = vmatpush3.bf16.msra.mxu1 %v9929_v59  ;;  %v5710_v12 = vpop.f32.mrb[93].mxu0  ;;  %9045 = vmatprep.subr.bf16.mxu0 %v9930_v49  ;;  %v9935_v26 = vld [vmem:[%s13697_s8 + $0xb0c] ss:$16 sps:$4 sm:$0xff]  }
 0x667   :  { %v5844_v50 = vmul.f32 %v5749_v3, %v11592_v18  ;;  %v5843_v55 = vmul.f32 %v5710_v12, %v11598_v13  ;;  %v5751_v20 = vpop.f32.mrb[93].mxu1  ;;  %v5712_v25 = vpop.f32.mrb[94].mxu0  ;;  %9067 = vmatprep.subr.bf16.mxu1 %v9931_v47  ;;  %v9936_v18 = vld [vmem:[%s13697_s8 + $0x80c] ss:$16 sps:$4 sm:$0xff]  }
 0x668   :  { %v5845_v58 = vmul.f32 %v5751_v20, %v11601_v14  ;;  %v5753_v52 = vpop.f32.mrb[94].mxu1  ;;  %v5713_v39 = vpop.f32.mrb[95].mxu0  ;;  %v5854_v5 = vpack.c.bf16 %v5842_v7, %v5842_v7  ;;  %v9938_v14 = vld [vmem:[%s13697_s8 + $0x92c] ss:$16 sps:$4 sm:$0xff]   ;;  %v6880_v25 = vld [vmem:[%s13698_s9 + $0x40] sm:$0xff] }
 0x669   :  { %v5855_v6 = vpack.c.bf16 %v5843_v55, %v5843_v55  ;;  %v5754_v57 = vpop.f32.mrb[95].mxu1  ;;  %9046 = vmatpush3.bf16.msra.mxu0 %v9932_v63  ;;  %v5856_v16 = vpack.c.bf16 %v5844_v50, %v5844_v50  ;;  %v6877_v20 = vld [vmem:[%s13698_s9 + $0x28] sm:$0xff] }
 0x66a   :  { %v5857_v13 = vpack.c.bf16 %v5845_v58, %v5845_v58  ;;  %9068 = vmatpush3.bf16.msra.mxu1 %v9933_v51  ;;  %9075 = vmatprep.subr.bf16.mxu0 %v9934_v9  ;;  %v6885_v57 = vld [vmem:[%s13698_s9 + $0x68] sm:$0xff] }
 0x66b   :  { %6742 = vmatprep.mubr.bf16.mxu0 %v5855_v6  ;;  %9097 = vmatprep.subr.bf16.mxu1 %v9935_v26  ;;  %v6884_v26 = vld [vmem:[%s13698_s9 + $0x60] sm:$0xff]  ;;  %v6881_v6 = vld [vmem:[%s13698_s9 + $0x48] sm:$0xff] }
 0x66c   :  { %6782 = vmatprep.mubr.bf16.mxu1 %v5857_v13  ;;  %6743 = vmatmul.mubr.bf16.vlgmr.msra.gmra.mrb[104].mxu0 %v5854_v5  ;;  %v8483_v39 = vcombine.high %v6880_v25, %v6884_v26  ;;  %v8485_v5 = vcombine.high %v6881_v6, %v6885_v57  ;;  %v6892_v13 = vld [vmem:[%s13698_s9 + $0xa0] sm:$0xff] }
 0x66d   :  { %6783 = vmatmul.mubr.bf16.vlgmr.msra.gmra.mrb[104].mxu1 %v5856_v16  ;;  %9076 = vmatpush3.bf16.msra.mxu0 %v9936_v18  ;;  %v6888_v18 = vld [vmem:[%s13698_s9 + $0x80] sm:$0xff]  ;;  %v8482_v16 = vcombine.low %v6880_v25, %v6884_v26  ;;  %v6879_v26 = vld [vmem:[%s13698_s9 + $0x38] sm:$0xff] }
 0x66e   :  { %9098 = vmatpush3.bf16.msra.mxu1 %v9937_v42  ;;  %9077 = vmatprep.subr.bf16.mxu0 %v9938_v14  ;;  %v6889_v42 = vld [vmem:[%s13698_s9 + $0x88] sm:$0xff] }
 0x66f   :  { %9099 = vmatprep.subr.bf16.mxu1 %v9939_v62  ;;  %v6893_v14 = vld [vmem:[%s13698_s9 + $0xa8] sm:$0xff]  ;;  %v8484_v62 = vcombine.low %v6881_v6, %v6885_v57 }
 0x671   :  { %9078 = vmatpush3.bf16.msra.mxu0 %v9940_v0  ;;  %v8491_v0 = vcombine.high %v6888_v18, %v6892_v13 }
 0x672   :  { %9100 = vmatpush3.bf16.msra.mxu1 %v9941_v22  ;;  %9079 = vmatprep.subr.bf16.mxu0 %v9942_v23  ;;  %v8493_v22 = vcombine.high %v6889_v42, %v6893_v14  ;;  %v6896_v23 = vld [vmem:[%s13698_s9 + $0xc0] sm:$0xff] }
 0x673   :  { %9101 = vmatprep.subr.bf16.mxu1 %v9943_v56  ;;  %v6900_v56 = vld [vmem:[%s13698_s9 + $0xe0] sm:$0xff] }
 0x675   :  { %9080 = vmatpush3.bf16.msra.mxu0 %v9944_v27  ;;  %v6897_v27 = vld [vmem:[%s13698_s9 + $0xc8] sm:$0xff] }
 0x676   :  { %9102 = vmatpush3.bf16.msra.mxu1 %v9945_v35  ;;  %9081 = vmatprep.subr.bf16.mxu0 %v9946_v36  ;;  %v6901_v35 = vld [vmem:[%s13698_s9 + $0xe8] sm:$0xff]  ;;  %v8490_v36 = vcombine.low %v6888_v18, %v6892_v13 }
 0x677   :  { %9103 = vmatprep.subr.bf16.mxu1 %v9947_v37  ;;  %v8492_v37 = vcombine.low %v6889_v42, %v6893_v14 }
 0x679   :  { %9082 = vmatpush3.bf16.msra.mxu0 %v9948_v28  ;;  %v8499_v28 = vcombine.high %v6896_v23, %v6900_v56 }
 0x67a   :  { %9104 = vmatpush3.bf16.msra.mxu1 %v9949_v38  ;;  %9083 = vmatprep.subr.bf16.mxu0 %v9950_v29  ;;  %v8501_v38 = vcombine.high %v6897_v27, %v6901_v35  ;;  %v6904_v29 = vld [vmem:[%s13698_s9 + $0x100] sm:$0xff] }
 0x67b   :  { %9105 = vmatprep.subr.bf16.mxu1 %v9951_v30  ;;  %v6908_v30 = vld [vmem:[%s13698_s9 + $0x120] sm:$0xff] }
 0x67d   :  { %9084 = vmatpush3.bf16.msra.mxu0 %v9952_v31  ;;  %v6905_v31 = vld [vmem:[%s13698_s9 + $0x108] sm:$0xff] }
 0x67e   :  { %9106 = vmatpush3.bf16.msra.mxu1 %v9953_v32  ;;  %9085 = vmatprep.subr.bf16.mxu0 %v9954_v33  ;;  %v6909_v32 = vld [vmem:[%s13698_s9 + $0x128] sm:$0xff]  ;;  %v8498_v33 = vcombine.low %v6896_v23, %v6900_v56 }
 0x67f   :  { %9107 = vmatprep.subr.bf16.mxu1 %v9955_v34  ;;  %v8500_v34 = vcombine.low %v6897_v27, %v6901_v35 }
 0x681   :  { %9086 = vmatpush3.bf16.msra.mxu0 %v9956_v17  ;;  %v8507_v17 = vcombine.high %v6904_v29, %v6908_v30 }
 0x682   :  { %9108 = vmatpush3.bf16.msra.mxu1 %v9957_v2  ;;  %9087 = vmatprep.subr.bf16.mxu0 %v9958_v43  ;;  %v8509_v2 = vcombine.high %v6905_v31, %v6909_v32  ;;  %v6912_v43 = vld [vmem:[%s13698_s9 + $0x140] sm:$0xff] }
 0x683   :  { %9109 = vmatprep.subr.bf16.mxu1 %v9959_v44  ;;  %v6916_v44 = vld [vmem:[%s13698_s9 + $0x160] sm:$0xff] }
 0x685   :  { %v5790_v61 = vpop.f32.mrb[96].mxu0  ;;  %9088 = vmatpush3.bf16.msra.mxu0 %v9960_v8  ;;  %v6913_v8 = vld [vmem:[%s13698_s9 + $0x148] sm:$0xff] }
 0x686   :  { %v5846_v53 = vmul.f32 %v5790_v61, %v11396_v40  ;;  %v5831_v54 = vpop.f32.mrb[96].mxu1  ;;  %9110 = vmatpush3.bf16.msra.mxu1 %v9961_v48  ;;  %v5792_v4 = vpop.f32.mrb[97].mxu0  ;;  %9089 = vmatprep.subr.bf16.mxu0 %v9962_v19  ;;  %v6917_v48 = vld [vmem:[%s13698_s9 + $0x168] sm:$0xff]  ;;  %v8506_v19 = vcombine.low %v6904_v29, %v6908_v30  ;;  %v8515_v61 = vcombine.high %v6912_v43, %v6916_v44 }
 0x687   :  { %v5848_v21 = vmul.f32 %v5831_v54, %v11399_v41  ;;  %v5847_v59 = vmul.f32 %v5792_v4, %v11405_v45  ;;  %v5833_v49 = vpop.f32.mrb[97].mxu1  ;;  %v5794_v47 = vpop.f32.mrb[98].mxu0  ;;  %9111 = vmatprep.subr.bf16.mxu1 %v9963_v11  ;;  %v6872_v41 = vld [vmem:[%s13698_s9] sm:$0xff]  ;;  %v8508_v11 = vcombine.low %v6905_v31, %v6909_v32  ;;  %v8516_v54 = vcombine.low %v6913_v8, %v6917_v48 }
 0x688   :  { %v5849_v24 = vmul.f32 %v5833_v49, %v11408_v46  ;;  %v5835_v63 = vpop.f32.mrb[98].mxu1  ;;  %v5795_v7 = vpop.f32.mrb[99].mxu0  ;;  %v5858_v12 = vpack.c.bf16 %v5846_v53, %v5846_v53  ;;  %v6876_v45 = vld [vmem:[%s13698_s9 + $0x20] sm:$0xff]  ;;  %v6873_v46 = vld [vmem:[%s13698_s9 + $0x8] sm:$0xff]  ;;  %v8514_v53 = vcombine.low %v6912_v43, %v6916_v44 }
 0x689   :  { %v5859_v40 = vpack.c.bf16 %v5847_v59, %v5847_v59  ;;  %v5836_v3 = vpop.f32.mrb[99].mxu1  ;;  %9090 = vmatpush3.bf16.msra.mxu0 %v9964_v10  ;;  %v5860_v9 = vpack.c.bf16 %v5848_v21, %v5848_v21  ;;  %v8474_v50 = vcombine.low %v6872_v41, %v6876_v45  ;;  %v8475_v55 = vcombine.high %v6872_v41, %v6876_v45  ;;  %v6920_v4 = vld [vmem:[%s13698_s9 + $0x180] sm:$0xff]  ;;  %v6921_v21 = vld [vmem:[%s13698_s9 + $0x188] sm:$0xff] }
 0x68a   :  { %v5861_v51 = vpack.c.bf16 %v5849_v24, %v5849_v24  ;;  %9112 = vmatpush3.bf16.msra.mxu1 %v9965_v15  ;;  %v8476_v58 = vcombine.low %v6873_v46, %v6877_v20  ;;  %v8477_v52 = vcombine.high %v6873_v46, %v6877_v20  ;;  %v8517_v10 = vcombine.high %v6913_v8, %v6917_v48  ;;  %v6924_v15 = vld [vmem:[%s13698_s9 + $0x1a0] sm:$0xff]  ;;  %v6925_v49 = vld [vmem:[%s13698_s9 + $0x1a8] sm:$0xff]  ;;  %v6874_v46 = vld [vmem:[%s13698_s9 + $0x10] sm:$0xff] }
 0x68b   :  { %6822 = vmatprep.mubr.bf16.mxu0 %v5859_v40  ;;  %7256 = vmatprep.subr.bf16.mxu0 %v8475_v55  ;;  %v8523_v59 = vcombine.high %v6920_v4, %v6924_v15  ;;  %v8522_v47 = vcombine.low %v6920_v4, %v6924_v15  ;;  %v8524_v24 = vcombine.low %v6921_v21, %v6925_v49  ;;  %v6928_v7 = vld [vmem:[%s13698_s9 + $0x1c0] sm:$0xff]  ;;  %v6929_v3 = vld [vmem:[%s13698_s9 + $0x1c8] sm:$0xff]  ;;  %v6875_v55 = vld [vmem:[%s13698_s9 + $0x18] sm:$0xff] }
 0x68c   :  { %6862 = vmatprep.mubr.bf16.mxu1 %v5861_v51  ;;  %6823 = vmatmul.mubr.bf16.vlgmr.msra.gmra.mrb[108].mxu0 %v5858_v12  ;;  %v8525_v63 = vcombine.high %v6921_v21, %v6925_v49  ;;  %v6932_v40 = vld [vmem:[%s13698_s9 + $0x1e0] sm:$0xff]  ;;  %v6933_v51 = vld [vmem:[%s13698_s9 + $0x1e8] sm:$0xff]  ;;  %v6887_v4 = vld [vmem:[%s13698_s9 + $0x78] sm:$0xff] }
 0x68d   :  { %6863 = vmatmul.mubr.bf16.vlgmr.msra.gmra.mrb[108].mxu1 %v5860_v9  ;;  %7288 = vmatprep.mubr.bf16.mxu0 %v13855_v1  ;;  %v8531_v12 = vcombine.high %v6928_v7, %v6932_v40  ;;  %v8530_v9 = vcombine.low %v6928_v7, %v6932_v40  ;;  %v8532_v41 = vcombine.low %v6929_v3, %v6933_v51 }
 0x68e   :  { %7329 = vmatprep.mubr.bf16.mxu1 %v13855_v1  ;;  %7297 = vmatprep.subr.bf16.mxu1 %v8477_v52  ;;  %v8533_v45 = vcombine.high %v6929_v3, %v6933_v51  ;;  %v8481_v52 = vcombine.high %v6875_v55, %v6879_v26  ;;  %v6898_v51 = vld [vmem:[%s13698_s9 + $0xd0] sm:$0xff] }
 0x68f   :  { %7257 = vmatpush1.bf16.msra.mxu0 %v8474_v50  ;;  %7298 = vmatpush1.bf16.msra.mxu1 %v8476_v58  ;;  %v6878_v50 = vld [vmem:[%s13698_s9 + $0x30] sm:$0xff]  ;;  %v8480_v58 = vcombine.low %v6875_v55, %v6879_v26 }
 0x690   :  { %7258 = vmatprep.subr.bf16.mxu0 %v8483_v39  ;;  %7299 = vmatprep.subr.bf16.mxu1 %v8485_v5  ;;  %v8478_v20 = vcombine.low %v6874_v46, %v6878_v50  ;;  %v8479_v25 = vcombine.high %v6874_v46, %v6878_v50  ;;  %v6910_v26 = vld [vmem:[%s13698_s9 + $0x130] sm:$0xff] }
 0x693   :  { %7259 = vmatpush1.bf16.msra.mxu0 %v8482_v16  ;;  %7300 = vmatpush1.bf16.msra.mxu1 %v8484_v62 }
 0x694   :  { %7260 = vmatprep.subr.bf16.mxu0 %v8491_v0  ;;  %7301 = vmatprep.subr.bf16.mxu1 %v8493_v22 }
 0x697   :  { %7261 = vmatpush1.bf16.msra.mxu0 %v8490_v36  ;;  %7302 = vmatpush1.bf16.msra.mxu1 %v8492_v37 }
 0x698   :  { %7262 = vmatprep.subr.bf16.mxu0 %v8499_v28  ;;  %7303 = vmatprep.subr.bf16.mxu1 %v8501_v38 }
 0x69b   :  { %7263 = vmatpush1.bf16.msra.mxu0 %v8498_v33  ;;  %7304 = vmatpush1.bf16.msra.mxu1 %v8500_v34 }
 0x69c   :  { %7264 = vmatprep.subr.bf16.mxu0 %v8507_v17  ;;  %7305 = vmatprep.subr.bf16.mxu1 %v8509_v2 }
 0x69f   :  { %7265 = vmatpush1.bf16.msra.mxu0 %v8506_v19  ;;  %7306 = vmatpush1.bf16.msra.mxu1 %v8508_v11 }
 0x6a0   :  { %7266 = vmatprep.subr.bf16.mxu0 %v8515_v61  ;;  %7307 = vmatprep.subr.bf16.mxu1 %v8517_v10  ;;  %v6882_v10 = vld [vmem:[%s13698_s9 + $0x50] sm:$0xff] }
 0x6a3   :  { %7267 = vmatpush1.bf16.msra.mxu0 %v8514_v53  ;;  %7308 = vmatpush1.bf16.msra.mxu1 %v8516_v54  ;;  %v6886_v53 = vld [vmem:[%s13698_s9 + $0x70] sm:$0xff]  ;;  %v6883_v54 = vld [vmem:[%s13698_s9 + $0x58] sm:$0xff] }
 0x6a4   :  { %7268 = vmatprep.subr.bf16.mxu0 %v8523_v59  ;;  %7309 = vmatprep.subr.bf16.mxu1 %v8525_v63  ;;  %v8487_v59 = vcombine.high %v6882_v10, %v6886_v53  ;;  %v8489_v49 = vcombine.high %v6883_v54, %v6887_v4  ;;  %v6891_v63 = vld [vmem:[%s13698_s9 + $0x98] sm:$0xff]  ;;  %v8486_v7 = vcombine.low %v6882_v10, %v6886_v53  ;;  %v9971_v10 = vld [vmem:[%s13699_s10 + $0x28] sm:$0xff]   ;;  %v9972_v53 = vld [vmem:[%s13699_s10 + $0x30] sm:$0xff]  }
 0x6a5   :  { %v8488_v40 = vcombine.low %v6883_v54, %v6887_v4  ;;  %v9973_v54 = vld [vmem:[%s13699_s10 + $0x38] sm:$0xff]   ;;  %v9974_v4 = vld [vmem:[%s13700_s12] sm:$0xff]  }
 0x6a7   :  { %7269 = vmatpush1.bf16.msra.mxu0 %v8522_v47  ;;  %7310 = vmatpush1.bf16.msra.mxu1 %v8524_v24  ;;  %v6890_v47 = vld [vmem:[%s13698_s9 + $0x90] sm:$0xff] }
 0x6a8   :  { %7270 = vmatprep.subr.bf16.mxu0 %v8531_v12  ;;  %7311 = vmatprep.subr.bf16.mxu1 %v8533_v45  ;;  %v6894_v24 = vld [vmem:[%s13698_s9 + $0xb0] sm:$0xff]  ;;  %v6903_v45 = vld [vmem:[%s13698_s9 + $0xf8] sm:$0xff] }
 0x6a9   :  { %v8495_v3 = vcombine.high %v6890_v47, %v6894_v24  ;;  %v8494_v46 = vcombine.low %v6890_v47, %v6894_v24  ;;  %v9978_v47 = vld [vmem:[%s13700_s12 + $0x20] sm:$0xff]   ;;  %v9979_v24 = vld [vmem:[%s13700_s12 + $0x28] sm:$0xff]  }
 0x6ab   :  { %7271 = vmatpush1.bf16.msra.mxu0 %v8530_v9  ;;  %7312 = vmatpush1.bf16.msra.mxu1 %v8532_v41  ;;  %v6902_v9 = vld [vmem:[%s13698_s9 + $0xf0] sm:$0xff]  ;;  %v6899_v41 = vld [vmem:[%s13698_s9 + $0xd8] sm:$0xff] }
 0x6ac   :  { %7338 = vmatprep.subr.bf16.mxu0 %v8479_v25  ;;  %7379 = vmatprep.subr.bf16.mxu1 %v8481_v52  ;;  %v8503_v55 = vcombine.high %v6898_v51, %v6902_v9  ;;  %v6906_v25 = vld [vmem:[%s13698_s9 + $0x110] sm:$0xff]  ;;  %v8502_v52 = vcombine.low %v6898_v51, %v6902_v9 }
 0x71f   :  { %v9003_v39 = vpop.f32.mrb[100].mxu0 }
 0x720   :  { %v9025_v6 = vpop.f32.mrb[100].mxu1  ;;  %v9004_v57 = vpop.f32.mrb[101].mxu0 }
 0x721   :  { %v9005_v18 = vadd.f32 %v9004_v57, %v9003_v39  ;;  %v9026_v5 = vpop.f32.mrb[101].mxu1  ;;  %v9006_v13 = vpop.f32.mrb[102].mxu0  ;;  %v8504_v39 = vcombine.low %v6899_v41, %v6903_v45 }
 0x722   :  { %v9027_v42 = vadd.f32 %v9026_v5, %v9025_v6  ;;  %v9028_v14 = vpop.f32.mrb[102].mxu1  ;;  %v9007_v16 = vpop.f32.mrb[103].mxu0  ;;  %v8511_v6 = vcombine.high %v6906_v25, %v6910_v26  ;;  %v6918_v5 = vld [vmem:[%s13698_s9 + $0x170] sm:$0xff]  ;;  %v6915_v13 = vld [vmem:[%s13698_s9 + $0x158] sm:$0xff] }
 0x723   :  { %v9029_v62 = vpop.f32.mrb[103].mxu1  ;;  %v8510_v14 = vcombine.low %v6906_v25, %v6910_v26 }
 0x724   :  { %v6705_v0 = vadd.f32 %v9027_v42, %v9005_v18  ;;  %v6914_v18 = vld [vmem:[%s13698_s9 + $0x150] sm:$0xff]  ;;  %v6919_v42 = vld [vmem:[%s13698_s9 + $0x178] sm:$0xff] }
 0x725   :  { %v8519_v62 = vcombine.high %v6914_v18, %v6918_v5 }
 0x73f   :  { %v9047_v22 = vpop.f32.mrb[104].mxu0 }
 0x740   :  { %v9069_v23 = vpop.f32.mrb[104].mxu1  ;;  %v9048_v56 = vpop.f32.mrb[105].mxu0 }
 0x741   :  { %v9049_v27 = vadd.f32 %v9048_v56, %v9047_v22  ;;  %v9070_v35 = vpop.f32.mrb[105].mxu1  ;;  %v9050_v36 = vpop.f32.mrb[106].mxu0  ;;  %v6922_v22 = vld [vmem:[%s13698_s9 + $0x190] sm:$0xff]  ;;  %v6923_v56 = vld [vmem:[%s13698_s9 + $0x198] sm:$0xff] }
 0x742   :  { %v9071_v37 = vadd.f32 %v9070_v35, %v9069_v23  ;;  %v9072_v28 = vpop.f32.mrb[106].mxu1  ;;  %v9051_v38 = vpop.f32.mrb[107].mxu0  ;;  %v6926_v23 = vld [vmem:[%s13698_s9 + $0x1b0] sm:$0xff]  ;;  %v8518_v35 = vcombine.low %v6914_v18, %v6918_v5  ;;  %v8520_v36 = vcombine.low %v6915_v13, %v6919_v42 }
 0x743   :  { %v6745_v29 = vadd.f32 %v9049_v27, %v6705_v0  ;;  %v9073_v30 = vpop.f32.mrb[107].mxu1  ;;  %v8521_v0 = vcombine.high %v6915_v13, %v6919_v42  ;;  %v6927_v27 = vld [vmem:[%s13698_s9 + $0x1b8] sm:$0xff]  ;;  %v6930_v38 = vld [vmem:[%s13698_s9 + $0x1d0] sm:$0xff] }
 0x744   :  { %v8529_v28 = vcombine.high %v6923_v56, %v6927_v27  ;;  %v6931_v30 = vld [vmem:[%s13698_s9 + $0x1d8] sm:$0xff]  ;;  %v9980_v13 = vld [vmem:[%s13700_s12 + $0x30] sm:$0xff]  }
 0x745   :  { %v6785_v31 = vadd.f32 %v9071_v37, %v6745_v29  ;;  %v8527_v37 = vcombine.high %v6922_v22, %v6926_v23  ;;  %v6934_v29 = vld [vmem:[%s13698_s9 + $0x1f0] sm:$0xff]  ;;  %v9981_v42 = vld [vmem:[%s13700_s12 + $0x38] sm:$0xff]  }
 0x75f   :  { %v9091_v32 = vpop.f32.mrb[108].mxu0 }
 0x760   :  { %v9113_v33 = vpop.f32.mrb[108].mxu1  ;;  %v9092_v34 = vpop.f32.mrb[109].mxu0 }
 0x761   :  { %v9093_v17 = vadd.f32 %v9092_v34, %v9091_v32  ;;  %v9114_v2 = vpop.f32.mrb[109].mxu1  ;;  %v9094_v43 = vpop.f32.mrb[110].mxu0  ;;  %v8526_v32 = vcombine.low %v6922_v22, %v6926_v23  ;;  %v8535_v34 = vcombine.high %v6930_v38, %v6934_v29  ;;  %v9986_v22 = vld [vmem:[%s13701_s14 + $0x20] sm:$0xff]   ;;  %v9987_v23 = vld [vmem:[%s13701_s14 + $0x28] sm:$0xff]  }
 0x762   :  { %v9115_v44 = vadd.f32 %v9114_v2, %v9113_v33  ;;  %v9116_v8 = vpop.f32.mrb[110].mxu1  ;;  %v9095_v48 = vpop.f32.mrb[111].mxu0  ;;  %v8528_v33 = vcombine.low %v6923_v56, %v6927_v27  ;;  %v8534_v2 = vcombine.low %v6930_v38, %v6934_v29  ;;  %v8538_v56 = vld [vmem:[%s13702_s11] ss:$0 sm:$0xff] }
 0x763   :  { %v6825_v19 = vadd.f32 %v9093_v17, %v6785_v31  ;;  %v9117_v11 = vpop.f32.mrb[111].mxu1  ;;  %v6935_v31 = vld [vmem:[%s13698_s9 + $0x1f8] sm:$0xff]  ;;  %v9966_v8 = vld [vmem:[%s13699_s10] sm:$0xff]   ;;  %v9967_v48 = vld [vmem:[%s13699_s10 + $0x8] sm:$0xff]  }
 0x764   :  { %v8537_v17 = vcombine.high %v6931_v30, %v6935_v31  ;;  %v8536_v43 = vcombine.low %v6931_v30, %v6935_v31  ;;  %v9969_v11 = vld [vmem:[%s13699_s10 + $0x18] sm:$0xff]   ;;  %v9988_v31 = vld [vmem:[%s13701_s14 + $0x30] sm:$0xff]  }
 0x765   :  { %v6865_v61 = vadd.f32 %v9115_v44, %v6825_v19  ;;  %v14053_v44 = vmov 0.0   ;;  %v9968_v19 = vld [vmem:[%s13699_s10 + $0x10] sm:$0xff]  }
 0x767   :  { %v13456_v15 = vadd.f32 %v6865_v61, %v13133_v60  ;;  %v6895_v60 = vld [vmem:[%s13698_s9 + $0xb8] sm:$0xff]  ;;  %v9970_v61 = vld [vmem:[%s13699_s10 + $0x20] sm:$0xff]  }
 0x768   :  { %v8497_v12 = vcombine.high %v6891_v63, %v6895_v60  ;;  %v8496_v50 = vcombine.low %v6891_v63, %v6895_v60 }
 0x769   :  { %v13460_v21 = vpack.c.bf16 %v13456_v15, %v13456_v15 }
 0x76b   :  { %7289 = vmatmul.mubr.bf16.vlgmr.msra.gmra.mrb[112].mxu0 %v13460_v21  ;;  %7330 = vmatmul.mubr.bf16.vlgmr.msra.gmra.mrb[112].mxu1 %v13460_v21 }
 0x76c   :  { %7339 = vmatpush1.bf16.msra.mxu0 %v8478_v20  ;;  %7380 = vmatpush1.bf16.msra.mxu1 %v8480_v58  ;;  %v8505_v20 = vcombine.high %v6899_v41, %v6903_v45  ;;  %v6911_v58 = vld [vmem:[%s13698_s9 + $0x138] sm:$0xff] }
 0x76d   :  { %7340 = vmatprep.subr.bf16.mxu0 %v8487_v59  ;;  %7381 = vmatprep.subr.bf16.mxu1 %v8489_v49  ;;  %v9976_v59 = vld [vmem:[%s13700_s12 + $0x10] sm:$0xff]   ;;  %v9977_v49 = vld [vmem:[%s13700_s12 + $0x18] sm:$0xff]  }
 0x76e   :  { %7370 = vmatprep.mubr.bf16.mxu0 %v13855_v1  ;;  %7411 = vmatprep.mubr.bf16.mxu1 %v13855_v1  ;;  %v6907_v1 = vld [vmem:[%s13698_s9 + $0x118] sm:$0xff] }
 0x76f   :  { %v8513_v57 = vcombine.high %v6907_v1, %v6911_v58  ;;  %v8512_v16 = vcombine.low %v6907_v1, %v6911_v58 }
 0x770   :  { %7341 = vmatpush1.bf16.msra.mxu0 %v8486_v7  ;;  %7382 = vmatpush1.bf16.msra.mxu1 %v8488_v40 }
 0x771   :  { %7342 = vmatprep.subr.bf16.mxu0 %v8495_v3  ;;  %7383 = vmatprep.subr.bf16.mxu1 %v8497_v12 }
 0x774   :  { %7343 = vmatpush1.bf16.msra.mxu0 %v8494_v46  ;;  %7384 = vmatpush1.bf16.msra.mxu1 %v8496_v50 }
 0x775   :  { %7344 = vmatprep.subr.bf16.mxu0 %v8503_v55  ;;  %7385 = vmatprep.subr.bf16.mxu1 %v8505_v20 }
 0x778   :  { %7345 = vmatpush1.bf16.msra.mxu0 %v8502_v52  ;;  %7386 = vmatpush1.bf16.msra.mxu1 %v8504_v39 }
 0x779   :  { %7346 = vmatprep.subr.bf16.mxu0 %v8511_v6  ;;  %7387 = vmatprep.subr.bf16.mxu1 %v8513_v57 }
 0x77c   :  { %7347 = vmatpush1.bf16.msra.mxu0 %v8510_v14  ;;  %7388 = vmatpush1.bf16.msra.mxu1 %v8512_v16  ;;  %v9982_v14 = vld [vmem:[%s13701_s14] sm:$0xff]   ;;  %v9983_v16 = vld [vmem:[%s13701_s14 + $0x8] sm:$0xff]  }
 0x77d   :  { %7348 = vmatprep.subr.bf16.mxu0 %v8519_v62  ;;  %7389 = vmatprep.subr.bf16.mxu1 %v8521_v0  ;;  %v9984_v62 = vld [vmem:[%s13701_s14 + $0x10] sm:$0xff]   ;;  %v9985_v0 = vld [vmem:[%s13701_s14 + $0x18] sm:$0xff]  }
 0x780   :  { %7349 = vmatpush1.bf16.msra.mxu0 %v8518_v35  ;;  %7390 = vmatpush1.bf16.msra.mxu1 %v8520_v36 }
 0x781   :  { %7350 = vmatprep.subr.bf16.mxu0 %v8527_v37  ;;  %7391 = vmatprep.subr.bf16.mxu1 %v8529_v28 }
 0x784   :  { %7351 = vmatpush1.bf16.msra.mxu0 %v8526_v32  ;;  %7392 = vmatpush1.bf16.msra.mxu1 %v8528_v33  ;;  %v9989_v32 = vld [vmem:[%s13701_s14 + $0x38] sm:$0xff]   ;;  %v9990_v33 = vld [vmem:[%s13703_s16] sm:$0xff]  }
 0x785   :  { %7352 = vmatprep.subr.bf16.mxu0 %v8535_v34  ;;  %7393 = vmatprep.subr.bf16.mxu1 %v8537_v17  ;;  %v9991_v34 = vld [vmem:[%s13703_s16 + $0x8] sm:$0xff]   ;;  %v9992_v17 = vld [vmem:[%s13703_s16 + $0x10] sm:$0xff]  }
 0x788   :  { %7353 = vmatpush1.bf16.msra.mxu0 %v8534_v2  ;;  %7394 = vmatpush1.bf16.msra.mxu1 %v8536_v43  ;;  %v9993_v2 = vld [vmem:[%s13703_s16 + $0x18] sm:$0xff]   ;;  %v9994_v43 = vld [vmem:[%s13703_s16 + $0x20] sm:$0xff]  }
 0x789   :  { %9195 = vmatprep.subr.bf16.mxu0 %v14053_v44  ;;  %9215 = vmatprep.subr.bf16.mxu1 %v14053_v44 }
 0x78b   :  { %7371 = vmatmul.mubr.bf16.vlgmr.msra.gmra.mrb[116].mxu0 %v13460_v21  ;;  %7412 = vmatmul.mubr.bf16.vlgmr.msra.gmra.mrb[116].mxu1 %v13460_v21  ;;  %v9975_v21 = vld [vmem:[%s13700_s12 + $0x8] sm:$0xff]  }
 0x78c   :  { %9211 = vmatprep.mubr.msk.bf16.mxu0 %vm10095_vm0, %v14053_v44  ;;  %9231 = vmatprep.mubr.msk.bf16.mxu1 %vm10095_vm0, %v14053_v44 }
 0x78d   :  { %9196 = vmatpush3.bf16.msra.mxu0 %v9966_v8  ;;  %9216 = vmatpush3.bf16.msra.mxu1 %v9974_v4  ;;  %v9995_v8 = vld [vmem:[%s13703_s16 + $0x28] sm:$0xff]  }
 0x78e   :  { %9197 = vmatprep.subr.bf16.mxu0 %v14053_v44  ;;  %9217 = vmatprep.subr.bf16.mxu1 %v14053_v44 }
 0x791   :  { %9198 = vmatpush3.bf16.msra.mxu0 %v9967_v48  ;;  %9218 = vmatpush3.bf16.msra.mxu1 %v9975_v21  ;;  %v8547_v48 = vld [vmem:[%s13704_s13] ss:$0 sm:$0xff] }
 0x792   :  { %9199 = vmatprep.subr.bf16.mxu0 %v14053_v44  ;;  %9219 = vmatprep.subr.bf16.mxu1 %v14053_v44 }
 0x795   :  { %9200 = vmatpush3.bf16.msra.mxu0 %v9968_v19  ;;  %9220 = vmatpush3.bf16.msra.mxu1 %v9976_v59  ;;  %v9996_v59 = vld [vmem:[%s13703_s16 + $0x30] sm:$0xff]  }
 0x796   :  { %9201 = vmatprep.subr.bf16.mxu0 %v14053_v44  ;;  %9221 = vmatprep.subr.bf16.mxu1 %v14053_v44 }
 0x799   :  { %9202 = vmatpush3.bf16.msra.mxu0 %v9969_v11  ;;  %9222 = vmatpush3.bf16.msra.mxu1 %v9977_v49  ;;  %v9997_v49 = vld [vmem:[%s13703_s16 + $0x38] sm:$0xff]  }
 0x79a   :  { %9203 = vmatprep.subr.bf16.mxu0 %v14053_v44  ;;  %9223 = vmatprep.subr.bf16.mxu1 %v14053_v44 }
 0x79d   :  { %9204 = vmatpush3.bf16.msra.mxu0 %v9970_v61  ;;  %9224 = vmatpush3.bf16.msra.mxu1 %v9978_v47  ;;  %v8556_v47 = vld [vmem:[%s13705_s15] ss:$0 sm:$0xff] }
 0x79e   :  { %9205 = vmatprep.subr.bf16.mxu0 %v14053_v44  ;;  %9225 = vmatprep.subr.bf16.mxu1 %v14053_v44 }
 0x7a1   :  { %9206 = vmatpush3.bf16.msra.mxu0 %v9971_v10  ;;  %9226 = vmatpush3.bf16.msra.mxu1 %v9979_v24 }
 0x7a2   :  { %9207 = vmatprep.subr.bf16.mxu0 %v14053_v44  ;;  %9227 = vmatprep.subr.bf16.mxu1 %v14053_v44 }
 0x7a5   :  { %9208 = vmatpush3.bf16.msra.mxu0 %v9972_v53  ;;  %9228 = vmatpush3.bf16.msra.mxu1 %v9980_v13 }
 0x7a6   :  { %9209 = vmatprep.subr.bf16.mxu0 %v14053_v44  ;;  %9229 = vmatprep.subr.bf16.mxu1 %v14053_v44 }
 0x7a9   :  { %9210 = vmatpush3.bf16.msra.mxu0 %v9973_v54  ;;  %9230 = vmatpush3.bf16.msra.mxu1 %v9981_v42 }
 0x7aa   :  { %9235 = vmatprep.subr.bf16.mxu0 %v14053_v44  ;;  %9255 = vmatprep.subr.bf16.mxu1 %v14053_v44 }
 0x83e   :  { %v7290_v63 = vpop.f32.mrb[112].mxu0  ;;  %v7331_v60 = vpop.f32.mrb[112].mxu1 }
 0x83f   :  { %v7292_v7 = vpop.f32.mrb[113].mxu0  ;;  %v7333_v40 = vpop.f32.mrb[113].mxu1 }
 0x840   :  { %v7294_v3 = vpop.f32.mrb[114].mxu0  ;;  %v7335_v12 = vpop.f32.mrb[114].mxu1 }
 0x841   :  { %v7295_v51 = vpop.f32.mrb[115].mxu0  ;;  %v7336_v9 = vpop.f32.mrb[115].mxu1 }
 0x85e   :  { %v7372_v41 = vpop.f32.mrb[116].mxu0  ;;  %v7413_v45 = vpop.f32.mrb[116].mxu1 }
 0x85f   :  { %v7420_v46 = vmul.f32 %v7372_v41, %v7290_v63  ;;  %v7423_v50 = vmul.f32 %v7413_v45, %v7331_v60  ;;  %v7374_v55 = vpop.f32.mrb[117].mxu0  ;;  %v7415_v20 = vpop.f32.mrb[117].mxu1 }
 0x860   :  { %v7421_v25 = vmul.f32 %v7374_v55, %v7292_v7  ;;  %v7425_v26 = vmul.f32 %v7415_v20, %v7333_v40  ;;  %v7376_v1 = vpop.f32.mrb[118].mxu0  ;;  %v7417_v58 = vpop.f32.mrb[118].mxu1 }
 0x861   :  { %v7377_v52 = vpop.f32.mrb[119].mxu0  ;;  %v7418_v39 = vpop.f32.mrb[119].mxu1 }
 0x862   :  { %v7422_v6 = vadd.f32 %v7421_v25, %v7420_v46 }
 0x864   :  { %v7424_v57 = vadd.f32 %v7423_v50, %v7422_v6 }
 0x866   :  { %v7426_v18 = vadd.f32 %v7425_v26, %v7424_v57 }
 0x868   :  { %v7427_v5 = vpack.c.bf16 %v7426_v18, %v7426_v18 }
 0x86a   :  { %9212 = vmatmul.mubr.bf16.vlgmr.msra.gmra.mrb[120].mxu0 %v7427_v5 }
 0x86b   :  { %9251 = vmatprep.mubr.msk.bf16.mxu0 %vm10095_vm0, %v14053_v44  ;;  %9236 = vmatpush3.bf16.msra.mxu0 %v9982_v14 }
 0x86c   :  { %9237 = vmatprep.subr.bf16.mxu0 %v14053_v44 }
 0x86f   :  { %9238 = vmatpush3.bf16.msra.mxu0 %v9983_v16 }
 0x870   :  { %9239 = vmatprep.subr.bf16.mxu0 %v14053_v44 }
 0x873   :  { %9240 = vmatpush3.bf16.msra.mxu0 %v9984_v62 }
 0x874   :  { %9241 = vmatprep.subr.bf16.mxu0 %v14053_v44 }
 0x877   :  { %9242 = vmatpush3.bf16.msra.mxu0 %v9985_v0 }
 0x878   :  { %9243 = vmatprep.subr.bf16.mxu0 %v14053_v44 }
 0x87b   :  { %9244 = vmatpush3.bf16.msra.mxu0 %v9986_v22 }
 0x87c   :  { %9245 = vmatprep.subr.bf16.mxu0 %v14053_v44 }
 0x87f   :  { %9246 = vmatpush3.bf16.msra.mxu0 %v9987_v23 }
 0x880   :  { %9247 = vmatprep.subr.bf16.mxu0 %v14053_v44 }
 0x883   :  { %9248 = vmatpush3.bf16.msra.mxu0 %v9988_v31 }
 0x884   :  { %9249 = vmatprep.subr.bf16.mxu0 %v14053_v44 }
 0x887   :  { %9250 = vmatpush3.bf16.msra.mxu0 %v9989_v32 }
 0x93d   :  { %v7533_v27 = vpop.f32.mrb[120].mxu0 }
 0x93e   :  { %v7534_v35 = vadd.f32 %v8538_v56, %v7533_v27  ;;  %v9213_v36 = vpop.f32.mrb[121].mxu0 }
 0x93f   :  { %v7536_v37 = vpop.f32.mrb[122].mxu0 }
 0x940   :  { %vm7539_vm3 = vcmp.gt.f32.partialorder %v7534_v35, 0.0  ;;  %v7540_v28 = vmul.f32 0.01, %v7534_v35  ;;  %v9214_v38 = vpop.f32.mrb[123].mxu0 }
 0x942   :  { %v7541_v29 = vsel %vm7539_vm3, %v7534_v35, %v7540_v28 }
 0x943   :  { %v7542_v30 = vpack.c.bf16 %v7541_v29, %v7541_v29 }
 0x945   :  { %9232 = vmatmul.mubr.bf16.vlgmr.msra.gmra.mrb[120].mxu1 %v7542_v30 }
 0x946   :  { %9271 = vmatprep.mubr.msk.bf16.mxu1 %vm10095_vm0, %v14053_v44  ;;  %9256 = vmatpush3.bf16.msra.mxu1 %v9990_v33 }
 0x947   :  { %9257 = vmatprep.subr.bf16.mxu1 %v14053_v44 }
 0x94a   :  { %9258 = vmatpush3.bf16.msra.mxu1 %v9991_v34 }
 0x94b   :  { %9259 = vmatprep.subr.bf16.mxu1 %v14053_v44 }
 0x94e   :  { %9260 = vmatpush3.bf16.msra.mxu1 %v9992_v17 }
 0x94f   :  { %9261 = vmatprep.subr.bf16.mxu1 %v14053_v44 }
 0x952   :  { %9262 = vmatpush3.bf16.msra.mxu1 %v9993_v2 }
 0x953   :  { %9263 = vmatprep.subr.bf16.mxu1 %v14053_v44 }
 0x956   :  { %9264 = vmatpush3.bf16.msra.mxu1 %v9994_v43 }
 0x957   :  { %9265 = vmatprep.subr.bf16.mxu1 %v14053_v44 }
 0x95a   :  { %9266 = vmatpush3.bf16.msra.mxu1 %v9995_v8 }
 0x95b   :  { %9267 = vmatprep.subr.bf16.mxu1 %v14053_v44 }
 0x95e   :  { %9268 = vmatpush3.bf16.msra.mxu1 %v9996_v59 }
 0x95f   :  { %9269 = vmatprep.subr.bf16.mxu1 %v14053_v44 }
 0x962   :  { %9270 = vmatpush3.bf16.msra.mxu1 %v9997_v49 }
 0xa18   :  { %v7648_v19 = vpop.f32.mrb[120].mxu1 }
 0xa19   :  { %v7649_v11 = vadd.f32 %v8547_v48, %v7648_v19  ;;  %v9233_v61 = vpop.f32.mrb[121].mxu1 }
 0xa1a   :  { %v7651_v10 = vpop.f32.mrb[122].mxu1 }
 0xa1b   :  { %vm7654_vm4 = vcmp.gt.f32.partialorder %v7649_v11, 0.0  ;;  %v7655_v53 = vmul.f32 0.01, %v7649_v11  ;;  %v9234_v54 = vpop.f32.mrb[123].mxu1 }
 0xa1d   :  { %v7656_v4 = vsel %vm7654_vm4, %v7649_v11, %v7655_v53 }
 0xa1e   :  { %v7657_v21 = vpack.c.bf16 %v7656_v4, %v7656_v4 }
 0xa20   :  { %9252 = vmatmul.mubr.bf16.vlgmr.msra.gmra.mrb[124].mxu0 %v7657_v21 }
 0xaf3   :  { %v7763_v24 = vpop.f32.mrb[124].mxu0 }
 0xaf4   :  { %v7764_v63 = vadd.f32 %v8556_v47, %v7763_v24  ;;  %v9253_v60 = vpop.f32.mrb[125].mxu0 }
 0xaf5   :  { %v7766_v7 = vpop.f32.mrb[126].mxu0 }
 0xaf6   :  { %v7769_v40 = vmul.f32 %v7764_v63, %v13456_v15  ;;  %v9254_v3 = vpop.f32.mrb[127].mxu0 }
 0xaf8   :  { %v7770_v12 = vpack.c.bf16 %v7769_v40, %v7769_v40 }
 0xafa   :  { %9272 = vmatmul.mubr.bf16.vlgmr.msra.gmra.mrb[124].mxu1 %v7770_v12 }
 0xbcd   :  { %v7869_v51 = vpop.f32.mrb[124].mxu1 }
 0xbce   :  { %7875 = vst [vmem:[%s13706_s17] sm:$0xff] %v7869_v51  ;;  %v9273_v44 = vpop.f32.mrb[125].mxu1 }
 0xbcf   :  { %v7872_v9 = vpop.f32.mrb[126].mxu1 }
 0xbd0   :  { %v9274_v41 = vpop.f32.mrb[127].mxu1 }

</bundles_post_ra>
